<compile_context>
chip_gen: v5e
topology: v5e:2x2
jax: 0.10.0
libtpu: 0.0.40
codegen_flags: <defaults>
</compile_context>

<pallas_src>
import functools

import jax
import jax.numpy as jnp
from jax.experimental import pallas as pl
from jax.experimental.pallas import tpu as pltpu

_LANES = 1024          # preferred lane-dense slab width (multiple of 128)
_SMALL_N = 1 << 20     # below this element count, plain XLA add wins


def _add_one_kernel(x_ref, o_ref):
    # Elementwise VPU add on the resident VMEM tile.
    o_ref[...] = x_ref[...] + jnp.asarray(1, dtype=o_ref.dtype)


def _sublane_multiple(dtype) -> int:
    # Minimum second-minor tile multiple for packed dtypes:
    # 8 (f32), 16 (bf16), 32 (int8 / fp8).
    itemsize = jnp.dtype(dtype).itemsize
    return max(8, 32 // max(itemsize, 1))


def _round_up(a: int, b: int) -> int:
    return ((a + b - 1) // b) * b


@functools.lru_cache(maxsize=None)
def _tile_budget():
    """Returns (tile_bytes_per_buffer, vmem_limit_bytes), generation-gated."""
    try:
        vmem_cap = int(pltpu.get_tpu_info().vmem_capacity_bytes)
    except Exception:
        vmem_cap = 64 << 20                      # conservative (v7x-sized) default
    if vmem_cap >= (100 << 20):                  # v5e / v6e: 128 MiB physical VMEM
        return 16 << 20, 72 << 20                # 4 double-buffered bufs = 64 MiB
    return 8 << 20, 40 << 20                     # v7x: 64 MiB physical per TC


def _pick_width(n: int):
    # Largest lane-dense slab width that divides n (free bitcast, no padding).
    for w in (1024, 512, 256, 128):
        if n % w == 0:
            return w
    return None


def _add_one_slab(x2d: jax.Array, donate_input: bool) -> jax.Array:
    rows, width = x2d.shape
    dtype = x2d.dtype
    sub = _sublane_multiple(dtype)
    itemsize = jnp.dtype(dtype).itemsize
    tile_bytes, vmem_limit = _tile_budget()

    # Constant-byte tiles across dtypes, rounded down to the sublane multiple.
    cap = max(sub, (tile_bytes // (width * itemsize)) // sub * sub)
    if rows <= cap:
        # Whole slab fits in one tile: split into (at least) two row blocks so
        # both v7x TensorCores get work on the "parallel" grid axis.
        tile_rows = max(sub, _round_up(pl.cdiv(rows, 2), sub))
        tile_rows = min(tile_rows, rows)
    else:
        tile_rows = cap
    grid = (pl.cdiv(rows, tile_rows),)

    extra = {}
    if donate_input:
        extra["input_output_aliases"] = {0: 0}

    return pl.pallas_call(
        _add_one_kernel,
        out_shape=jax.ShapeDtypeStruct((rows, width), dtype),
        grid=grid,
        in_specs=[pl.BlockSpec((tile_rows, width), lambda i: (i, 0))],
        out_specs=pl.BlockSpec((tile_rows, width), lambda i: (i, 0)),
        compiler_params=pltpu.CompilerParams(
            dimension_semantics=("parallel",),   # shard row tiles across v7x's 2 TCs
            vmem_limit_bytes=vmem_limit,
        ),
        **extra,
    )(x2d)


def tudui_forward(x, *, donate_input: bool = False) -> jax.Array:
    """Pallas equivalent of TuDui.forward: returns x + 1 (same shape/dtype)."""
    x = jnp.asarray(x)
    orig_shape = x.shape
    dtype = x.dtype
    n = x.size

    # Tiny tensors (incl. the scalar from the reference usage): a fused XLA add
    # is already at HBM roofline; a custom call only adds fixed overhead.
    if n < _SMALL_N:
        return x + jnp.asarray(1, dtype=dtype)

    flat = x.reshape(-1)
    width = _pick_width(n)
    if width is not None:
        # Free bitcast into a lane-dense slab. A partial final row-block (rows
        # not a multiple of the tile) is masked by Pallas -- no pad, no slice.
        out = _add_one_slab(flat.reshape(n // width, width), donate_input)
        return out.reshape(orig_shape)

    # Truly ragged element count: aligned main slab via Pallas plus a tiny
    # (<1024-element) tail via plain XLA -- no full-size pad / slice passes.
    n_main = (n // _LANES) * _LANES
    main = flat[:n_main].reshape(n_main // _LANES, _LANES)
    tail = flat[n_main:]
    out_main = _add_one_slab(main, donate_input)
    out = jnp.concatenate(
        [out_main.reshape(-1), tail + jnp.asarray(1, dtype=dtype)])
    return out.reshape(orig_shape)


if __name__ == "__main__":
    key = jax.random.PRNGKey(0)
    k1, k2, k3, k4, k5 = jax.random.split(key, 5)

    # 1) Mirrors the reference usage: x = torch.tensor(1.0); output = tudui(x).
    x_scalar = jnp.asarray(1.0, dtype=jnp.float32)
    out_scalar = jax.block_until_ready(tudui_forward(x_scalar))
    assert out_scalar.shape == ()
    assert jnp.allclose(out_scalar, 2.0)

    # 2) Small tensor (below threshold -> fused XLA fast path).
    x_small = jax.random.normal(k1, (2, 4, 16, 16), dtype=jnp.float32)
    out_small = jax.block_until_ready(tudui_forward(x_small))
    assert out_small.shape == x_small.shape
    assert jnp.allclose(out_small, x_small + 1.0)

    # 3) Large aligned tensor -> Pallas lane-dense slab, 2 "parallel" row blocks.
    x_large = jax.random.normal(k2, (8, 16, 128, 128), dtype=jnp.float32)
    out_large = jax.block_until_ready(tudui_forward(x_large))
    assert out_large.shape == x_large.shape
    assert jnp.allclose(out_large, x_large + 1.0)

    # 4) Large ragged tensor (odd element count) -> aligned main slab + tiny XLA
    #    tail; partial final row-block masked by Pallas. No pad/slice passes.
    x_ragged = jax.random.normal(k3, (1237, 1021), dtype=jnp.float32)
    out_ragged = jax.block_until_ready(tudui_forward(x_ragged))
    assert out_ragged.shape == x_ragged.shape
    assert jnp.allclose(out_ragged, x_ragged + 1.0)

    # 5) bf16 -> constant-byte tiles with 16-row sublane alignment.
    x_bf16 = jax.random.normal(k4, (1024, 2048), dtype=jnp.bfloat16)
    out_bf16 = jax.block_until_ready(tudui_forward(x_bf16))
    assert out_bf16.shape == x_bf16.shape
    assert out_bf16.dtype == jnp.bfloat16
    assert jnp.allclose(out_bf16.astype(jnp.float32),
                        (x_bf16 + jnp.asarray(1, jnp.bfloat16)).astype(jnp.float32))

    # 6) Donated / in-place variant: output aliases the donated input buffer
    #    (input_output_aliases={0: 0} inside the pallas_call).
    x_donate = jax.random.normal(k5, (1024, 1024), dtype=jnp.float32)
    expected = jax.block_until_ready(x_donate + 1.0)
    add_one_inplace = jax.jit(
        functools.partial(tudui_forward, donate_input=True), donate_argnums=0)
    out_donate = jax.block_until_ready(add_one_inplace(x_donate))
    assert out_donate.shape == expected.shape
    assert jnp.allclose(out_donate, expected)

    print("KERNEL_OK")
</pallas_src>

<mosaic_0001>
module attributes {stable_mosaic.version = 11 : i64} {
  func.func @_add_one_kernel(%arg0: i32, %arg1: memref<1024x1024xf32, #tpu.memory_space<vmem>>, %arg2: memref<1024x1024xf32, #tpu.memory_space<vmem>>) attributes {dimension_semantics = [#tpu.dimension_semantics<parallel>], iteration_bounds = array<i64: 2>, scalar_prefetch = 0 : i64, scratch_operands = 0 : i64, tpu.core_type = #tpu.core_type<tc>, window_params = [{transform_indices = @transform_0, window_bounds = array<i64: 1024, 1024>}, {transform_indices = @transform_1, window_bounds = array<i64: 1024, 1024>}]} {
    %c0 = arith.constant 0 : index
    %c0_0 = arith.constant 0 : index
    %0 = vector.load %arg1[%c0, %c0_0] : memref<1024x1024xf32, #tpu.memory_space<vmem>>, vector<1024x1024xf32>
    %cst = arith.constant 1.000000e+00 : f32
    %1 = vector.broadcast %cst : f32 to vector<1024x1024xf32>
    %2 = arith.addf %0, %1 : vector<1024x1024xf32>
    %c0_1 = arith.constant 0 : index
    %c0_2 = arith.constant 0 : index
    %3 = vector.load %arg2[%c0_1, %c0_2] : memref<1024x1024xf32, #tpu.memory_space<vmem>>, vector<1024x1024xf32>
    tpu.vector_store %arg2[%c0_1, %c0_2], %2 {strides = array<i32>} : memref<1024x1024xf32, #tpu.memory_space<vmem>>, vector<1024x1024xf32>,
    return
  }
  func.func @transform_0(%arg0: i32) -> (i32, i32) {
    %c0_i32 = arith.constant 0 : i32
    %c0_i32_0 = arith.constant 0 : i32
    return %arg0, %c0_i32 : i32, i32
  }
  func.func @transform_1(%arg0: i32) -> (i32, i32) {
    %c0_i32 = arith.constant 0 : i32
    %c0_i32_0 = arith.constant 0 : i32
    return %arg0, %c0_i32 : i32, i32
  }
}

</mosaic_0001>

<bundles_post_ra>
// kernel: tpu_custom_call.1
= control target key start
LH: loop header
LB: loop body
LE: loop exit
PB: predicated region body
PF: predicated region fallthrough
CT: control target
= control target key end

     0   :  { %6 = vsyncpa [#allocation3], 0  ;;  %s5664_s0 = inlined_call_operand.hbm [shape: f32[2048,1024], index: 0, kind: input, shape index: {}]   ;;  %s5665_s1 = inlined_call_operand.hbm [shape: f32[2048,1024], index: 1, kind: output, shape index: {}]  }
   0x1   :  { %8 = vsyncpa [#allocation3 + $0x1], 0 }
   0x2   :  { %9 = vsyncpa [#allocation4], 0 }
   0x3   :  { %11 = vsyncpa [#allocation4 + $0x1], 0  ;;  %s3484_s6 = smov 0   ;;  %s3486_s7 = smov 0  }
   0x4   :  { %s3488_s8 = smov 0   ;;  %s3490_s9 = smov 0  }
   0x5 LB: > { %s3505_s10 = sadd.s32 4294967295, %s3468_s9   ;;  %s3302_s11 = sadd.s32 4294967294, %s3468_s9   ;;  %s3468_s9 = sphi %s3490_s9, %s5675_s9   ;;  %s3464_s8 = sphi %s3488_s8, %s5674_s8   ;;  %s3460_s7 = sphi %s3486_s7, %s5673_s7   ;;  %s3456_s6 = sphi %s3484_s6, %s5672_s6  }
   0x6   : > { %s3509_s12 = sadd.s32 1, %s3468_s9   ;;  %s24_s13 = sadd.s32 1, %s3464_s8 }
   0x7   : > { %s21_s14 = ssub.s32 %s3468_s9, %s3509_s12  ;;  %p31_p0 = scmp.ne.s32.totalorder %s3464_s8, %s3460_s7 }
   0x8   : > { %p22_p1 = scmp.eq.s32.totalorder %s21_s14, 0  ;;  %p32_p2 = scmp.eq.s32.totalorder %s3468_s9, 0 }
   0x9   : > { %p37_p3 = scmp.ne.s32.totalorder %s3460_s7, %s3456_s6  ;;  %p38_p4 = scmp.eq.s32.totalorder %s3505_s10, 0 }
   0xa   : > { %s3521_s15 = scalar_select %p22_p1, %s3464_s8, %s24_s13  }
   0xb   : > { %p3523_p5 = por %p32_p2, %p31_p0  ;;  %p3527_p6 = por %p38_p4, %p37_p3 }
   0xc   : > { %p61_p7 = scmp.eq.s32.totalorder %s3505_s10, 1  ;;  %p67_p8 = scmp.eq.s32.totalorder %s3302_s11, 1 }
   0xd   : > { %p3334_p10 = scmp.lt.s32.totalorder %s3468_s9, 2  ;;  %s87_s20 = sand.u32 1, %s3464_s8  }
   0xe   : > { %p3534_p11 = por %p61_p7, %p31_p0  ;;  %p3538_p12 = por %p67_p8, %p37_p3 }
   0xf   : > { %s3319_s21 = sshll.u32 %s3468_s9, 13  ;;  %s3305_s22 = sshll.u32 %s87_s20, 13 }
  0x10   : > { %s97_s25 = scalar_lea.hbm %s5664_s0, %s3319_s21  ;;  %s91_s27 = scalar_lea.vmem [#allocation2], %s3305_s22 }
  0x11   : > { %s98_s26 = sshll.u32 %s97_s25, 4  ;;  %s100_s28 = sshll.u32 %s91_s27, 4  ;;  %s99_s26 = int_to_ptr.hbm [resolvable:$true] %s98_s26  ;;  %s101_s28 = int_to_ptr.vmem [resolvable:$true] %s100_s28 }
  0x12   : > { %p3549_p13 = pnand %p3334_p10, %p3523_p5  ;;  %p3309_p0 = scmp.ge.s32.totalorder %s3468_s9, 1 }
  0x13   : > { %p108_p1 = scmp.lt.s32.totalorder %s3468_s9, 3  ;;  %s88_s30 = scalar_lea.sflag [#allocation3], %s87_s20 }
  0x14   : > { %s3372_s2 = sshra.s32 %s99_s26, 4  ;;  %p3376_p3 = pneg %p3549_p13  ;;  %s3373_s2 = int_to_ptr.hbm [resolvable:$true] %s3372_s2 }
  0x15   : > { %s3374_s3 = scalar_lea.hbm %s3373_s2, 8192  ;;  %s3379_s11 = scalar_lea.hbm %s5664_s0, 16384 }
  0x16   : > { %p3375_p2 = scmp.ne.s32.totalorder %s3373_s2, %s3374_s3  ;;  %p3380_p5 = scmp.lt.s32.totalorder %s3373_s2, %s5664_s0 }
  0x17   : > { %p3381_p8 = scmp.lt.s32.totalorder %s3379_s11, %s3374_s3 }
  0x18   : > { %p3377_p4 = pnand %p3376_p3, %p3375_p2 }
  0x19   : > { %p3382_p10 = por %p3381_p8, %p3380_p5 }
  0x1a   : > { %p3378_p7 = pneg %p3377_p4 }
  0x1c   : > { %p3383_p9 = pnand %p3382_p10, %p3378_p7 }
  0x1e   : > { %3386 = shalt.err (!%p3383_p9)
}
  0x1f   : > { %s3470_s16 = smov 1024   ;;  %s3471_s20 = smov 64  }
  0x20   : > { %3329 = dma.hbm_to_vmem [thread:$0]  (!%p3549_p13), %s99_s26, 131072, %s101_s28, %s88_s30, %s3470_s16, %s3470_s16, %s3471_s20  }
  0x21   : > { %p109_p2 = pnand %p3309_p0, %p108_p1 }
  0x22   : > { %s3570_s21 = sand.u32 (!%p109_p2), 1, %s3460_s7  }
  0x23   : > { %112 = sbr.rel (%p109_p2) target bundleno = 1071 (0x42f), region = 24  ;;  %s3310_s22 = sshll.u32 (!%p109_p2), %s3570_s21, 13 }
  0x24   : > { %s115_s23 = scalar_lea.sflag (!%p109_p2), [#allocation3], %s3570_s21  ;;  %s3574_s24 = scalar_lea.vmem (!%p109_p2), [#allocation2], %s3310_s22 }
  0x28   : > { %3447 = dma.done.wait (%p3527_p6), %s115_s23, 131072  }
  0x29   : > { %3449 = vsyncadd (%p3527_p6), %s115_s23, 4294836224  ;;  %v140_v0 = vld [vmem:[%s3574_s24] sm:$0xff]  ;;  %v141_v1 = vld [vmem:[%s3574_s24 + $0x8] sm:$0xff]  ;;  %s3587_s17 = scalar_lea.vmem [#allocation5], %s3310_s22  ;;  %s3321_s25 = sshll.u32 %s3505_s10, 13 }
  0x2a   : > { %v142_v2 = vld [vmem:[%s3574_s24 + $0x10] sm:$0xff]  ;;  %v1164_v3 = vadd.f32 1.0, %v140_v0  ;;  %v1165_v4 = vadd.f32 1.0, %v141_v1  ;;  %v143_v6 = vld [vmem:[%s3574_s24 + $0x18] sm:$0xff]  ;;  %v144_v7 = vld [vmem:[%s3574_s24 + $0x20] sm:$0xff]  ;;  %s3225_s28 = scalar_lea.hbm %s5665_s1, %s3321_s25  ;;  %s3226_s10 = sshll.u32 %s3587_s17, 4  ;;  %s3227_s10 = int_to_ptr.vmem [resolvable:$true] %s3226_s10 }
  0x2b   : > { %v1166_v5 = vadd.f32 1.0, %v142_v2  ;;  %v145_v8 = vld [vmem:[%s3574_s24 + $0x28] sm:$0xff]  ;;  %v1167_v9 = vadd.f32 1.0, %v143_v6  ;;  %v146_v10 = vld [vmem:[%s3574_s24 + $0x30] sm:$0xff]  ;;  %v1168_v11 = vadd.f32 1.0, %v144_v7  ;;  %v147_v12 = vld [vmem:[%s3574_s24 + $0x38] sm:$0xff] }
  0x2c   : > { %2188 = vst [vmem:[%s3587_s17] sm:$0xff] %v1164_v3  ;;  %v1169_v13 = vadd.f32 1.0, %v145_v8  ;;  %v148_v14 = vld [vmem:[%s3574_s24 + $0x40] sm:$0xff]  ;;  %v1170_v15 = vadd.f32 1.0, %v146_v10  ;;  %v149_v16 = vld [vmem:[%s3574_s24 + $0x48] sm:$0xff]  ;;  %v1171_v17 = vadd.f32 1.0, %v147_v12  ;;  %v150_v18 = vld [vmem:[%s3574_s24 + $0x50] sm:$0xff] }
  0x2d   : > { %2189 = vst [vmem:[%s3587_s17 + $0x8] sm:$0xff] %v1165_v4  ;;  %v1172_v19 = vadd.f32 1.0, %v148_v14  ;;  %v151_v20 = vld [vmem:[%s3574_s24 + $0x58] sm:$0xff]  ;;  %v1173_v21 = vadd.f32 1.0, %v149_v16  ;;  %v152_v22 = vld [vmem:[%s3574_s24 + $0x60] sm:$0xff]  ;;  %v1174_v23 = vadd.f32 1.0, %v150_v18 }
  0x2e   : > { %2190 = vst [vmem:[%s3587_s17 + $0x10] sm:$0xff] %v1166_v5  ;;  %v153_v24 = vld [vmem:[%s3574_s24 + $0x68] sm:$0xff]  ;;  %v1175_v25 = vadd.f32 1.0, %v151_v20  ;;  %v154_v26 = vld [vmem:[%s3574_s24 + $0x70] sm:$0xff]  ;;  %v1176_v27 = vadd.f32 1.0, %v152_v22  ;;  %v155_v28 = vld [vmem:[%s3574_s24 + $0x78] sm:$0xff] }
  0x2f   : > { %2191 = vst [vmem:[%s3587_s17 + $0x18] sm:$0xff] %v1167_v9  ;;  %v1177_v29 = vadd.f32 1.0, %v153_v24  ;;  %v156_v30 = vld [vmem:[%s3574_s24 + $0x80] sm:$0xff]  ;;  %v1178_v31 = vadd.f32 1.0, %v154_v26  ;;  %v157_v32 = vld [vmem:[%s3574_s24 + $0x88] sm:$0xff]  ;;  %v1179_v33 = vadd.f32 1.0, %v155_v28 }
  0x30   : > { %2192 = vst [vmem:[%s3587_s17 + $0x20] sm:$0xff] %v1168_v11  ;;  %v158_v34 = vld [vmem:[%s3574_s24 + $0x90] sm:$0xff]  ;;  %v1180_v35 = vadd.f32 1.0, %v156_v30  ;;  %v159_v36 = vld [vmem:[%s3574_s24 + $0x98] sm:$0xff]  ;;  %v1181_v37 = vadd.f32 1.0, %v157_v32  ;;  %v160_v38 = vld [vmem:[%s3574_s24 + $0xa0] sm:$0xff] }
  0x31   : > { %2193 = vst [vmem:[%s3587_s17 + $0x28] sm:$0xff] %v1169_v13  ;;  %v1182_v39 = vadd.f32 1.0, %v158_v34  ;;  %v161_v40 = vld [vmem:[%s3574_s24 + $0xa8] sm:$0xff]  ;;  %v1183_v41 = vadd.f32 1.0, %v159_v36  ;;  %v162_v42 = vld [vmem:[%s3574_s24 + $0xb0] sm:$0xff]  ;;  %v1184_v43 = vadd.f32 1.0, %v160_v38 }
  0x32   : > { %2194 = vst [vmem:[%s3587_s17 + $0x30] sm:$0xff] %v1170_v15  ;;  %v163_v44 = vld [vmem:[%s3574_s24 + $0xb8] sm:$0xff]  ;;  %v1185_v45 = vadd.f32 1.0, %v161_v40  ;;  %v164_v46 = vld [vmem:[%s3574_s24 + $0xc0] sm:$0xff]  ;;  %v1186_v47 = vadd.f32 1.0, %v162_v42  ;;  %v165_v48 = vld [vmem:[%s3574_s24 + $0xc8] sm:$0xff] }
  0x33   : > { %2195 = vst [vmem:[%s3587_s17 + $0x38] sm:$0xff] %v1171_v17  ;;  %v1187_v49 = vadd.f32 1.0, %v163_v44  ;;  %v166_v50 = vld [vmem:[%s3574_s24 + $0xd0] sm:$0xff]  ;;  %v1188_v51 = vadd.f32 1.0, %v164_v46  ;;  %v167_v52 = vld [vmem:[%s3574_s24 + $0xd8] sm:$0xff]  ;;  %v1189_v53 = vadd.f32 1.0, %v165_v48 }
  0x34   : > { %2196 = vst [vmem:[%s3587_s17 + $0x40] sm:$0xff] %v1172_v19  ;;  %v168_v54 = vld [vmem:[%s3574_s24 + $0xe0] sm:$0xff]  ;;  %v1190_v55 = vadd.f32 1.0, %v166_v50  ;;  %v169_v56 = vld [vmem:[%s3574_s24 + $0xe8] sm:$0xff]  ;;  %v1191_v57 = vadd.f32 1.0, %v167_v52  ;;  %v170_v58 = vld [vmem:[%s3574_s24 + $0xf0] sm:$0xff] }
  0x35   : > { %2197 = vst [vmem:[%s3587_s17 + $0x48] sm:$0xff] %v1173_v21  ;;  %v1192_v59 = vadd.f32 1.0, %v168_v54  ;;  %v171_v60 = vld [vmem:[%s3574_s24 + $0xf8] sm:$0xff]  ;;  %v1193_v61 = vadd.f32 1.0, %v169_v56  ;;  %v172_v62 = vld [vmem:[%s3574_s24 + $0x100] sm:$0xff]  ;;  %v1194_v63 = vadd.f32 1.0, %v170_v58 }
  0x36   : > { %2198 = vst [vmem:[%s3587_s17 + $0x50] sm:$0xff] %v1174_v23  ;;  %v173_v0 = vld [vmem:[%s3574_s24 + $0x108] sm:$0xff]  ;;  %v1195_v1 = vadd.f32 1.0, %v171_v60  ;;  %v174_v2 = vld [vmem:[%s3574_s24 + $0x110] sm:$0xff]  ;;  %v1196_v3 = vadd.f32 1.0, %v172_v62  ;;  %v175_v4 = vld [vmem:[%s3574_s24 + $0x118] sm:$0xff] }
  0x37   : > { %2199 = vst [vmem:[%s3587_s17 + $0x58] sm:$0xff] %v1175_v25  ;;  %v1197_v5 = vadd.f32 1.0, %v173_v0  ;;  %v176_v6 = vld [vmem:[%s3574_s24 + $0x120] sm:$0xff]  ;;  %v1198_v7 = vadd.f32 1.0, %v174_v2  ;;  %v177_v8 = vld [vmem:[%s3574_s24 + $0x128] sm:$0xff]  ;;  %v1199_v9 = vadd.f32 1.0, %v175_v4 }
  0x38   : > { %2200 = vst [vmem:[%s3587_s17 + $0x60] sm:$0xff] %v1176_v27  ;;  %v178_v10 = vld [vmem:[%s3574_s24 + $0x130] sm:$0xff]  ;;  %v1200_v11 = vadd.f32 1.0, %v176_v6  ;;  %v179_v12 = vld [vmem:[%s3574_s24 + $0x138] sm:$0xff]  ;;  %v1201_v13 = vadd.f32 1.0, %v177_v8  ;;  %v180_v14 = vld [vmem:[%s3574_s24 + $0x140] sm:$0xff] }
  0x39   : > { %2201 = vst [vmem:[%s3587_s17 + $0x68] sm:$0xff] %v1177_v29  ;;  %v1202_v15 = vadd.f32 1.0, %v178_v10  ;;  %v181_v16 = vld [vmem:[%s3574_s24 + $0x148] sm:$0xff]  ;;  %v1203_v17 = vadd.f32 1.0, %v179_v12  ;;  %v182_v18 = vld [vmem:[%s3574_s24 + $0x150] sm:$0xff]  ;;  %v1204_v19 = vadd.f32 1.0, %v180_v14 }
  0x3a   : > { %2202 = vst [vmem:[%s3587_s17 + $0x70] sm:$0xff] %v1178_v31  ;;  %v183_v20 = vld [vmem:[%s3574_s24 + $0x158] sm:$0xff]  ;;  %v1205_v21 = vadd.f32 1.0, %v181_v16  ;;  %v184_v22 = vld [vmem:[%s3574_s24 + $0x160] sm:$0xff]  ;;  %v1206_v23 = vadd.f32 1.0, %v182_v18  ;;  %v185_v24 = vld [vmem:[%s3574_s24 + $0x168] sm:$0xff] }
  0x3b   : > { %2203 = vst [vmem:[%s3587_s17 + $0x78] sm:$0xff] %v1179_v33  ;;  %v1207_v25 = vadd.f32 1.0, %v183_v20  ;;  %v186_v26 = vld [vmem:[%s3574_s24 + $0x170] sm:$0xff]  ;;  %v1208_v27 = vadd.f32 1.0, %v184_v22  ;;  %v187_v28 = vld [vmem:[%s3574_s24 + $0x178] sm:$0xff]  ;;  %v1209_v29 = vadd.f32 1.0, %v185_v24 }
  0x3c   : > { %2204 = vst [vmem:[%s3587_s17 + $0x80] sm:$0xff] %v1180_v35  ;;  %v188_v30 = vld [vmem:[%s3574_s24 + $0x180] sm:$0xff]  ;;  %v1210_v31 = vadd.f32 1.0, %v186_v26  ;;  %v189_v32 = vld [vmem:[%s3574_s24 + $0x188] sm:$0xff]  ;;  %v1211_v33 = vadd.f32 1.0, %v187_v28  ;;  %v190_v34 = vld [vmem:[%s3574_s24 + $0x190] sm:$0xff] }
  0x3d   : > { %2205 = vst [vmem:[%s3587_s17 + $0x88] sm:$0xff] %v1181_v37  ;;  %v1212_v35 = vadd.f32 1.0, %v188_v30  ;;  %v191_v36 = vld [vmem:[%s3574_s24 + $0x198] sm:$0xff]  ;;  %v1213_v37 = vadd.f32 1.0, %v189_v32  ;;  %v192_v38 = vld [vmem:[%s3574_s24 + $0x1a0] sm:$0xff]  ;;  %v193_v40 = vld [vmem:[%s3574_s24 + $0x1a8] sm:$0xff] }
  0x3e   : > { %2206 = vst [vmem:[%s3587_s17 + $0x90] sm:$0xff] %v1182_v39  ;;  %v1214_v39 = vadd.f32 1.0, %v190_v34  ;;  %v194_v42 = vld [vmem:[%s3574_s24 + $0x1b0] sm:$0xff]  ;;  %v195_v44 = vld [vmem:[%s3574_s24 + $0x1b8] sm:$0xff]  ;;  %v196_v46 = vld [vmem:[%s3574_s24 + $0x1c0] sm:$0xff]  ;;  %s3228_s29 = sshll.u32 %s3225_s28, 4  ;;  %s3229_s29 = int_to_ptr.hbm [resolvable:$true] %s3228_s29 }
  0x3f   : > { %2207 = vst [vmem:[%s3587_s17 + $0x98] sm:$0xff] %v1183_v41  ;;  %v1215_v41 = vadd.f32 1.0, %v191_v36  ;;  %v197_v48 = vld [vmem:[%s3574_s24 + $0x1c8] sm:$0xff]  ;;  %v198_v50 = vld [vmem:[%s3574_s24 + $0x1d0] sm:$0xff]  ;;  %v199_v52 = vld [vmem:[%s3574_s24 + $0x1d8] sm:$0xff]  ;;  %s3213_s30 = scalar_lea.sflag [#allocation4], %s3570_s21 }
  0x40   : > { %2208 = vst [vmem:[%s3587_s17 + $0xa0] sm:$0xff] %v1184_v43  ;;  %v1216_v43 = vadd.f32 1.0, %v192_v38  ;;  %v200_v54 = vld [vmem:[%s3574_s24 + $0x1e0] sm:$0xff]  ;;  %v201_v56 = vld [vmem:[%s3574_s24 + $0x1e8] sm:$0xff]  ;;  %v202_v58 = vld [vmem:[%s3574_s24 + $0x1f0] sm:$0xff]  ;;  %s3416_s2 = sshra.s32 %s3229_s29, 4  ;;  %s3417_s2 = int_to_ptr.hbm [resolvable:$true] %s3416_s2 }
  0x41   : > { %2209 = vst [vmem:[%s3587_s17 + $0xa8] sm:$0xff] %v1185_v45  ;;  %v1217_v45 = vadd.f32 1.0, %v193_v40  ;;  %v203_v60 = vld [vmem:[%s3574_s24 + $0x1f8] sm:$0xff]  ;;  %v204_v62 = vld [vmem:[%s3574_s24 + $0x200] sm:$0xff]  ;;  %v205_v0 = vld [vmem:[%s3574_s24 + $0x208] sm:$0xff]  ;;  %s3418_s3 = scalar_lea.hbm %s3417_s2, 8192  ;;  %p3423_p0 = scmp.lt.s32.totalorder %s3417_s2, %s5665_s1 }
  0x42   : > { %2210 = vst [vmem:[%s3587_s17 + $0xb0] sm:$0xff] %v1186_v47  ;;  %v1218_v47 = vadd.f32 1.0, %v194_v42  ;;  %v206_v2 = vld [vmem:[%s3574_s24 + $0x210] sm:$0xff]  ;;  %v207_v4 = vld [vmem:[%s3574_s24 + $0x218] sm:$0xff]  ;;  %v208_v6 = vld [vmem:[%s3574_s24 + $0x220] sm:$0xff]  ;;  %p3419_p6 = scmp.ne.s32.totalorder %s3417_s2, %s3418_s3  ;;  %s3422_s11 = scalar_lea.hbm %s5665_s1, 16384 }
  0x43   : > { %2211 = vst [vmem:[%s3587_s17 + $0xb8] sm:$0xff] %v1187_v49  ;;  %v1219_v49 = vadd.f32 1.0, %v195_v44  ;;  %v209_v8 = vld [vmem:[%s3574_s24 + $0x228] sm:$0xff]  ;;  %v210_v10 = vld [vmem:[%s3574_s24 + $0x230] sm:$0xff]  ;;  %v211_v12 = vld [vmem:[%s3574_s24 + $0x238] sm:$0xff]  ;;  %p3424_p1 = scmp.lt.s32.totalorder %s3422_s11, %s3418_s3 }
  0x44   : > { %2212 = vst [vmem:[%s3587_s17 + $0xc0] sm:$0xff] %v1188_v51  ;;  %v1220_v51 = vadd.f32 1.0, %v196_v46  ;;  %v212_v14 = vld [vmem:[%s3574_s24 + $0x240] sm:$0xff]  ;;  %v213_v16 = vld [vmem:[%s3574_s24 + $0x248] sm:$0xff]  ;;  %v214_v18 = vld [vmem:[%s3574_s24 + $0x250] sm:$0xff]  ;;  %p3420_p9 = pnand %p3419_p6, %p3534_p11 }
  0x45   : > { %2213 = vst [vmem:[%s3587_s17 + $0xc8] sm:$0xff] %v1189_v53  ;;  %v1221_v53 = vadd.f32 1.0, %v197_v48  ;;  %v215_v20 = vld [vmem:[%s3574_s24 + $0x258] sm:$0xff]  ;;  %v216_v22 = vld [vmem:[%s3574_s24 + $0x260] sm:$0xff]  ;;  %v217_v24 = vld [vmem:[%s3574_s24 + $0x268] sm:$0xff]  ;;  %p3425_p3 = por %p3424_p1, %p3423_p0 }
  0x46   : > { %2214 = vst [vmem:[%s3587_s17 + $0xd0] sm:$0xff] %v1190_v55  ;;  %v1222_v55 = vadd.f32 1.0, %v198_v50  ;;  %v218_v26 = vld [vmem:[%s3574_s24 + $0x270] sm:$0xff]  ;;  %v219_v28 = vld [vmem:[%s3574_s24 + $0x278] sm:$0xff]  ;;  %v220_v30 = vld [vmem:[%s3574_s24 + $0x280] sm:$0xff]  ;;  %p3421_p13 = pneg %p3420_p9 }
  0x47   : > { %2215 = vst [vmem:[%s3587_s17 + $0xd8] sm:$0xff] %v1191_v57  ;;  %v1223_v57 = vadd.f32 1.0, %v199_v52  ;;  %v221_v32 = vld [vmem:[%s3574_s24 + $0x288] sm:$0xff]  ;;  %v222_v34 = vld [vmem:[%s3574_s24 + $0x290] sm:$0xff]  ;;  %v223_v36 = vld [vmem:[%s3574_s24 + $0x298] sm:$0xff] }
  0x48   : > { %2216 = vst [vmem:[%s3587_s17 + $0xe0] sm:$0xff] %v1192_v59  ;;  %v1224_v59 = vadd.f32 1.0, %v200_v54  ;;  %v224_v38 = vld [vmem:[%s3574_s24 + $0x2a0] sm:$0xff]  ;;  %v225_v40 = vld [vmem:[%s3574_s24 + $0x2a8] sm:$0xff]  ;;  %v226_v42 = vld [vmem:[%s3574_s24 + $0x2b0] sm:$0xff]  ;;  %p3426_p4 = pnand %p3425_p3, %p3421_p13 }
  0x49   : > { %2217 = vst [vmem:[%s3587_s17 + $0xe8] sm:$0xff] %v1193_v61  ;;  %v1225_v61 = vadd.f32 1.0, %v201_v56  ;;  %v227_v44 = vld [vmem:[%s3574_s24 + $0x2b8] sm:$0xff]  ;;  %v228_v46 = vld [vmem:[%s3574_s24 + $0x2c0] sm:$0xff]  ;;  %v229_v48 = vld [vmem:[%s3574_s24 + $0x2c8] sm:$0xff] }
  0x4a   : > { %2218 = vst [vmem:[%s3587_s17 + $0xf0] sm:$0xff] %v1194_v63  ;;  %v1226_v63 = vadd.f32 1.0, %v202_v58  ;;  %v230_v50 = vld [vmem:[%s3574_s24 + $0x2d0] sm:$0xff]  ;;  %v231_v52 = vld [vmem:[%s3574_s24 + $0x2d8] sm:$0xff]  ;;  %v232_v54 = vld [vmem:[%s3574_s24 + $0x2e0] sm:$0xff] }
  0x4b   : > { %2219 = vst [vmem:[%s3587_s17 + $0xf8] sm:$0xff] %v1195_v1  ;;  %v1227_v1 = vadd.f32 1.0, %v203_v60  ;;  %v233_v56 = vld [vmem:[%s3574_s24 + $0x2e8] sm:$0xff]  ;;  %v234_v58 = vld [vmem:[%s3574_s24 + $0x2f0] sm:$0xff]  ;;  %v235_v60 = vld [vmem:[%s3574_s24 + $0x2f8] sm:$0xff] }
  0x4c   : > { %2220 = vst [vmem:[%s3587_s17 + $0x100] sm:$0xff] %v1196_v3  ;;  %v1228_v3 = vadd.f32 1.0, %v204_v62  ;;  %v236_v62 = vld [vmem:[%s3574_s24 + $0x300] sm:$0xff] }
  0x4d   : > { %2221 = vst [vmem:[%s3587_s17 + $0x108] sm:$0xff] %v1197_v5  ;;  %v1229_v5 = vadd.f32 1.0, %v205_v0  ;;  %v237_v0 = vld [vmem:[%s3574_s24 + $0x308] sm:$0xff] }
  0x4e   : > { %2222 = vst [vmem:[%s3587_s17 + $0x110] sm:$0xff] %v1198_v7  ;;  %v1230_v7 = vadd.f32 1.0, %v206_v2  ;;  %v238_v2 = vld [vmem:[%s3574_s24 + $0x310] sm:$0xff] }
  0x4f   : > { %2223 = vst [vmem:[%s3587_s17 + $0x118] sm:$0xff] %v1199_v9  ;;  %v1231_v9 = vadd.f32 1.0, %v207_v4  ;;  %v239_v4 = vld [vmem:[%s3574_s24 + $0x318] sm:$0xff] }
  0x50   : > { %2224 = vst [vmem:[%s3587_s17 + $0x120] sm:$0xff] %v1200_v11  ;;  %v1232_v11 = vadd.f32 1.0, %v208_v6  ;;  %v240_v6 = vld [vmem:[%s3574_s24 + $0x320] sm:$0xff] }
  0x51   : > { %2225 = vst [vmem:[%s3587_s17 + $0x128] sm:$0xff] %v1201_v13  ;;  %v1233_v13 = vadd.f32 1.0, %v209_v8  ;;  %v241_v8 = vld [vmem:[%s3574_s24 + $0x328] sm:$0xff] }
  0x52   : > { %2226 = vst [vmem:[%s3587_s17 + $0x130] sm:$0xff] %v1202_v15  ;;  %v1234_v15 = vadd.f32 1.0, %v210_v10  ;;  %v242_v10 = vld [vmem:[%s3574_s24 + $0x330] sm:$0xff] }
  0x53   : > { %2227 = vst [vmem:[%s3587_s17 + $0x138] sm:$0xff] %v1203_v17  ;;  %v1235_v17 = vadd.f32 1.0, %v211_v12  ;;  %v243_v12 = vld [vmem:[%s3574_s24 + $0x338] sm:$0xff] }
  0x54   : > { %2228 = vst [vmem:[%s3587_s17 + $0x140] sm:$0xff] %v1204_v19  ;;  %v1236_v19 = vadd.f32 1.0, %v212_v14  ;;  %v244_v14 = vld [vmem:[%s3574_s24 + $0x340] sm:$0xff] }
  0x55   : > { %2229 = vst [vmem:[%s3587_s17 + $0x148] sm:$0xff] %v1205_v21  ;;  %v1237_v21 = vadd.f32 1.0, %v213_v16  ;;  %v245_v16 = vld [vmem:[%s3574_s24 + $0x348] sm:$0xff] }
  0x56   : > { %2230 = vst [vmem:[%s3587_s17 + $0x150] sm:$0xff] %v1206_v23  ;;  %v1238_v23 = vadd.f32 1.0, %v214_v18  ;;  %v246_v18 = vld [vmem:[%s3574_s24 + $0x350] sm:$0xff] }
  0x57   : > { %2231 = vst [vmem:[%s3587_s17 + $0x158] sm:$0xff] %v1207_v25  ;;  %v1239_v25 = vadd.f32 1.0, %v215_v20  ;;  %v247_v20 = vld [vmem:[%s3574_s24 + $0x358] sm:$0xff] }
  0x58   : > { %2232 = vst [vmem:[%s3587_s17 + $0x160] sm:$0xff] %v1208_v27  ;;  %v1240_v27 = vadd.f32 1.0, %v216_v22  ;;  %v248_v22 = vld [vmem:[%s3574_s24 + $0x360] sm:$0xff] }
  0x59   : > { %2233 = vst [vmem:[%s3587_s17 + $0x168] sm:$0xff] %v1209_v29  ;;  %v1241_v29 = vadd.f32 1.0, %v217_v24  ;;  %v249_v24 = vld [vmem:[%s3574_s24 + $0x368] sm:$0xff] }
  0x5a   : > { %2234 = vst [vmem:[%s3587_s17 + $0x170] sm:$0xff] %v1210_v31  ;;  %v1242_v31 = vadd.f32 1.0, %v218_v26  ;;  %v250_v26 = vld [vmem:[%s3574_s24 + $0x370] sm:$0xff] }
  0x5b   : > { %2235 = vst [vmem:[%s3587_s17 + $0x178] sm:$0xff] %v1211_v33  ;;  %v1243_v33 = vadd.f32 1.0, %v219_v28  ;;  %v251_v28 = vld [vmem:[%s3574_s24 + $0x378] sm:$0xff] }
  0x5c   : > { %2236 = vst [vmem:[%s3587_s17 + $0x180] sm:$0xff] %v1212_v35  ;;  %v1244_v35 = vadd.f32 1.0, %v220_v30  ;;  %v252_v30 = vld [vmem:[%s3574_s24 + $0x380] sm:$0xff] }
  0x5d   : > { %2237 = vst [vmem:[%s3587_s17 + $0x188] sm:$0xff] %v1213_v37  ;;  %v1245_v37 = vadd.f32 1.0, %v221_v32  ;;  %v253_v32 = vld [vmem:[%s3574_s24 + $0x388] sm:$0xff] }
  0x5e   : > { %2238 = vst [vmem:[%s3587_s17 + $0x190] sm:$0xff] %v1214_v39  ;;  %v1246_v39 = vadd.f32 1.0, %v222_v34  ;;  %v254_v34 = vld [vmem:[%s3574_s24 + $0x390] sm:$0xff] }
  0x5f   : > { %2239 = vst [vmem:[%s3587_s17 + $0x198] sm:$0xff] %v1215_v41  ;;  %v1247_v41 = vadd.f32 1.0, %v223_v36  ;;  %v255_v36 = vld [vmem:[%s3574_s24 + $0x398] sm:$0xff] }
  0x60   : > { %2240 = vst [vmem:[%s3587_s17 + $0x1a0] sm:$0xff] %v1216_v43  ;;  %v1248_v43 = vadd.f32 1.0, %v224_v38  ;;  %v256_v38 = vld [vmem:[%s3574_s24 + $0x3a0] sm:$0xff] }
  0x61   : > { %2241 = vst [vmem:[%s3587_s17 + $0x1a8] sm:$0xff] %v1217_v45  ;;  %v1249_v45 = vadd.f32 1.0, %v225_v40  ;;  %v257_v40 = vld [vmem:[%s3574_s24 + $0x3a8] sm:$0xff] }
  0x62   : > { %2242 = vst [vmem:[%s3587_s17 + $0x1b0] sm:$0xff] %v1218_v47  ;;  %v1250_v47 = vadd.f32 1.0, %v226_v42  ;;  %v258_v42 = vld [vmem:[%s3574_s24 + $0x3b0] sm:$0xff] }
  0x63   : > { %2243 = vst [vmem:[%s3587_s17 + $0x1b8] sm:$0xff] %v1219_v49  ;;  %v1251_v49 = vadd.f32 1.0, %v227_v44  ;;  %v259_v44 = vld [vmem:[%s3574_s24 + $0x3b8] sm:$0xff] }
  0x64   : > { %2244 = vst [vmem:[%s3587_s17 + $0x1c0] sm:$0xff] %v1220_v51  ;;  %v1252_v51 = vadd.f32 1.0, %v228_v46  ;;  %v260_v46 = vld [vmem:[%s3574_s24 + $0x3c0] sm:$0xff] }
  0x65   : > { %2245 = vst [vmem:[%s3587_s17 + $0x1c8] sm:$0xff] %v1221_v53  ;;  %v1253_v53 = vadd.f32 1.0, %v229_v48  ;;  %v261_v48 = vld [vmem:[%s3574_s24 + $0x3c8] sm:$0xff] }
  0x66   : > { %2246 = vst [vmem:[%s3587_s17 + $0x1d0] sm:$0xff] %v1222_v55  ;;  %v1254_v55 = vadd.f32 1.0, %v230_v50  ;;  %v262_v50 = vld [vmem:[%s3574_s24 + $0x3d0] sm:$0xff] }
  0x67   : > { %2247 = vst [vmem:[%s3587_s17 + $0x1d8] sm:$0xff] %v1223_v57  ;;  %v1255_v57 = vadd.f32 1.0, %v231_v52  ;;  %v263_v52 = vld [vmem:[%s3574_s24 + $0x3d8] sm:$0xff] }
  0x68   : > { %2248 = vst [vmem:[%s3587_s17 + $0x1e0] sm:$0xff] %v1224_v59  ;;  %v1256_v59 = vadd.f32 1.0, %v232_v54  ;;  %v264_v54 = vld [vmem:[%s3574_s24 + $0x3e0] sm:$0xff] }
  0x69   : > { %2249 = vst [vmem:[%s3587_s17 + $0x1e8] sm:$0xff] %v1225_v61  ;;  %v1257_v61 = vadd.f32 1.0, %v233_v56  ;;  %v265_v56 = vld [vmem:[%s3574_s24 + $0x3e8] sm:$0xff] }
  0x6a   : > { %2250 = vst [vmem:[%s3587_s17 + $0x1f0] sm:$0xff] %v1226_v63  ;;  %v1258_v63 = vadd.f32 1.0, %v234_v58  ;;  %v266_v58 = vld [vmem:[%s3574_s24 + $0x3f0] sm:$0xff] }
  0x6b   : > { %2251 = vst [vmem:[%s3587_s17 + $0x1f8] sm:$0xff] %v1227_v1  ;;  %v1259_v1 = vadd.f32 1.0, %v235_v60  ;;  %v267_v60 = vld [vmem:[%s3574_s24 + $0x3f8] sm:$0xff] }
  0x6c   : > { %2252 = vst [vmem:[%s3587_s17 + $0x200] sm:$0xff] %v1228_v3  ;;  %v1260_v3 = vadd.f32 1.0, %v236_v62  ;;  %v268_v62 = vld [vmem:[%s3574_s24 + $0x400] sm:$0xff] }
  0x6d   : > { %2253 = vst [vmem:[%s3587_s17 + $0x208] sm:$0xff] %v1229_v5  ;;  %v1261_v5 = vadd.f32 1.0, %v237_v0  ;;  %v269_v0 = vld [vmem:[%s3574_s24 + $0x408] sm:$0xff] }
  0x6e   : > { %2254 = vst [vmem:[%s3587_s17 + $0x210] sm:$0xff] %v1230_v7  ;;  %v1262_v7 = vadd.f32 1.0, %v238_v2  ;;  %v270_v2 = vld [vmem:[%s3574_s24 + $0x410] sm:$0xff] }
  0x6f   : > { %2255 = vst [vmem:[%s3587_s17 + $0x218] sm:$0xff] %v1231_v9  ;;  %v1263_v9 = vadd.f32 1.0, %v239_v4  ;;  %v271_v4 = vld [vmem:[%s3574_s24 + $0x418] sm:$0xff] }
  0x70   : > { %2256 = vst [vmem:[%s3587_s17 + $0x220] sm:$0xff] %v1232_v11  ;;  %v1264_v11 = vadd.f32 1.0, %v240_v6  ;;  %v272_v6 = vld [vmem:[%s3574_s24 + $0x420] sm:$0xff] }
  0x71   : > { %2257 = vst [vmem:[%s3587_s17 + $0x228] sm:$0xff] %v1233_v13  ;;  %v1265_v13 = vadd.f32 1.0, %v241_v8  ;;  %v273_v8 = vld [vmem:[%s3574_s24 + $0x428] sm:$0xff] }
  0x72   : > { %2258 = vst [vmem:[%s3587_s17 + $0x230] sm:$0xff] %v1234_v15  ;;  %v1266_v15 = vadd.f32 1.0, %v242_v10  ;;  %v274_v10 = vld [vmem:[%s3574_s24 + $0x430] sm:$0xff] }
  0x73   : > { %2259 = vst [vmem:[%s3587_s17 + $0x238] sm:$0xff] %v1235_v17  ;;  %v1267_v17 = vadd.f32 1.0, %v243_v12  ;;  %v275_v12 = vld [vmem:[%s3574_s24 + $0x438] sm:$0xff] }
  0x74   : > { %2260 = vst [vmem:[%s3587_s17 + $0x240] sm:$0xff] %v1236_v19  ;;  %v1268_v19 = vadd.f32 1.0, %v244_v14  ;;  %v276_v14 = vld [vmem:[%s3574_s24 + $0x440] sm:$0xff] }
  0x75   : > { %2261 = vst [vmem:[%s3587_s17 + $0x248] sm:$0xff] %v1237_v21  ;;  %v1269_v21 = vadd.f32 1.0, %v245_v16  ;;  %v277_v16 = vld [vmem:[%s3574_s24 + $0x448] sm:$0xff] }
  0x76   : > { %2262 = vst [vmem:[%s3587_s17 + $0x250] sm:$0xff] %v1238_v23  ;;  %v1270_v23 = vadd.f32 1.0, %v246_v18  ;;  %v278_v18 = vld [vmem:[%s3574_s24 + $0x450] sm:$0xff] }
  0x77   : > { %2263 = vst [vmem:[%s3587_s17 + $0x258] sm:$0xff] %v1239_v25  ;;  %v1271_v25 = vadd.f32 1.0, %v247_v20  ;;  %v279_v20 = vld [vmem:[%s3574_s24 + $0x458] sm:$0xff] }
  0x78   : > { %2264 = vst [vmem:[%s3587_s17 + $0x260] sm:$0xff] %v1240_v27  ;;  %v1272_v27 = vadd.f32 1.0, %v248_v22  ;;  %v280_v22 = vld [vmem:[%s3574_s24 + $0x460] sm:$0xff] }
  0x79   : > { %2265 = vst [vmem:[%s3587_s17 + $0x268] sm:$0xff] %v1241_v29  ;;  %v1273_v29 = vadd.f32 1.0, %v249_v24  ;;  %v281_v24 = vld [vmem:[%s3574_s24 + $0x468] sm:$0xff] }
  0x7a   : > { %2266 = vst [vmem:[%s3587_s17 + $0x270] sm:$0xff] %v1242_v31  ;;  %v1274_v31 = vadd.f32 1.0, %v250_v26  ;;  %v282_v26 = vld [vmem:[%s3574_s24 + $0x470] sm:$0xff] }
  0x7b   : > { %2267 = vst [vmem:[%s3587_s17 + $0x278] sm:$0xff] %v1243_v33  ;;  %v1275_v33 = vadd.f32 1.0, %v251_v28  ;;  %v283_v28 = vld [vmem:[%s3574_s24 + $0x478] sm:$0xff] }
  0x7c   : > { %2268 = vst [vmem:[%s3587_s17 + $0x280] sm:$0xff] %v1244_v35  ;;  %v1276_v35 = vadd.f32 1.0, %v252_v30  ;;  %v284_v30 = vld [vmem:[%s3574_s24 + $0x480] sm:$0xff] }
  0x7d   : > { %2269 = vst [vmem:[%s3587_s17 + $0x288] sm:$0xff] %v1245_v37  ;;  %v1277_v37 = vadd.f32 1.0, %v253_v32  ;;  %v285_v32 = vld [vmem:[%s3574_s24 + $0x488] sm:$0xff] }
  0x7e   : > { %2270 = vst [vmem:[%s3587_s17 + $0x290] sm:$0xff] %v1246_v39  ;;  %v1278_v39 = vadd.f32 1.0, %v254_v34  ;;  %v286_v34 = vld [vmem:[%s3574_s24 + $0x490] sm:$0xff] }
  0x7f   : > { %2271 = vst [vmem:[%s3587_s17 + $0x298] sm:$0xff] %v1247_v41  ;;  %v1279_v41 = vadd.f32 1.0, %v255_v36  ;;  %v287_v36 = vld [vmem:[%s3574_s24 + $0x498] sm:$0xff] }
  0x80   : > { %2272 = vst [vmem:[%s3587_s17 + $0x2a0] sm:$0xff] %v1248_v43  ;;  %v1280_v43 = vadd.f32 1.0, %v256_v38  ;;  %v288_v38 = vld [vmem:[%s3574_s24 + $0x4a0] sm:$0xff] }
  0x81   : > { %2273 = vst [vmem:[%s3587_s17 + $0x2a8] sm:$0xff] %v1249_v45  ;;  %v1281_v45 = vadd.f32 1.0, %v257_v40  ;;  %v289_v40 = vld [vmem:[%s3574_s24 + $0x4a8] sm:$0xff] }
  0x82   : > { %2274 = vst [vmem:[%s3587_s17 + $0x2b0] sm:$0xff] %v1250_v47  ;;  %v1282_v47 = vadd.f32 1.0, %v258_v42  ;;  %v290_v42 = vld [vmem:[%s3574_s24 + $0x4b0] sm:$0xff] }
  0x83   : > { %2275 = vst [vmem:[%s3587_s17 + $0x2b8] sm:$0xff] %v1251_v49  ;;  %v1283_v49 = vadd.f32 1.0, %v259_v44  ;;  %v291_v44 = vld [vmem:[%s3574_s24 + $0x4b8] sm:$0xff] }
  0x84   : > { %2276 = vst [vmem:[%s3587_s17 + $0x2c0] sm:$0xff] %v1252_v51  ;;  %v1284_v51 = vadd.f32 1.0, %v260_v46  ;;  %v292_v46 = vld [vmem:[%s3574_s24 + $0x4c0] sm:$0xff] }
  0x85   : > { %2277 = vst [vmem:[%s3587_s17 + $0x2c8] sm:$0xff] %v1253_v53  ;;  %v1285_v53 = vadd.f32 1.0, %v261_v48  ;;  %v293_v48 = vld [vmem:[%s3574_s24 + $0x4c8] sm:$0xff] }
  0x86   : > { %2278 = vst [vmem:[%s3587_s17 + $0x2d0] sm:$0xff] %v1254_v55  ;;  %v1286_v55 = vadd.f32 1.0, %v262_v50  ;;  %v294_v50 = vld [vmem:[%s3574_s24 + $0x4d0] sm:$0xff] }
  0x87   : > { %2279 = vst [vmem:[%s3587_s17 + $0x2d8] sm:$0xff] %v1255_v57  ;;  %v1287_v57 = vadd.f32 1.0, %v263_v52  ;;  %v295_v52 = vld [vmem:[%s3574_s24 + $0x4d8] sm:$0xff] }
  0x88   : > { %2280 = vst [vmem:[%s3587_s17 + $0x2e0] sm:$0xff] %v1256_v59  ;;  %v1288_v59 = vadd.f32 1.0, %v264_v54  ;;  %v296_v54 = vld [vmem:[%s3574_s24 + $0x4e0] sm:$0xff] }
  0x89   : > { %2281 = vst [vmem:[%s3587_s17 + $0x2e8] sm:$0xff] %v1257_v61  ;;  %v1289_v61 = vadd.f32 1.0, %v265_v56  ;;  %v297_v56 = vld [vmem:[%s3574_s24 + $0x4e8] sm:$0xff] }
  0x8a   : > { %2282 = vst [vmem:[%s3587_s17 + $0x2f0] sm:$0xff] %v1258_v63  ;;  %v1290_v63 = vadd.f32 1.0, %v266_v58  ;;  %v298_v58 = vld [vmem:[%s3574_s24 + $0x4f0] sm:$0xff] }
  0x8b   : > { %2283 = vst [vmem:[%s3587_s17 + $0x2f8] sm:$0xff] %v1259_v1  ;;  %v1291_v1 = vadd.f32 1.0, %v267_v60  ;;  %v299_v60 = vld [vmem:[%s3574_s24 + $0x4f8] sm:$0xff] }
  0x8c   : > { %2284 = vst [vmem:[%s3587_s17 + $0x300] sm:$0xff] %v1260_v3  ;;  %v1292_v3 = vadd.f32 1.0, %v268_v62  ;;  %v300_v62 = vld [vmem:[%s3574_s24 + $0x500] sm:$0xff] }
  0x8d   : > { %2285 = vst [vmem:[%s3587_s17 + $0x308] sm:$0xff] %v1261_v5  ;;  %v1293_v5 = vadd.f32 1.0, %v269_v0  ;;  %v301_v0 = vld [vmem:[%s3574_s24 + $0x508] sm:$0xff] }
  0x8e   : > { %2286 = vst [vmem:[%s3587_s17 + $0x310] sm:$0xff] %v1262_v7  ;;  %v1294_v7 = vadd.f32 1.0, %v270_v2  ;;  %v302_v2 = vld [vmem:[%s3574_s24 + $0x510] sm:$0xff] }
  0x8f   : > { %2287 = vst [vmem:[%s3587_s17 + $0x318] sm:$0xff] %v1263_v9  ;;  %v1295_v9 = vadd.f32 1.0, %v271_v4  ;;  %v303_v4 = vld [vmem:[%s3574_s24 + $0x518] sm:$0xff] }
  0x90   : > { %2288 = vst [vmem:[%s3587_s17 + $0x320] sm:$0xff] %v1264_v11  ;;  %v1296_v11 = vadd.f32 1.0, %v272_v6  ;;  %v304_v6 = vld [vmem:[%s3574_s24 + $0x520] sm:$0xff] }
  0x91   : > { %2289 = vst [vmem:[%s3587_s17 + $0x328] sm:$0xff] %v1265_v13  ;;  %v1297_v13 = vadd.f32 1.0, %v273_v8  ;;  %v305_v8 = vld [vmem:[%s3574_s24 + $0x528] sm:$0xff] }
  0x92   : > { %2290 = vst [vmem:[%s3587_s17 + $0x330] sm:$0xff] %v1266_v15  ;;  %v1298_v15 = vadd.f32 1.0, %v274_v10  ;;  %v306_v10 = vld [vmem:[%s3574_s24 + $0x530] sm:$0xff] }
  0x93   : > { %2291 = vst [vmem:[%s3587_s17 + $0x338] sm:$0xff] %v1267_v17  ;;  %v1299_v17 = vadd.f32 1.0, %v275_v12  ;;  %v307_v12 = vld [vmem:[%s3574_s24 + $0x538] sm:$0xff] }
  0x94   : > { %2292 = vst [vmem:[%s3587_s17 + $0x340] sm:$0xff] %v1268_v19  ;;  %v1300_v19 = vadd.f32 1.0, %v276_v14  ;;  %v308_v14 = vld [vmem:[%s3574_s24 + $0x540] sm:$0xff] }
  0x95   : > { %2293 = vst [vmem:[%s3587_s17 + $0x348] sm:$0xff] %v1269_v21  ;;  %v1301_v21 = vadd.f32 1.0, %v277_v16  ;;  %v309_v16 = vld [vmem:[%s3574_s24 + $0x548] sm:$0xff] }
  0x96   : > { %2294 = vst [vmem:[%s3587_s17 + $0x350] sm:$0xff] %v1270_v23  ;;  %v1302_v23 = vadd.f32 1.0, %v278_v18  ;;  %v310_v18 = vld [vmem:[%s3574_s24 + $0x550] sm:$0xff] }
  0x97   : > { %2295 = vst [vmem:[%s3587_s17 + $0x358] sm:$0xff] %v1271_v25  ;;  %v1303_v25 = vadd.f32 1.0, %v279_v20  ;;  %v311_v20 = vld [vmem:[%s3574_s24 + $0x558] sm:$0xff] }
  0x98   : > { %2296 = vst [vmem:[%s3587_s17 + $0x360] sm:$0xff] %v1272_v27  ;;  %v1304_v27 = vadd.f32 1.0, %v280_v22  ;;  %v312_v22 = vld [vmem:[%s3574_s24 + $0x560] sm:$0xff] }
  0x99   : > { %2297 = vst [vmem:[%s3587_s17 + $0x368] sm:$0xff] %v1273_v29  ;;  %v1305_v29 = vadd.f32 1.0, %v281_v24  ;;  %v313_v24 = vld [vmem:[%s3574_s24 + $0x568] sm:$0xff] }
  0x9a   : > { %2298 = vst [vmem:[%s3587_s17 + $0x370] sm:$0xff] %v1274_v31  ;;  %v1306_v31 = vadd.f32 1.0, %v282_v26  ;;  %v314_v26 = vld [vmem:[%s3574_s24 + $0x570] sm:$0xff] }
  0x9b   : > { %2299 = vst [vmem:[%s3587_s17 + $0x378] sm:$0xff] %v1275_v33  ;;  %v1307_v33 = vadd.f32 1.0, %v283_v28  ;;  %v315_v28 = vld [vmem:[%s3574_s24 + $0x578] sm:$0xff] }
  0x9c   : > { %2300 = vst [vmem:[%s3587_s17 + $0x380] sm:$0xff] %v1276_v35  ;;  %v1308_v35 = vadd.f32 1.0, %v284_v30  ;;  %v316_v30 = vld [vmem:[%s3574_s24 + $0x580] sm:$0xff] }
  0x9d   : > { %2301 = vst [vmem:[%s3587_s17 + $0x388] sm:$0xff] %v1277_v37  ;;  %v1309_v37 = vadd.f32 1.0, %v285_v32  ;;  %v317_v32 = vld [vmem:[%s3574_s24 + $0x588] sm:$0xff] }
  0x9e   : > { %2302 = vst [vmem:[%s3587_s17 + $0x390] sm:$0xff] %v1278_v39  ;;  %v1310_v39 = vadd.f32 1.0, %v286_v34  ;;  %v318_v34 = vld [vmem:[%s3574_s24 + $0x590] sm:$0xff] }
  0x9f   : > { %2303 = vst [vmem:[%s3587_s17 + $0x398] sm:$0xff] %v1279_v41  ;;  %v1311_v41 = vadd.f32 1.0, %v287_v36  ;;  %v319_v36 = vld [vmem:[%s3574_s24 + $0x598] sm:$0xff] }
  0xa0   : > { %2304 = vst [vmem:[%s3587_s17 + $0x3a0] sm:$0xff] %v1280_v43  ;;  %v1312_v43 = vadd.f32 1.0, %v288_v38  ;;  %v320_v38 = vld [vmem:[%s3574_s24 + $0x5a0] sm:$0xff] }
  0xa1   : > { %2305 = vst [vmem:[%s3587_s17 + $0x3a8] sm:$0xff] %v1281_v45  ;;  %v1313_v45 = vadd.f32 1.0, %v289_v40  ;;  %v321_v40 = vld [vmem:[%s3574_s24 + $0x5a8] sm:$0xff] }
  0xa2   : > { %2306 = vst [vmem:[%s3587_s17 + $0x3b0] sm:$0xff] %v1282_v47  ;;  %v1314_v47 = vadd.f32 1.0, %v290_v42  ;;  %v322_v42 = vld [vmem:[%s3574_s24 + $0x5b0] sm:$0xff] }
  0xa3   : > { %2307 = vst [vmem:[%s3587_s17 + $0x3b8] sm:$0xff] %v1283_v49  ;;  %v1315_v49 = vadd.f32 1.0, %v291_v44  ;;  %v323_v44 = vld [vmem:[%s3574_s24 + $0x5b8] sm:$0xff] }
  0xa4   : > { %2308 = vst [vmem:[%s3587_s17 + $0x3c0] sm:$0xff] %v1284_v51  ;;  %v1316_v51 = vadd.f32 1.0, %v292_v46  ;;  %v324_v46 = vld [vmem:[%s3574_s24 + $0x5c0] sm:$0xff] }
  0xa5   : > { %2309 = vst [vmem:[%s3587_s17 + $0x3c8] sm:$0xff] %v1285_v53  ;;  %v1317_v53 = vadd.f32 1.0, %v293_v48  ;;  %v325_v48 = vld [vmem:[%s3574_s24 + $0x5c8] sm:$0xff] }
  0xa6   : > { %2310 = vst [vmem:[%s3587_s17 + $0x3d0] sm:$0xff] %v1286_v55  ;;  %v1318_v55 = vadd.f32 1.0, %v294_v50  ;;  %v326_v50 = vld [vmem:[%s3574_s24 + $0x5d0] sm:$0xff] }
  0xa7   : > { %2311 = vst [vmem:[%s3587_s17 + $0x3d8] sm:$0xff] %v1287_v57  ;;  %v1319_v57 = vadd.f32 1.0, %v295_v52  ;;  %v327_v52 = vld [vmem:[%s3574_s24 + $0x5d8] sm:$0xff] }
  0xa8   : > { %2312 = vst [vmem:[%s3587_s17 + $0x3e0] sm:$0xff] %v1288_v59  ;;  %v1320_v59 = vadd.f32 1.0, %v296_v54  ;;  %v328_v54 = vld [vmem:[%s3574_s24 + $0x5e0] sm:$0xff] }
  0xa9   : > { %2313 = vst [vmem:[%s3587_s17 + $0x3e8] sm:$0xff] %v1289_v61  ;;  %v1321_v61 = vadd.f32 1.0, %v297_v56  ;;  %v329_v56 = vld [vmem:[%s3574_s24 + $0x5e8] sm:$0xff] }
  0xaa   : > { %2314 = vst [vmem:[%s3587_s17 + $0x3f0] sm:$0xff] %v1290_v63  ;;  %v1322_v63 = vadd.f32 1.0, %v298_v58  ;;  %v330_v58 = vld [vmem:[%s3574_s24 + $0x5f0] sm:$0xff] }
  0xab   : > { %2315 = vst [vmem:[%s3587_s17 + $0x3f8] sm:$0xff] %v1291_v1  ;;  %v1323_v1 = vadd.f32 1.0, %v299_v60  ;;  %v331_v60 = vld [vmem:[%s3574_s24 + $0x5f8] sm:$0xff] }
  0xac   : > { %2316 = vst [vmem:[%s3587_s17 + $0x400] sm:$0xff] %v1292_v3  ;;  %v1324_v3 = vadd.f32 1.0, %v300_v62  ;;  %v332_v62 = vld [vmem:[%s3574_s24 + $0x600] sm:$0xff] }
  0xad   : > { %2317 = vst [vmem:[%s3587_s17 + $0x408] sm:$0xff] %v1293_v5  ;;  %v1325_v5 = vadd.f32 1.0, %v301_v0  ;;  %v333_v0 = vld [vmem:[%s3574_s24 + $0x608] sm:$0xff] }
  0xae   : > { %2318 = vst [vmem:[%s3587_s17 + $0x410] sm:$0xff] %v1294_v7  ;;  %v1326_v7 = vadd.f32 1.0, %v302_v2  ;;  %v334_v2 = vld [vmem:[%s3574_s24 + $0x610] sm:$0xff] }
  0xaf   : > { %2319 = vst [vmem:[%s3587_s17 + $0x418] sm:$0xff] %v1295_v9  ;;  %v1327_v9 = vadd.f32 1.0, %v303_v4  ;;  %v335_v4 = vld [vmem:[%s3574_s24 + $0x618] sm:$0xff] }
  0xb0   : > { %2320 = vst [vmem:[%s3587_s17 + $0x420] sm:$0xff] %v1296_v11  ;;  %v1328_v11 = vadd.f32 1.0, %v304_v6  ;;  %v336_v6 = vld [vmem:[%s3574_s24 + $0x620] sm:$0xff] }
  0xb1   : > { %2321 = vst [vmem:[%s3587_s17 + $0x428] sm:$0xff] %v1297_v13  ;;  %v1329_v13 = vadd.f32 1.0, %v305_v8  ;;  %v337_v8 = vld [vmem:[%s3574_s24 + $0x628] sm:$0xff] }
  0xb2   : > { %2322 = vst [vmem:[%s3587_s17 + $0x430] sm:$0xff] %v1298_v15  ;;  %v1330_v15 = vadd.f32 1.0, %v306_v10  ;;  %v338_v10 = vld [vmem:[%s3574_s24 + $0x630] sm:$0xff] }
  0xb3   : > { %2323 = vst [vmem:[%s3587_s17 + $0x438] sm:$0xff] %v1299_v17  ;;  %v1331_v17 = vadd.f32 1.0, %v307_v12  ;;  %v339_v12 = vld [vmem:[%s3574_s24 + $0x638] sm:$0xff] }
  0xb4   : > { %2324 = vst [vmem:[%s3587_s17 + $0x440] sm:$0xff] %v1300_v19  ;;  %v1332_v19 = vadd.f32 1.0, %v308_v14  ;;  %v340_v14 = vld [vmem:[%s3574_s24 + $0x640] sm:$0xff] }
  0xb5   : > { %2325 = vst [vmem:[%s3587_s17 + $0x448] sm:$0xff] %v1301_v21  ;;  %v1333_v21 = vadd.f32 1.0, %v309_v16  ;;  %v341_v16 = vld [vmem:[%s3574_s24 + $0x648] sm:$0xff] }
  0xb6   : > { %2326 = vst [vmem:[%s3587_s17 + $0x450] sm:$0xff] %v1302_v23  ;;  %v1334_v23 = vadd.f32 1.0, %v310_v18  ;;  %v342_v18 = vld [vmem:[%s3574_s24 + $0x650] sm:$0xff] }
  0xb7   : > { %2327 = vst [vmem:[%s3587_s17 + $0x458] sm:$0xff] %v1303_v25  ;;  %v1335_v25 = vadd.f32 1.0, %v311_v20  ;;  %v343_v20 = vld [vmem:[%s3574_s24 + $0x658] sm:$0xff] }
  0xb8   : > { %2328 = vst [vmem:[%s3587_s17 + $0x460] sm:$0xff] %v1304_v27  ;;  %v1336_v27 = vadd.f32 1.0, %v312_v22  ;;  %v344_v22 = vld [vmem:[%s3574_s24 + $0x660] sm:$0xff] }
  0xb9   : > { %2329 = vst [vmem:[%s3587_s17 + $0x468] sm:$0xff] %v1305_v29  ;;  %v1337_v29 = vadd.f32 1.0, %v313_v24  ;;  %v345_v24 = vld [vmem:[%s3574_s24 + $0x668] sm:$0xff] }
  0xba   : > { %2330 = vst [vmem:[%s3587_s17 + $0x470] sm:$0xff] %v1306_v31  ;;  %v1338_v31 = vadd.f32 1.0, %v314_v26  ;;  %v346_v26 = vld [vmem:[%s3574_s24 + $0x670] sm:$0xff] }
  0xbb   : > { %2331 = vst [vmem:[%s3587_s17 + $0x478] sm:$0xff] %v1307_v33  ;;  %v1339_v33 = vadd.f32 1.0, %v315_v28  ;;  %v347_v28 = vld [vmem:[%s3574_s24 + $0x678] sm:$0xff] }
  0xbc   : > { %2332 = vst [vmem:[%s3587_s17 + $0x480] sm:$0xff] %v1308_v35  ;;  %v1340_v35 = vadd.f32 1.0, %v316_v30  ;;  %v348_v30 = vld [vmem:[%s3574_s24 + $0x680] sm:$0xff] }
  0xbd   : > { %2333 = vst [vmem:[%s3587_s17 + $0x488] sm:$0xff] %v1309_v37  ;;  %v1341_v37 = vadd.f32 1.0, %v317_v32  ;;  %v349_v32 = vld [vmem:[%s3574_s24 + $0x688] sm:$0xff] }
  0xbe   : > { %2334 = vst [vmem:[%s3587_s17 + $0x490] sm:$0xff] %v1310_v39  ;;  %v1342_v39 = vadd.f32 1.0, %v318_v34  ;;  %v350_v34 = vld [vmem:[%s3574_s24 + $0x690] sm:$0xff] }
  0xbf   : > { %2335 = vst [vmem:[%s3587_s17 + $0x498] sm:$0xff] %v1311_v41  ;;  %v1343_v41 = vadd.f32 1.0, %v319_v36  ;;  %v351_v36 = vld [vmem:[%s3574_s24 + $0x698] sm:$0xff] }
  0xc0   : > { %2336 = vst [vmem:[%s3587_s17 + $0x4a0] sm:$0xff] %v1312_v43  ;;  %v1344_v43 = vadd.f32 1.0, %v320_v38  ;;  %v352_v38 = vld [vmem:[%s3574_s24 + $0x6a0] sm:$0xff] }
  0xc1   : > { %2337 = vst [vmem:[%s3587_s17 + $0x4a8] sm:$0xff] %v1313_v45  ;;  %v1345_v45 = vadd.f32 1.0, %v321_v40  ;;  %v353_v40 = vld [vmem:[%s3574_s24 + $0x6a8] sm:$0xff] }
  0xc2   : > { %2338 = vst [vmem:[%s3587_s17 + $0x4b0] sm:$0xff] %v1314_v47  ;;  %v1346_v47 = vadd.f32 1.0, %v322_v42  ;;  %v354_v42 = vld [vmem:[%s3574_s24 + $0x6b0] sm:$0xff] }
  0xc3   : > { %2339 = vst [vmem:[%s3587_s17 + $0x4b8] sm:$0xff] %v1315_v49  ;;  %v1347_v49 = vadd.f32 1.0, %v323_v44  ;;  %v355_v44 = vld [vmem:[%s3574_s24 + $0x6b8] sm:$0xff] }
  0xc4   : > { %2340 = vst [vmem:[%s3587_s17 + $0x4c0] sm:$0xff] %v1316_v51  ;;  %v1348_v51 = vadd.f32 1.0, %v324_v46  ;;  %v356_v46 = vld [vmem:[%s3574_s24 + $0x6c0] sm:$0xff] }
  0xc5   : > { %2341 = vst [vmem:[%s3587_s17 + $0x4c8] sm:$0xff] %v1317_v53  ;;  %v1349_v53 = vadd.f32 1.0, %v325_v48  ;;  %v357_v48 = vld [vmem:[%s3574_s24 + $0x6c8] sm:$0xff] }
  0xc6   : > { %2342 = vst [vmem:[%s3587_s17 + $0x4d0] sm:$0xff] %v1318_v55  ;;  %v1350_v55 = vadd.f32 1.0, %v326_v50  ;;  %v358_v50 = vld [vmem:[%s3574_s24 + $0x6d0] sm:$0xff] }
  0xc7   : > { %2343 = vst [vmem:[%s3587_s17 + $0x4d8] sm:$0xff] %v1319_v57  ;;  %v1351_v57 = vadd.f32 1.0, %v327_v52  ;;  %v359_v52 = vld [vmem:[%s3574_s24 + $0x6d8] sm:$0xff] }
  0xc8   : > { %2344 = vst [vmem:[%s3587_s17 + $0x4e0] sm:$0xff] %v1320_v59  ;;  %v1352_v59 = vadd.f32 1.0, %v328_v54  ;;  %v360_v54 = vld [vmem:[%s3574_s24 + $0x6e0] sm:$0xff] }
  0xc9   : > { %2345 = vst [vmem:[%s3587_s17 + $0x4e8] sm:$0xff] %v1321_v61  ;;  %v1353_v61 = vadd.f32 1.0, %v329_v56  ;;  %v361_v56 = vld [vmem:[%s3574_s24 + $0x6e8] sm:$0xff] }
  0xca   : > { %2346 = vst [vmem:[%s3587_s17 + $0x4f0] sm:$0xff] %v1322_v63  ;;  %v1354_v63 = vadd.f32 1.0, %v330_v58  ;;  %v362_v58 = vld [vmem:[%s3574_s24 + $0x6f0] sm:$0xff] }
  0xcb   : > { %2347 = vst [vmem:[%s3587_s17 + $0x4f8] sm:$0xff] %v1323_v1  ;;  %v1355_v1 = vadd.f32 1.0, %v331_v60  ;;  %v363_v60 = vld [vmem:[%s3574_s24 + $0x6f8] sm:$0xff] }
  0xcc   : > { %2348 = vst [vmem:[%s3587_s17 + $0x500] sm:$0xff] %v1324_v3  ;;  %v1356_v3 = vadd.f32 1.0, %v332_v62  ;;  %v364_v62 = vld [vmem:[%s3574_s24 + $0x700] sm:$0xff] }
  0xcd   : > { %2349 = vst [vmem:[%s3587_s17 + $0x508] sm:$0xff] %v1325_v5  ;;  %v1357_v5 = vadd.f32 1.0, %v333_v0  ;;  %v365_v0 = vld [vmem:[%s3574_s24 + $0x708] sm:$0xff] }
  0xce   : > { %2350 = vst [vmem:[%s3587_s17 + $0x510] sm:$0xff] %v1326_v7  ;;  %v1358_v7 = vadd.f32 1.0, %v334_v2  ;;  %v366_v2 = vld [vmem:[%s3574_s24 + $0x710] sm:$0xff] }
  0xcf   : > { %2351 = vst [vmem:[%s3587_s17 + $0x518] sm:$0xff] %v1327_v9  ;;  %v1359_v9 = vadd.f32 1.0, %v335_v4  ;;  %v367_v4 = vld [vmem:[%s3574_s24 + $0x718] sm:$0xff] }
  0xd0   : > { %2352 = vst [vmem:[%s3587_s17 + $0x520] sm:$0xff] %v1328_v11  ;;  %v1360_v11 = vadd.f32 1.0, %v336_v6  ;;  %v368_v6 = vld [vmem:[%s3574_s24 + $0x720] sm:$0xff] }
  0xd1   : > { %2353 = vst [vmem:[%s3587_s17 + $0x528] sm:$0xff] %v1329_v13  ;;  %v1361_v13 = vadd.f32 1.0, %v337_v8  ;;  %v369_v8 = vld [vmem:[%s3574_s24 + $0x728] sm:$0xff] }
  0xd2   : > { %2354 = vst [vmem:[%s3587_s17 + $0x530] sm:$0xff] %v1330_v15  ;;  %v1362_v15 = vadd.f32 1.0, %v338_v10  ;;  %v370_v10 = vld [vmem:[%s3574_s24 + $0x730] sm:$0xff] }
  0xd3   : > { %2355 = vst [vmem:[%s3587_s17 + $0x538] sm:$0xff] %v1331_v17  ;;  %v1363_v17 = vadd.f32 1.0, %v339_v12  ;;  %v371_v12 = vld [vmem:[%s3574_s24 + $0x738] sm:$0xff] }
  0xd4   : > { %2356 = vst [vmem:[%s3587_s17 + $0x540] sm:$0xff] %v1332_v19  ;;  %v1364_v19 = vadd.f32 1.0, %v340_v14  ;;  %v372_v14 = vld [vmem:[%s3574_s24 + $0x740] sm:$0xff] }
  0xd5   : > { %2357 = vst [vmem:[%s3587_s17 + $0x548] sm:$0xff] %v1333_v21  ;;  %v1365_v21 = vadd.f32 1.0, %v341_v16  ;;  %v373_v16 = vld [vmem:[%s3574_s24 + $0x748] sm:$0xff] }
  0xd6   : > { %2358 = vst [vmem:[%s3587_s17 + $0x550] sm:$0xff] %v1334_v23  ;;  %v1366_v23 = vadd.f32 1.0, %v342_v18  ;;  %v374_v18 = vld [vmem:[%s3574_s24 + $0x750] sm:$0xff] }
  0xd7   : > { %2359 = vst [vmem:[%s3587_s17 + $0x558] sm:$0xff] %v1335_v25  ;;  %v1367_v25 = vadd.f32 1.0, %v343_v20  ;;  %v375_v20 = vld [vmem:[%s3574_s24 + $0x758] sm:$0xff] }
  0xd8   : > { %2360 = vst [vmem:[%s3587_s17 + $0x560] sm:$0xff] %v1336_v27  ;;  %v1368_v27 = vadd.f32 1.0, %v344_v22  ;;  %v376_v22 = vld [vmem:[%s3574_s24 + $0x760] sm:$0xff] }
  0xd9   : > { %2361 = vst [vmem:[%s3587_s17 + $0x568] sm:$0xff] %v1337_v29  ;;  %v1369_v29 = vadd.f32 1.0, %v345_v24  ;;  %v377_v24 = vld [vmem:[%s3574_s24 + $0x768] sm:$0xff] }
  0xda   : > { %2362 = vst [vmem:[%s3587_s17 + $0x570] sm:$0xff] %v1338_v31  ;;  %v1370_v31 = vadd.f32 1.0, %v346_v26  ;;  %v378_v26 = vld [vmem:[%s3574_s24 + $0x770] sm:$0xff] }
  0xdb   : > { %2363 = vst [vmem:[%s3587_s17 + $0x578] sm:$0xff] %v1339_v33  ;;  %v1371_v33 = vadd.f32 1.0, %v347_v28  ;;  %v379_v28 = vld [vmem:[%s3574_s24 + $0x778] sm:$0xff] }
  0xdc   : > { %2364 = vst [vmem:[%s3587_s17 + $0x580] sm:$0xff] %v1340_v35  ;;  %v1372_v35 = vadd.f32 1.0, %v348_v30  ;;  %v380_v30 = vld [vmem:[%s3574_s24 + $0x780] sm:$0xff] }
  0xdd   : > { %2365 = vst [vmem:[%s3587_s17 + $0x588] sm:$0xff] %v1341_v37  ;;  %v1373_v37 = vadd.f32 1.0, %v349_v32  ;;  %v381_v32 = vld [vmem:[%s3574_s24 + $0x788] sm:$0xff] }
  0xde   : > { %2366 = vst [vmem:[%s3587_s17 + $0x590] sm:$0xff] %v1342_v39  ;;  %v1374_v39 = vadd.f32 1.0, %v350_v34  ;;  %v382_v34 = vld [vmem:[%s3574_s24 + $0x790] sm:$0xff] }
  0xdf   : > { %2367 = vst [vmem:[%s3587_s17 + $0x598] sm:$0xff] %v1343_v41  ;;  %v1375_v41 = vadd.f32 1.0, %v351_v36  ;;  %v383_v36 = vld [vmem:[%s3574_s24 + $0x798] sm:$0xff] }
  0xe0   : > { %2368 = vst [vmem:[%s3587_s17 + $0x5a0] sm:$0xff] %v1344_v43  ;;  %v1376_v43 = vadd.f32 1.0, %v352_v38  ;;  %v384_v38 = vld [vmem:[%s3574_s24 + $0x7a0] sm:$0xff] }
  0xe1   : > { %2369 = vst [vmem:[%s3587_s17 + $0x5a8] sm:$0xff] %v1345_v45  ;;  %v1377_v45 = vadd.f32 1.0, %v353_v40  ;;  %v385_v40 = vld [vmem:[%s3574_s24 + $0x7a8] sm:$0xff] }
  0xe2   : > { %2370 = vst [vmem:[%s3587_s17 + $0x5b0] sm:$0xff] %v1346_v47  ;;  %v1378_v47 = vadd.f32 1.0, %v354_v42  ;;  %v386_v42 = vld [vmem:[%s3574_s24 + $0x7b0] sm:$0xff] }
  0xe3   : > { %2371 = vst [vmem:[%s3587_s17 + $0x5b8] sm:$0xff] %v1347_v49  ;;  %v1379_v49 = vadd.f32 1.0, %v355_v44  ;;  %v387_v44 = vld [vmem:[%s3574_s24 + $0x7b8] sm:$0xff] }
  0xe4   : > { %2372 = vst [vmem:[%s3587_s17 + $0x5c0] sm:$0xff] %v1348_v51  ;;  %v1380_v51 = vadd.f32 1.0, %v356_v46  ;;  %v388_v46 = vld [vmem:[%s3574_s24 + $0x7c0] sm:$0xff] }
  0xe5   : > { %2373 = vst [vmem:[%s3587_s17 + $0x5c8] sm:$0xff] %v1349_v53  ;;  %v1381_v53 = vadd.f32 1.0, %v357_v48  ;;  %v389_v48 = vld [vmem:[%s3574_s24 + $0x7c8] sm:$0xff] }
  0xe6   : > { %2374 = vst [vmem:[%s3587_s17 + $0x5d0] sm:$0xff] %v1350_v55  ;;  %v1382_v55 = vadd.f32 1.0, %v358_v50  ;;  %v390_v50 = vld [vmem:[%s3574_s24 + $0x7d0] sm:$0xff] }
  0xe7   : > { %2375 = vst [vmem:[%s3587_s17 + $0x5d8] sm:$0xff] %v1351_v57  ;;  %v1383_v57 = vadd.f32 1.0, %v359_v52  ;;  %v391_v52 = vld [vmem:[%s3574_s24 + $0x7d8] sm:$0xff] }
  0xe8   : > { %2376 = vst [vmem:[%s3587_s17 + $0x5e0] sm:$0xff] %v1352_v59  ;;  %v1384_v59 = vadd.f32 1.0, %v360_v54  ;;  %v392_v54 = vld [vmem:[%s3574_s24 + $0x7e0] sm:$0xff] }
  0xe9   : > { %2377 = vst [vmem:[%s3587_s17 + $0x5e8] sm:$0xff] %v1353_v61  ;;  %v1385_v61 = vadd.f32 1.0, %v361_v56  ;;  %v393_v56 = vld [vmem:[%s3574_s24 + $0x7e8] sm:$0xff] }
  0xea   : > { %2378 = vst [vmem:[%s3587_s17 + $0x5f0] sm:$0xff] %v1354_v63  ;;  %v1386_v63 = vadd.f32 1.0, %v362_v58  ;;  %v394_v58 = vld [vmem:[%s3574_s24 + $0x7f0] sm:$0xff] }
  0xeb   : > { %2379 = vst [vmem:[%s3587_s17 + $0x5f8] sm:$0xff] %v1355_v1  ;;  %v1387_v1 = vadd.f32 1.0, %v363_v60  ;;  %v395_v60 = vld [vmem:[%s3574_s24 + $0x7f8] sm:$0xff] }
  0xec   : > { %2380 = vst [vmem:[%s3587_s17 + $0x600] sm:$0xff] %v1356_v3  ;;  %v1388_v3 = vadd.f32 1.0, %v364_v62  ;;  %v396_v62 = vld [vmem:[%s3574_s24 + $0x800] sm:$0xff] }
  0xed   : > { %2381 = vst [vmem:[%s3587_s17 + $0x608] sm:$0xff] %v1357_v5  ;;  %v1389_v5 = vadd.f32 1.0, %v365_v0  ;;  %v397_v0 = vld [vmem:[%s3574_s24 + $0x808] sm:$0xff] }
  0xee   : > { %2382 = vst [vmem:[%s3587_s17 + $0x610] sm:$0xff] %v1358_v7  ;;  %v1390_v7 = vadd.f32 1.0, %v366_v2  ;;  %v398_v2 = vld [vmem:[%s3574_s24 + $0x810] sm:$0xff] }
  0xef   : > { %2383 = vst [vmem:[%s3587_s17 + $0x618] sm:$0xff] %v1359_v9  ;;  %v1391_v9 = vadd.f32 1.0, %v367_v4  ;;  %v399_v4 = vld [vmem:[%s3574_s24 + $0x818] sm:$0xff] }
  0xf0   : > { %2384 = vst [vmem:[%s3587_s17 + $0x620] sm:$0xff] %v1360_v11  ;;  %v1392_v11 = vadd.f32 1.0, %v368_v6  ;;  %v400_v6 = vld [vmem:[%s3574_s24 + $0x820] sm:$0xff] }
  0xf1   : > { %2385 = vst [vmem:[%s3587_s17 + $0x628] sm:$0xff] %v1361_v13  ;;  %v1393_v13 = vadd.f32 1.0, %v369_v8  ;;  %v401_v8 = vld [vmem:[%s3574_s24 + $0x828] sm:$0xff] }
  0xf2   : > { %2386 = vst [vmem:[%s3587_s17 + $0x630] sm:$0xff] %v1362_v15  ;;  %v1394_v15 = vadd.f32 1.0, %v370_v10  ;;  %v402_v10 = vld [vmem:[%s3574_s24 + $0x830] sm:$0xff] }
  0xf3   : > { %2387 = vst [vmem:[%s3587_s17 + $0x638] sm:$0xff] %v1363_v17  ;;  %v1395_v17 = vadd.f32 1.0, %v371_v12  ;;  %v403_v12 = vld [vmem:[%s3574_s24 + $0x838] sm:$0xff] }
  0xf4   : > { %2388 = vst [vmem:[%s3587_s17 + $0x640] sm:$0xff] %v1364_v19  ;;  %v1396_v19 = vadd.f32 1.0, %v372_v14  ;;  %v404_v14 = vld [vmem:[%s3574_s24 + $0x840] sm:$0xff] }
  0xf5   : > { %2389 = vst [vmem:[%s3587_s17 + $0x648] sm:$0xff] %v1365_v21  ;;  %v1397_v21 = vadd.f32 1.0, %v373_v16  ;;  %v405_v16 = vld [vmem:[%s3574_s24 + $0x848] sm:$0xff] }
  0xf6   : > { %2390 = vst [vmem:[%s3587_s17 + $0x650] sm:$0xff] %v1366_v23  ;;  %v1398_v23 = vadd.f32 1.0, %v374_v18  ;;  %v406_v18 = vld [vmem:[%s3574_s24 + $0x850] sm:$0xff] }
  0xf7   : > { %2391 = vst [vmem:[%s3587_s17 + $0x658] sm:$0xff] %v1367_v25  ;;  %v1399_v25 = vadd.f32 1.0, %v375_v20  ;;  %v407_v20 = vld [vmem:[%s3574_s24 + $0x858] sm:$0xff] }
  0xf8   : > { %2392 = vst [vmem:[%s3587_s17 + $0x660] sm:$0xff] %v1368_v27  ;;  %v1400_v27 = vadd.f32 1.0, %v376_v22  ;;  %v408_v22 = vld [vmem:[%s3574_s24 + $0x860] sm:$0xff] }
  0xf9   : > { %2393 = vst [vmem:[%s3587_s17 + $0x668] sm:$0xff] %v1369_v29  ;;  %v1401_v29 = vadd.f32 1.0, %v377_v24  ;;  %v409_v24 = vld [vmem:[%s3574_s24 + $0x868] sm:$0xff] }
  0xfa   : > { %2394 = vst [vmem:[%s3587_s17 + $0x670] sm:$0xff] %v1370_v31  ;;  %v1402_v31 = vadd.f32 1.0, %v378_v26  ;;  %v410_v26 = vld [vmem:[%s3574_s24 + $0x870] sm:$0xff] }
  0xfb   : > { %2395 = vst [vmem:[%s3587_s17 + $0x678] sm:$0xff] %v1371_v33  ;;  %v1403_v33 = vadd.f32 1.0, %v379_v28  ;;  %v411_v28 = vld [vmem:[%s3574_s24 + $0x878] sm:$0xff] }
  0xfc   : > { %2396 = vst [vmem:[%s3587_s17 + $0x680] sm:$0xff] %v1372_v35  ;;  %v1404_v35 = vadd.f32 1.0, %v380_v30  ;;  %v412_v30 = vld [vmem:[%s3574_s24 + $0x880] sm:$0xff] }
  0xfd   : > { %2397 = vst [vmem:[%s3587_s17 + $0x688] sm:$0xff] %v1373_v37  ;;  %v1405_v37 = vadd.f32 1.0, %v381_v32  ;;  %v413_v32 = vld [vmem:[%s3574_s24 + $0x888] sm:$0xff] }
  0xfe   : > { %2398 = vst [vmem:[%s3587_s17 + $0x690] sm:$0xff] %v1374_v39  ;;  %v1406_v39 = vadd.f32 1.0, %v382_v34  ;;  %v414_v34 = vld [vmem:[%s3574_s24 + $0x890] sm:$0xff] }
  0xff   : > { %2399 = vst [vmem:[%s3587_s17 + $0x698] sm:$0xff] %v1375_v41  ;;  %v1407_v41 = vadd.f32 1.0, %v383_v36  ;;  %v415_v36 = vld [vmem:[%s3574_s24 + $0x898] sm:$0xff] }
 0x100   : > { %2400 = vst [vmem:[%s3587_s17 + $0x6a0] sm:$0xff] %v1376_v43  ;;  %v1408_v43 = vadd.f32 1.0, %v384_v38  ;;  %v416_v38 = vld [vmem:[%s3574_s24 + $0x8a0] sm:$0xff] }
 0x101   : > { %2401 = vst [vmem:[%s3587_s17 + $0x6a8] sm:$0xff] %v1377_v45  ;;  %v1409_v45 = vadd.f32 1.0, %v385_v40  ;;  %v417_v40 = vld [vmem:[%s3574_s24 + $0x8a8] sm:$0xff] }
 0x102   : > { %2402 = vst [vmem:[%s3587_s17 + $0x6b0] sm:$0xff] %v1378_v47  ;;  %v1410_v47 = vadd.f32 1.0, %v386_v42  ;;  %v418_v42 = vld [vmem:[%s3574_s24 + $0x8b0] sm:$0xff] }
 0x103   : > { %2403 = vst [vmem:[%s3587_s17 + $0x6b8] sm:$0xff] %v1379_v49  ;;  %v1411_v49 = vadd.f32 1.0, %v387_v44  ;;  %v419_v44 = vld [vmem:[%s3574_s24 + $0x8b8] sm:$0xff] }
 0x104   : > { %2404 = vst [vmem:[%s3587_s17 + $0x6c0] sm:$0xff] %v1380_v51  ;;  %v1412_v51 = vadd.f32 1.0, %v388_v46  ;;  %v420_v46 = vld [vmem:[%s3574_s24 + $0x8c0] sm:$0xff] }
 0x105   : > { %2405 = vst [vmem:[%s3587_s17 + $0x6c8] sm:$0xff] %v1381_v53  ;;  %v1413_v53 = vadd.f32 1.0, %v389_v48  ;;  %v421_v48 = vld [vmem:[%s3574_s24 + $0x8c8] sm:$0xff] }
 0x106   : > { %2406 = vst [vmem:[%s3587_s17 + $0x6d0] sm:$0xff] %v1382_v55  ;;  %v1414_v55 = vadd.f32 1.0, %v390_v50  ;;  %v422_v50 = vld [vmem:[%s3574_s24 + $0x8d0] sm:$0xff] }
 0x107   : > { %2407 = vst [vmem:[%s3587_s17 + $0x6d8] sm:$0xff] %v1383_v57  ;;  %v1415_v57 = vadd.f32 1.0, %v391_v52  ;;  %v423_v52 = vld [vmem:[%s3574_s24 + $0x8d8] sm:$0xff] }
 0x108   : > { %2408 = vst [vmem:[%s3587_s17 + $0x6e0] sm:$0xff] %v1384_v59  ;;  %v1416_v59 = vadd.f32 1.0, %v392_v54  ;;  %v424_v54 = vld [vmem:[%s3574_s24 + $0x8e0] sm:$0xff] }
 0x109   : > { %2409 = vst [vmem:[%s3587_s17 + $0x6e8] sm:$0xff] %v1385_v61  ;;  %v1417_v61 = vadd.f32 1.0, %v393_v56  ;;  %v425_v56 = vld [vmem:[%s3574_s24 + $0x8e8] sm:$0xff] }
 0x10a   : > { %2410 = vst [vmem:[%s3587_s17 + $0x6f0] sm:$0xff] %v1386_v63  ;;  %v1418_v63 = vadd.f32 1.0, %v394_v58  ;;  %v426_v58 = vld [vmem:[%s3574_s24 + $0x8f0] sm:$0xff] }
 0x10b   : > { %2411 = vst [vmem:[%s3587_s17 + $0x6f8] sm:$0xff] %v1387_v1  ;;  %v1419_v1 = vadd.f32 1.0, %v395_v60  ;;  %v427_v60 = vld [vmem:[%s3574_s24 + $0x8f8] sm:$0xff] }
 0x10c   : > { %2412 = vst [vmem:[%s3587_s17 + $0x700] sm:$0xff] %v1388_v3  ;;  %v1420_v3 = vadd.f32 1.0, %v396_v62  ;;  %v428_v62 = vld [vmem:[%s3574_s24 + $0x900] sm:$0xff] }
 0x10d   : > { %2413 = vst [vmem:[%s3587_s17 + $0x708] sm:$0xff] %v1389_v5  ;;  %v1421_v5 = vadd.f32 1.0, %v397_v0  ;;  %v429_v0 = vld [vmem:[%s3574_s24 + $0x908] sm:$0xff] }
 0x10e   : > { %2414 = vst [vmem:[%s3587_s17 + $0x710] sm:$0xff] %v1390_v7  ;;  %v1422_v7 = vadd.f32 1.0, %v398_v2  ;;  %v430_v2 = vld [vmem:[%s3574_s24 + $0x910] sm:$0xff] }
 0x10f   : > { %2415 = vst [vmem:[%s3587_s17 + $0x718] sm:$0xff] %v1391_v9  ;;  %v1423_v9 = vadd.f32 1.0, %v399_v4  ;;  %v431_v4 = vld [vmem:[%s3574_s24 + $0x918] sm:$0xff] }
 0x110   : > { %2416 = vst [vmem:[%s3587_s17 + $0x720] sm:$0xff] %v1392_v11  ;;  %v1424_v11 = vadd.f32 1.0, %v400_v6  ;;  %v432_v6 = vld [vmem:[%s3574_s24 + $0x920] sm:$0xff] }
 0x111   : > { %2417 = vst [vmem:[%s3587_s17 + $0x728] sm:$0xff] %v1393_v13  ;;  %v1425_v13 = vadd.f32 1.0, %v401_v8  ;;  %v433_v8 = vld [vmem:[%s3574_s24 + $0x928] sm:$0xff] }
 0x112   : > { %2418 = vst [vmem:[%s3587_s17 + $0x730] sm:$0xff] %v1394_v15  ;;  %v1426_v15 = vadd.f32 1.0, %v402_v10  ;;  %v434_v10 = vld [vmem:[%s3574_s24 + $0x930] sm:$0xff] }
 0x113   : > { %2419 = vst [vmem:[%s3587_s17 + $0x738] sm:$0xff] %v1395_v17  ;;  %v1427_v17 = vadd.f32 1.0, %v403_v12  ;;  %v435_v12 = vld [vmem:[%s3574_s24 + $0x938] sm:$0xff] }
 0x114   : > { %2420 = vst [vmem:[%s3587_s17 + $0x740] sm:$0xff] %v1396_v19  ;;  %v1428_v19 = vadd.f32 1.0, %v404_v14  ;;  %v436_v14 = vld [vmem:[%s3574_s24 + $0x940] sm:$0xff] }
 0x115   : > { %2421 = vst [vmem:[%s3587_s17 + $0x748] sm:$0xff] %v1397_v21  ;;  %v1429_v21 = vadd.f32 1.0, %v405_v16  ;;  %v437_v16 = vld [vmem:[%s3574_s24 + $0x948] sm:$0xff] }
 0x116   : > { %2422 = vst [vmem:[%s3587_s17 + $0x750] sm:$0xff] %v1398_v23  ;;  %v1430_v23 = vadd.f32 1.0, %v406_v18  ;;  %v438_v18 = vld [vmem:[%s3574_s24 + $0x950] sm:$0xff] }
 0x117   : > { %2423 = vst [vmem:[%s3587_s17 + $0x758] sm:$0xff] %v1399_v25  ;;  %v1431_v25 = vadd.f32 1.0, %v407_v20  ;;  %v439_v20 = vld [vmem:[%s3574_s24 + $0x958] sm:$0xff] }
 0x118   : > { %2424 = vst [vmem:[%s3587_s17 + $0x760] sm:$0xff] %v1400_v27  ;;  %v1432_v27 = vadd.f32 1.0, %v408_v22  ;;  %v440_v22 = vld [vmem:[%s3574_s24 + $0x960] sm:$0xff] }
 0x119   : > { %2425 = vst [vmem:[%s3587_s17 + $0x768] sm:$0xff] %v1401_v29  ;;  %v1433_v29 = vadd.f32 1.0, %v409_v24  ;;  %v441_v24 = vld [vmem:[%s3574_s24 + $0x968] sm:$0xff] }
 0x11a   : > { %2426 = vst [vmem:[%s3587_s17 + $0x770] sm:$0xff] %v1402_v31  ;;  %v1434_v31 = vadd.f32 1.0, %v410_v26  ;;  %v442_v26 = vld [vmem:[%s3574_s24 + $0x970] sm:$0xff] }
 0x11b   : > { %2427 = vst [vmem:[%s3587_s17 + $0x778] sm:$0xff] %v1403_v33  ;;  %v1435_v33 = vadd.f32 1.0, %v411_v28  ;;  %v443_v28 = vld [vmem:[%s3574_s24 + $0x978] sm:$0xff] }
 0x11c   : > { %2428 = vst [vmem:[%s3587_s17 + $0x780] sm:$0xff] %v1404_v35  ;;  %v1436_v35 = vadd.f32 1.0, %v412_v30  ;;  %v444_v30 = vld [vmem:[%s3574_s24 + $0x980] sm:$0xff] }
 0x11d   : > { %2429 = vst [vmem:[%s3587_s17 + $0x788] sm:$0xff] %v1405_v37  ;;  %v1437_v37 = vadd.f32 1.0, %v413_v32  ;;  %v445_v32 = vld [vmem:[%s3574_s24 + $0x988] sm:$0xff] }
 0x11e   : > { %2430 = vst [vmem:[%s3587_s17 + $0x790] sm:$0xff] %v1406_v39  ;;  %v1438_v39 = vadd.f32 1.0, %v414_v34  ;;  %v446_v34 = vld [vmem:[%s3574_s24 + $0x990] sm:$0xff] }
 0x11f   : > { %2431 = vst [vmem:[%s3587_s17 + $0x798] sm:$0xff] %v1407_v41  ;;  %v1439_v41 = vadd.f32 1.0, %v415_v36  ;;  %v447_v36 = vld [vmem:[%s3574_s24 + $0x998] sm:$0xff] }
 0x120   : > { %2432 = vst [vmem:[%s3587_s17 + $0x7a0] sm:$0xff] %v1408_v43  ;;  %v1440_v43 = vadd.f32 1.0, %v416_v38  ;;  %v448_v38 = vld [vmem:[%s3574_s24 + $0x9a0] sm:$0xff] }
 0x121   : > { %2433 = vst [vmem:[%s3587_s17 + $0x7a8] sm:$0xff] %v1409_v45  ;;  %v1441_v45 = vadd.f32 1.0, %v417_v40  ;;  %v449_v40 = vld [vmem:[%s3574_s24 + $0x9a8] sm:$0xff] }
 0x122   : > { %2434 = vst [vmem:[%s3587_s17 + $0x7b0] sm:$0xff] %v1410_v47  ;;  %v1442_v47 = vadd.f32 1.0, %v418_v42  ;;  %v450_v42 = vld [vmem:[%s3574_s24 + $0x9b0] sm:$0xff] }
 0x123   : > { %2435 = vst [vmem:[%s3587_s17 + $0x7b8] sm:$0xff] %v1411_v49  ;;  %v1443_v49 = vadd.f32 1.0, %v419_v44  ;;  %v451_v44 = vld [vmem:[%s3574_s24 + $0x9b8] sm:$0xff] }
 0x124   : > { %2436 = vst [vmem:[%s3587_s17 + $0x7c0] sm:$0xff] %v1412_v51  ;;  %v1444_v51 = vadd.f32 1.0, %v420_v46  ;;  %v452_v46 = vld [vmem:[%s3574_s24 + $0x9c0] sm:$0xff] }
 0x125   : > { %2437 = vst [vmem:[%s3587_s17 + $0x7c8] sm:$0xff] %v1413_v53  ;;  %v1445_v53 = vadd.f32 1.0, %v421_v48  ;;  %v453_v48 = vld [vmem:[%s3574_s24 + $0x9c8] sm:$0xff] }
 0x126   : > { %2438 = vst [vmem:[%s3587_s17 + $0x7d0] sm:$0xff] %v1414_v55  ;;  %v1446_v55 = vadd.f32 1.0, %v422_v50  ;;  %v454_v50 = vld [vmem:[%s3574_s24 + $0x9d0] sm:$0xff] }
 0x127   : > { %2439 = vst [vmem:[%s3587_s17 + $0x7d8] sm:$0xff] %v1415_v57  ;;  %v1447_v57 = vadd.f32 1.0, %v423_v52  ;;  %v455_v52 = vld [vmem:[%s3574_s24 + $0x9d8] sm:$0xff] }
 0x128   : > { %2440 = vst [vmem:[%s3587_s17 + $0x7e0] sm:$0xff] %v1416_v59  ;;  %v1448_v59 = vadd.f32 1.0, %v424_v54  ;;  %v456_v54 = vld [vmem:[%s3574_s24 + $0x9e0] sm:$0xff] }
 0x129   : > { %2441 = vst [vmem:[%s3587_s17 + $0x7e8] sm:$0xff] %v1417_v61  ;;  %v1449_v61 = vadd.f32 1.0, %v425_v56  ;;  %v457_v56 = vld [vmem:[%s3574_s24 + $0x9e8] sm:$0xff] }
 0x12a   : > { %2442 = vst [vmem:[%s3587_s17 + $0x7f0] sm:$0xff] %v1418_v63  ;;  %v1450_v63 = vadd.f32 1.0, %v426_v58  ;;  %v458_v58 = vld [vmem:[%s3574_s24 + $0x9f0] sm:$0xff] }
 0x12b   : > { %2443 = vst [vmem:[%s3587_s17 + $0x7f8] sm:$0xff] %v1419_v1  ;;  %v1451_v1 = vadd.f32 1.0, %v427_v60  ;;  %v459_v60 = vld [vmem:[%s3574_s24 + $0x9f8] sm:$0xff] }
 0x12c   : > { %2444 = vst [vmem:[%s3587_s17 + $0x800] sm:$0xff] %v1420_v3  ;;  %v1452_v3 = vadd.f32 1.0, %v428_v62  ;;  %v460_v62 = vld [vmem:[%s3574_s24 + $0xa00] sm:$0xff] }
 0x12d   : > { %2445 = vst [vmem:[%s3587_s17 + $0x808] sm:$0xff] %v1421_v5  ;;  %v1453_v5 = vadd.f32 1.0, %v429_v0  ;;  %v461_v0 = vld [vmem:[%s3574_s24 + $0xa08] sm:$0xff] }
 0x12e   : > { %2446 = vst [vmem:[%s3587_s17 + $0x810] sm:$0xff] %v1422_v7  ;;  %v1454_v7 = vadd.f32 1.0, %v430_v2  ;;  %v462_v2 = vld [vmem:[%s3574_s24 + $0xa10] sm:$0xff] }
 0x12f   : > { %2447 = vst [vmem:[%s3587_s17 + $0x818] sm:$0xff] %v1423_v9  ;;  %v1455_v9 = vadd.f32 1.0, %v431_v4  ;;  %v463_v4 = vld [vmem:[%s3574_s24 + $0xa18] sm:$0xff] }
 0x130   : > { %2448 = vst [vmem:[%s3587_s17 + $0x820] sm:$0xff] %v1424_v11  ;;  %v1456_v11 = vadd.f32 1.0, %v432_v6  ;;  %v464_v6 = vld [vmem:[%s3574_s24 + $0xa20] sm:$0xff] }
 0x131   : > { %2449 = vst [vmem:[%s3587_s17 + $0x828] sm:$0xff] %v1425_v13  ;;  %v1457_v13 = vadd.f32 1.0, %v433_v8  ;;  %v465_v8 = vld [vmem:[%s3574_s24 + $0xa28] sm:$0xff] }
 0x132   : > { %2450 = vst [vmem:[%s3587_s17 + $0x830] sm:$0xff] %v1426_v15  ;;  %v1458_v15 = vadd.f32 1.0, %v434_v10  ;;  %v466_v10 = vld [vmem:[%s3574_s24 + $0xa30] sm:$0xff] }
 0x133   : > { %2451 = vst [vmem:[%s3587_s17 + $0x838] sm:$0xff] %v1427_v17  ;;  %v1459_v17 = vadd.f32 1.0, %v435_v12  ;;  %v467_v12 = vld [vmem:[%s3574_s24 + $0xa38] sm:$0xff] }
 0x134   : > { %2452 = vst [vmem:[%s3587_s17 + $0x840] sm:$0xff] %v1428_v19  ;;  %v1460_v19 = vadd.f32 1.0, %v436_v14  ;;  %v468_v14 = vld [vmem:[%s3574_s24 + $0xa40] sm:$0xff] }
 0x135   : > { %2453 = vst [vmem:[%s3587_s17 + $0x848] sm:$0xff] %v1429_v21  ;;  %v1461_v21 = vadd.f32 1.0, %v437_v16  ;;  %v469_v16 = vld [vmem:[%s3574_s24 + $0xa48] sm:$0xff] }
 0x136   : > { %2454 = vst [vmem:[%s3587_s17 + $0x850] sm:$0xff] %v1430_v23  ;;  %v1462_v23 = vadd.f32 1.0, %v438_v18  ;;  %v470_v18 = vld [vmem:[%s3574_s24 + $0xa50] sm:$0xff] }
 0x137   : > { %2455 = vst [vmem:[%s3587_s17 + $0x858] sm:$0xff] %v1431_v25  ;;  %v1463_v25 = vadd.f32 1.0, %v439_v20  ;;  %v471_v20 = vld [vmem:[%s3574_s24 + $0xa58] sm:$0xff] }
 0x138   : > { %2456 = vst [vmem:[%s3587_s17 + $0x860] sm:$0xff] %v1432_v27  ;;  %v1464_v27 = vadd.f32 1.0, %v440_v22  ;;  %v472_v22 = vld [vmem:[%s3574_s24 + $0xa60] sm:$0xff] }
 0x139   : > { %2457 = vst [vmem:[%s3587_s17 + $0x868] sm:$0xff] %v1433_v29  ;;  %v1465_v29 = vadd.f32 1.0, %v441_v24  ;;  %v473_v24 = vld [vmem:[%s3574_s24 + $0xa68] sm:$0xff] }
 0x13a   : > { %2458 = vst [vmem:[%s3587_s17 + $0x870] sm:$0xff] %v1434_v31  ;;  %v1466_v31 = vadd.f32 1.0, %v442_v26  ;;  %v474_v26 = vld [vmem:[%s3574_s24 + $0xa70] sm:$0xff] }
 0x13b   : > { %2459 = vst [vmem:[%s3587_s17 + $0x878] sm:$0xff] %v1435_v33  ;;  %v1467_v33 = vadd.f32 1.0, %v443_v28  ;;  %v475_v28 = vld [vmem:[%s3574_s24 + $0xa78] sm:$0xff] }
 0x13c   : > { %2460 = vst [vmem:[%s3587_s17 + $0x880] sm:$0xff] %v1436_v35  ;;  %v1468_v35 = vadd.f32 1.0, %v444_v30  ;;  %v476_v30 = vld [vmem:[%s3574_s24 + $0xa80] sm:$0xff] }
 0x13d   : > { %2461 = vst [vmem:[%s3587_s17 + $0x888] sm:$0xff] %v1437_v37  ;;  %v1469_v37 = vadd.f32 1.0, %v445_v32  ;;  %v477_v32 = vld [vmem:[%s3574_s24 + $0xa88] sm:$0xff] }
 0x13e   : > { %2462 = vst [vmem:[%s3587_s17 + $0x890] sm:$0xff] %v1438_v39  ;;  %v1470_v39 = vadd.f32 1.0, %v446_v34  ;;  %v478_v34 = vld [vmem:[%s3574_s24 + $0xa90] sm:$0xff] }
 0x13f   : > { %2463 = vst [vmem:[%s3587_s17 + $0x898] sm:$0xff] %v1439_v41  ;;  %v1471_v41 = vadd.f32 1.0, %v447_v36  ;;  %v479_v36 = vld [vmem:[%s3574_s24 + $0xa98] sm:$0xff] }
 0x140   : > { %2464 = vst [vmem:[%s3587_s17 + $0x8a0] sm:$0xff] %v1440_v43  ;;  %v1472_v43 = vadd.f32 1.0, %v448_v38  ;;  %v480_v38 = vld [vmem:[%s3574_s24 + $0xaa0] sm:$0xff] }
 0x141   : > { %2465 = vst [vmem:[%s3587_s17 + $0x8a8] sm:$0xff] %v1441_v45  ;;  %v1473_v45 = vadd.f32 1.0, %v449_v40  ;;  %v481_v40 = vld [vmem:[%s3574_s24 + $0xaa8] sm:$0xff] }
 0x142   : > { %2466 = vst [vmem:[%s3587_s17 + $0x8b0] sm:$0xff] %v1442_v47  ;;  %v1474_v47 = vadd.f32 1.0, %v450_v42  ;;  %v482_v42 = vld [vmem:[%s3574_s24 + $0xab0] sm:$0xff] }
 0x143   : > { %2467 = vst [vmem:[%s3587_s17 + $0x8b8] sm:$0xff] %v1443_v49  ;;  %v1475_v49 = vadd.f32 1.0, %v451_v44  ;;  %v483_v44 = vld [vmem:[%s3574_s24 + $0xab8] sm:$0xff] }
 0x144   : > { %2468 = vst [vmem:[%s3587_s17 + $0x8c0] sm:$0xff] %v1444_v51  ;;  %v1476_v51 = vadd.f32 1.0, %v452_v46  ;;  %v484_v46 = vld [vmem:[%s3574_s24 + $0xac0] sm:$0xff] }
 0x145   : > { %2469 = vst [vmem:[%s3587_s17 + $0x8c8] sm:$0xff] %v1445_v53  ;;  %v1477_v53 = vadd.f32 1.0, %v453_v48  ;;  %v485_v48 = vld [vmem:[%s3574_s24 + $0xac8] sm:$0xff] }
 0x146   : > { %2470 = vst [vmem:[%s3587_s17 + $0x8d0] sm:$0xff] %v1446_v55  ;;  %v1478_v55 = vadd.f32 1.0, %v454_v50  ;;  %v486_v50 = vld [vmem:[%s3574_s24 + $0xad0] sm:$0xff] }
 0x147   : > { %2471 = vst [vmem:[%s3587_s17 + $0x8d8] sm:$0xff] %v1447_v57  ;;  %v1479_v57 = vadd.f32 1.0, %v455_v52  ;;  %v487_v52 = vld [vmem:[%s3574_s24 + $0xad8] sm:$0xff] }
 0x148   : > { %2472 = vst [vmem:[%s3587_s17 + $0x8e0] sm:$0xff] %v1448_v59  ;;  %v1480_v59 = vadd.f32 1.0, %v456_v54  ;;  %v488_v54 = vld [vmem:[%s3574_s24 + $0xae0] sm:$0xff] }
 0x149   : > { %2473 = vst [vmem:[%s3587_s17 + $0x8e8] sm:$0xff] %v1449_v61  ;;  %v1481_v61 = vadd.f32 1.0, %v457_v56  ;;  %v489_v56 = vld [vmem:[%s3574_s24 + $0xae8] sm:$0xff] }
 0x14a   : > { %2474 = vst [vmem:[%s3587_s17 + $0x8f0] sm:$0xff] %v1450_v63  ;;  %v1482_v63 = vadd.f32 1.0, %v458_v58  ;;  %v490_v58 = vld [vmem:[%s3574_s24 + $0xaf0] sm:$0xff] }
 0x14b   : > { %2475 = vst [vmem:[%s3587_s17 + $0x8f8] sm:$0xff] %v1451_v1  ;;  %v1483_v1 = vadd.f32 1.0, %v459_v60  ;;  %v491_v60 = vld [vmem:[%s3574_s24 + $0xaf8] sm:$0xff] }
 0x14c   : > { %2476 = vst [vmem:[%s3587_s17 + $0x900] sm:$0xff] %v1452_v3  ;;  %v1484_v3 = vadd.f32 1.0, %v460_v62  ;;  %v492_v62 = vld [vmem:[%s3574_s24 + $0xb00] sm:$0xff] }
 0x14d   : > { %2477 = vst [vmem:[%s3587_s17 + $0x908] sm:$0xff] %v1453_v5  ;;  %v1485_v5 = vadd.f32 1.0, %v461_v0  ;;  %v493_v0 = vld [vmem:[%s3574_s24 + $0xb08] sm:$0xff] }
 0x14e   : > { %2478 = vst [vmem:[%s3587_s17 + $0x910] sm:$0xff] %v1454_v7  ;;  %v1486_v7 = vadd.f32 1.0, %v462_v2  ;;  %v494_v2 = vld [vmem:[%s3574_s24 + $0xb10] sm:$0xff] }
 0x14f   : > { %2479 = vst [vmem:[%s3587_s17 + $0x918] sm:$0xff] %v1455_v9  ;;  %v1487_v9 = vadd.f32 1.0, %v463_v4  ;;  %v495_v4 = vld [vmem:[%s3574_s24 + $0xb18] sm:$0xff] }
 0x150   : > { %2480 = vst [vmem:[%s3587_s17 + $0x920] sm:$0xff] %v1456_v11  ;;  %v1488_v11 = vadd.f32 1.0, %v464_v6  ;;  %v496_v6 = vld [vmem:[%s3574_s24 + $0xb20] sm:$0xff] }
 0x151   : > { %2481 = vst [vmem:[%s3587_s17 + $0x928] sm:$0xff] %v1457_v13  ;;  %v1489_v13 = vadd.f32 1.0, %v465_v8  ;;  %v497_v8 = vld [vmem:[%s3574_s24 + $0xb28] sm:$0xff] }
 0x152   : > { %2482 = vst [vmem:[%s3587_s17 + $0x930] sm:$0xff] %v1458_v15  ;;  %v1490_v15 = vadd.f32 1.0, %v466_v10  ;;  %v498_v10 = vld [vmem:[%s3574_s24 + $0xb30] sm:$0xff] }
 0x153   : > { %2483 = vst [vmem:[%s3587_s17 + $0x938] sm:$0xff] %v1459_v17  ;;  %v1491_v17 = vadd.f32 1.0, %v467_v12  ;;  %v499_v12 = vld [vmem:[%s3574_s24 + $0xb38] sm:$0xff] }
 0x154   : > { %2484 = vst [vmem:[%s3587_s17 + $0x940] sm:$0xff] %v1460_v19  ;;  %v1492_v19 = vadd.f32 1.0, %v468_v14  ;;  %v500_v14 = vld [vmem:[%s3574_s24 + $0xb40] sm:$0xff] }
 0x155   : > { %2485 = vst [vmem:[%s3587_s17 + $0x948] sm:$0xff] %v1461_v21  ;;  %v1493_v21 = vadd.f32 1.0, %v469_v16  ;;  %v501_v16 = vld [vmem:[%s3574_s24 + $0xb48] sm:$0xff] }
 0x156   : > { %2486 = vst [vmem:[%s3587_s17 + $0x950] sm:$0xff] %v1462_v23  ;;  %v1494_v23 = vadd.f32 1.0, %v470_v18  ;;  %v502_v18 = vld [vmem:[%s3574_s24 + $0xb50] sm:$0xff] }
 0x157   : > { %2487 = vst [vmem:[%s3587_s17 + $0x958] sm:$0xff] %v1463_v25  ;;  %v1495_v25 = vadd.f32 1.0, %v471_v20  ;;  %v503_v20 = vld [vmem:[%s3574_s24 + $0xb58] sm:$0xff] }
 0x158   : > { %2488 = vst [vmem:[%s3587_s17 + $0x960] sm:$0xff] %v1464_v27  ;;  %v1496_v27 = vadd.f32 1.0, %v472_v22  ;;  %v504_v22 = vld [vmem:[%s3574_s24 + $0xb60] sm:$0xff] }
 0x159   : > { %2489 = vst [vmem:[%s3587_s17 + $0x968] sm:$0xff] %v1465_v29  ;;  %v1497_v29 = vadd.f32 1.0, %v473_v24  ;;  %v505_v24 = vld [vmem:[%s3574_s24 + $0xb68] sm:$0xff] }
 0x15a   : > { %2490 = vst [vmem:[%s3587_s17 + $0x970] sm:$0xff] %v1466_v31  ;;  %v1498_v31 = vadd.f32 1.0, %v474_v26  ;;  %v506_v26 = vld [vmem:[%s3574_s24 + $0xb70] sm:$0xff] }
 0x15b   : > { %2491 = vst [vmem:[%s3587_s17 + $0x978] sm:$0xff] %v1467_v33  ;;  %v1499_v33 = vadd.f32 1.0, %v475_v28  ;;  %v507_v28 = vld [vmem:[%s3574_s24 + $0xb78] sm:$0xff] }
 0x15c   : > { %2492 = vst [vmem:[%s3587_s17 + $0x980] sm:$0xff] %v1468_v35  ;;  %v1500_v35 = vadd.f32 1.0, %v476_v30  ;;  %v508_v30 = vld [vmem:[%s3574_s24 + $0xb80] sm:$0xff] }
 0x15d   : > { %2493 = vst [vmem:[%s3587_s17 + $0x988] sm:$0xff] %v1469_v37  ;;  %v1501_v37 = vadd.f32 1.0, %v477_v32  ;;  %v509_v32 = vld [vmem:[%s3574_s24 + $0xb88] sm:$0xff] }
 0x15e   : > { %2494 = vst [vmem:[%s3587_s17 + $0x990] sm:$0xff] %v1470_v39  ;;  %v1502_v39 = vadd.f32 1.0, %v478_v34  ;;  %v510_v34 = vld [vmem:[%s3574_s24 + $0xb90] sm:$0xff] }
 0x15f   : > { %2495 = vst [vmem:[%s3587_s17 + $0x998] sm:$0xff] %v1471_v41  ;;  %v1503_v41 = vadd.f32 1.0, %v479_v36  ;;  %v511_v36 = vld [vmem:[%s3574_s24 + $0xb98] sm:$0xff] }
 0x160   : > { %2496 = vst [vmem:[%s3587_s17 + $0x9a0] sm:$0xff] %v1472_v43  ;;  %v1504_v43 = vadd.f32 1.0, %v480_v38  ;;  %v512_v38 = vld [vmem:[%s3574_s24 + $0xba0] sm:$0xff] }
 0x161   : > { %2497 = vst [vmem:[%s3587_s17 + $0x9a8] sm:$0xff] %v1473_v45  ;;  %v1505_v45 = vadd.f32 1.0, %v481_v40  ;;  %v513_v40 = vld [vmem:[%s3574_s24 + $0xba8] sm:$0xff] }
 0x162   : > { %2498 = vst [vmem:[%s3587_s17 + $0x9b0] sm:$0xff] %v1474_v47  ;;  %v1506_v47 = vadd.f32 1.0, %v482_v42  ;;  %v514_v42 = vld [vmem:[%s3574_s24 + $0xbb0] sm:$0xff] }
 0x163   : > { %2499 = vst [vmem:[%s3587_s17 + $0x9b8] sm:$0xff] %v1475_v49  ;;  %v1507_v49 = vadd.f32 1.0, %v483_v44  ;;  %v515_v44 = vld [vmem:[%s3574_s24 + $0xbb8] sm:$0xff] }
 0x164   : > { %2500 = vst [vmem:[%s3587_s17 + $0x9c0] sm:$0xff] %v1476_v51  ;;  %v1508_v51 = vadd.f32 1.0, %v484_v46  ;;  %v516_v46 = vld [vmem:[%s3574_s24 + $0xbc0] sm:$0xff] }
 0x165   : > { %2501 = vst [vmem:[%s3587_s17 + $0x9c8] sm:$0xff] %v1477_v53  ;;  %v1509_v53 = vadd.f32 1.0, %v485_v48  ;;  %v517_v48 = vld [vmem:[%s3574_s24 + $0xbc8] sm:$0xff] }
 0x166   : > { %2502 = vst [vmem:[%s3587_s17 + $0x9d0] sm:$0xff] %v1478_v55  ;;  %v1510_v55 = vadd.f32 1.0, %v486_v50  ;;  %v518_v50 = vld [vmem:[%s3574_s24 + $0xbd0] sm:$0xff] }
 0x167   : > { %2503 = vst [vmem:[%s3587_s17 + $0x9d8] sm:$0xff] %v1479_v57  ;;  %v1511_v57 = vadd.f32 1.0, %v487_v52  ;;  %v519_v52 = vld [vmem:[%s3574_s24 + $0xbd8] sm:$0xff] }
 0x168   : > { %2504 = vst [vmem:[%s3587_s17 + $0x9e0] sm:$0xff] %v1480_v59  ;;  %v1512_v59 = vadd.f32 1.0, %v488_v54  ;;  %v520_v54 = vld [vmem:[%s3574_s24 + $0xbe0] sm:$0xff] }
 0x169   : > { %2505 = vst [vmem:[%s3587_s17 + $0x9e8] sm:$0xff] %v1481_v61  ;;  %v1513_v61 = vadd.f32 1.0, %v489_v56  ;;  %v521_v56 = vld [vmem:[%s3574_s24 + $0xbe8] sm:$0xff] }
 0x16a   : > { %2506 = vst [vmem:[%s3587_s17 + $0x9f0] sm:$0xff] %v1482_v63  ;;  %v1514_v63 = vadd.f32 1.0, %v490_v58  ;;  %v522_v58 = vld [vmem:[%s3574_s24 + $0xbf0] sm:$0xff] }
 0x16b   : > { %2507 = vst [vmem:[%s3587_s17 + $0x9f8] sm:$0xff] %v1483_v1  ;;  %v1515_v1 = vadd.f32 1.0, %v491_v60  ;;  %v523_v60 = vld [vmem:[%s3574_s24 + $0xbf8] sm:$0xff] }
 0x16c   : > { %2508 = vst [vmem:[%s3587_s17 + $0xa00] sm:$0xff] %v1484_v3  ;;  %v1516_v3 = vadd.f32 1.0, %v492_v62  ;;  %v524_v62 = vld [vmem:[%s3574_s24 + $0xc00] sm:$0xff] }
 0x16d   : > { %2509 = vst [vmem:[%s3587_s17 + $0xa08] sm:$0xff] %v1485_v5  ;;  %v1517_v5 = vadd.f32 1.0, %v493_v0  ;;  %v525_v0 = vld [vmem:[%s3574_s24 + $0xc08] sm:$0xff] }
 0x16e   : > { %2510 = vst [vmem:[%s3587_s17 + $0xa10] sm:$0xff] %v1486_v7  ;;  %v1518_v7 = vadd.f32 1.0, %v494_v2  ;;  %v526_v2 = vld [vmem:[%s3574_s24 + $0xc10] sm:$0xff] }
 0x16f   : > { %2511 = vst [vmem:[%s3587_s17 + $0xa18] sm:$0xff] %v1487_v9  ;;  %v1519_v9 = vadd.f32 1.0, %v495_v4  ;;  %v527_v4 = vld [vmem:[%s3574_s24 + $0xc18] sm:$0xff] }
 0x170   : > { %2512 = vst [vmem:[%s3587_s17 + $0xa20] sm:$0xff] %v1488_v11  ;;  %v1520_v11 = vadd.f32 1.0, %v496_v6  ;;  %v528_v6 = vld [vmem:[%s3574_s24 + $0xc20] sm:$0xff] }
 0x171   : > { %2513 = vst [vmem:[%s3587_s17 + $0xa28] sm:$0xff] %v1489_v13  ;;  %v1521_v13 = vadd.f32 1.0, %v497_v8  ;;  %v529_v8 = vld [vmem:[%s3574_s24 + $0xc28] sm:$0xff] }
 0x172   : > { %2514 = vst [vmem:[%s3587_s17 + $0xa30] sm:$0xff] %v1490_v15  ;;  %v1522_v15 = vadd.f32 1.0, %v498_v10  ;;  %v530_v10 = vld [vmem:[%s3574_s24 + $0xc30] sm:$0xff] }
 0x173   : > { %2515 = vst [vmem:[%s3587_s17 + $0xa38] sm:$0xff] %v1491_v17  ;;  %v1523_v17 = vadd.f32 1.0, %v499_v12  ;;  %v531_v12 = vld [vmem:[%s3574_s24 + $0xc38] sm:$0xff] }
 0x174   : > { %2516 = vst [vmem:[%s3587_s17 + $0xa40] sm:$0xff] %v1492_v19  ;;  %v1524_v19 = vadd.f32 1.0, %v500_v14  ;;  %v532_v14 = vld [vmem:[%s3574_s24 + $0xc40] sm:$0xff] }
 0x175   : > { %2517 = vst [vmem:[%s3587_s17 + $0xa48] sm:$0xff] %v1493_v21  ;;  %v1525_v21 = vadd.f32 1.0, %v501_v16  ;;  %v533_v16 = vld [vmem:[%s3574_s24 + $0xc48] sm:$0xff] }
 0x176   : > { %2518 = vst [vmem:[%s3587_s17 + $0xa50] sm:$0xff] %v1494_v23  ;;  %v1526_v23 = vadd.f32 1.0, %v502_v18  ;;  %v534_v18 = vld [vmem:[%s3574_s24 + $0xc50] sm:$0xff] }
 0x177   : > { %2519 = vst [vmem:[%s3587_s17 + $0xa58] sm:$0xff] %v1495_v25  ;;  %v1527_v25 = vadd.f32 1.0, %v503_v20  ;;  %v535_v20 = vld [vmem:[%s3574_s24 + $0xc58] sm:$0xff] }
 0x178   : > { %2520 = vst [vmem:[%s3587_s17 + $0xa60] sm:$0xff] %v1496_v27  ;;  %v1528_v27 = vadd.f32 1.0, %v504_v22  ;;  %v536_v22 = vld [vmem:[%s3574_s24 + $0xc60] sm:$0xff] }
 0x179   : > { %2521 = vst [vmem:[%s3587_s17 + $0xa68] sm:$0xff] %v1497_v29  ;;  %v1529_v29 = vadd.f32 1.0, %v505_v24  ;;  %v537_v24 = vld [vmem:[%s3574_s24 + $0xc68] sm:$0xff] }
 0x17a   : > { %2522 = vst [vmem:[%s3587_s17 + $0xa70] sm:$0xff] %v1498_v31  ;;  %v1530_v31 = vadd.f32 1.0, %v506_v26  ;;  %v538_v26 = vld [vmem:[%s3574_s24 + $0xc70] sm:$0xff] }
 0x17b   : > { %2523 = vst [vmem:[%s3587_s17 + $0xa78] sm:$0xff] %v1499_v33  ;;  %v1531_v33 = vadd.f32 1.0, %v507_v28  ;;  %v539_v28 = vld [vmem:[%s3574_s24 + $0xc78] sm:$0xff] }
 0x17c   : > { %2524 = vst [vmem:[%s3587_s17 + $0xa80] sm:$0xff] %v1500_v35  ;;  %v1532_v35 = vadd.f32 1.0, %v508_v30  ;;  %v540_v30 = vld [vmem:[%s3574_s24 + $0xc80] sm:$0xff] }
 0x17d   : > { %2525 = vst [vmem:[%s3587_s17 + $0xa88] sm:$0xff] %v1501_v37  ;;  %v1533_v37 = vadd.f32 1.0, %v509_v32  ;;  %v541_v32 = vld [vmem:[%s3574_s24 + $0xc88] sm:$0xff] }
 0x17e   : > { %2526 = vst [vmem:[%s3587_s17 + $0xa90] sm:$0xff] %v1502_v39  ;;  %v1534_v39 = vadd.f32 1.0, %v510_v34  ;;  %v542_v34 = vld [vmem:[%s3574_s24 + $0xc90] sm:$0xff] }
 0x17f   : > { %2527 = vst [vmem:[%s3587_s17 + $0xa98] sm:$0xff] %v1503_v41  ;;  %v1535_v41 = vadd.f32 1.0, %v511_v36  ;;  %v543_v36 = vld [vmem:[%s3574_s24 + $0xc98] sm:$0xff] }
 0x180   : > { %2528 = vst [vmem:[%s3587_s17 + $0xaa0] sm:$0xff] %v1504_v43  ;;  %v1536_v43 = vadd.f32 1.0, %v512_v38  ;;  %v544_v38 = vld [vmem:[%s3574_s24 + $0xca0] sm:$0xff] }
 0x181   : > { %2529 = vst [vmem:[%s3587_s17 + $0xaa8] sm:$0xff] %v1505_v45  ;;  %v1537_v45 = vadd.f32 1.0, %v513_v40  ;;  %v545_v40 = vld [vmem:[%s3574_s24 + $0xca8] sm:$0xff] }
 0x182   : > { %2530 = vst [vmem:[%s3587_s17 + $0xab0] sm:$0xff] %v1506_v47  ;;  %v1538_v47 = vadd.f32 1.0, %v514_v42  ;;  %v546_v42 = vld [vmem:[%s3574_s24 + $0xcb0] sm:$0xff] }
 0x183   : > { %2531 = vst [vmem:[%s3587_s17 + $0xab8] sm:$0xff] %v1507_v49  ;;  %v1539_v49 = vadd.f32 1.0, %v515_v44  ;;  %v547_v44 = vld [vmem:[%s3574_s24 + $0xcb8] sm:$0xff] }
 0x184   : > { %2532 = vst [vmem:[%s3587_s17 + $0xac0] sm:$0xff] %v1508_v51  ;;  %v1540_v51 = vadd.f32 1.0, %v516_v46  ;;  %v548_v46 = vld [vmem:[%s3574_s24 + $0xcc0] sm:$0xff] }
 0x185   : > { %2533 = vst [vmem:[%s3587_s17 + $0xac8] sm:$0xff] %v1509_v53  ;;  %v1541_v53 = vadd.f32 1.0, %v517_v48  ;;  %v549_v48 = vld [vmem:[%s3574_s24 + $0xcc8] sm:$0xff] }
 0x186   : > { %2534 = vst [vmem:[%s3587_s17 + $0xad0] sm:$0xff] %v1510_v55  ;;  %v1542_v55 = vadd.f32 1.0, %v518_v50  ;;  %v550_v50 = vld [vmem:[%s3574_s24 + $0xcd0] sm:$0xff] }
 0x187   : > { %2535 = vst [vmem:[%s3587_s17 + $0xad8] sm:$0xff] %v1511_v57  ;;  %v1543_v57 = vadd.f32 1.0, %v519_v52  ;;  %v551_v52 = vld [vmem:[%s3574_s24 + $0xcd8] sm:$0xff] }
 0x188   : > { %2536 = vst [vmem:[%s3587_s17 + $0xae0] sm:$0xff] %v1512_v59  ;;  %v1544_v59 = vadd.f32 1.0, %v520_v54  ;;  %v552_v54 = vld [vmem:[%s3574_s24 + $0xce0] sm:$0xff] }
 0x189   : > { %2537 = vst [vmem:[%s3587_s17 + $0xae8] sm:$0xff] %v1513_v61  ;;  %v1545_v61 = vadd.f32 1.0, %v521_v56  ;;  %v553_v56 = vld [vmem:[%s3574_s24 + $0xce8] sm:$0xff] }
 0x18a   : > { %2538 = vst [vmem:[%s3587_s17 + $0xaf0] sm:$0xff] %v1514_v63  ;;  %v1546_v63 = vadd.f32 1.0, %v522_v58  ;;  %v554_v58 = vld [vmem:[%s3574_s24 + $0xcf0] sm:$0xff] }
 0x18b   : > { %2539 = vst [vmem:[%s3587_s17 + $0xaf8] sm:$0xff] %v1515_v1  ;;  %v1547_v1 = vadd.f32 1.0, %v523_v60  ;;  %v555_v60 = vld [vmem:[%s3574_s24 + $0xcf8] sm:$0xff] }
 0x18c   : > { %2540 = vst [vmem:[%s3587_s17 + $0xb00] sm:$0xff] %v1516_v3  ;;  %v1548_v3 = vadd.f32 1.0, %v524_v62  ;;  %v556_v62 = vld [vmem:[%s3574_s24 + $0xd00] sm:$0xff] }
 0x18d   : > { %2541 = vst [vmem:[%s3587_s17 + $0xb08] sm:$0xff] %v1517_v5  ;;  %v1549_v5 = vadd.f32 1.0, %v525_v0  ;;  %v557_v0 = vld [vmem:[%s3574_s24 + $0xd08] sm:$0xff] }
 0x18e   : > { %2542 = vst [vmem:[%s3587_s17 + $0xb10] sm:$0xff] %v1518_v7  ;;  %v1550_v7 = vadd.f32 1.0, %v526_v2  ;;  %v558_v2 = vld [vmem:[%s3574_s24 + $0xd10] sm:$0xff] }
 0x18f   : > { %2543 = vst [vmem:[%s3587_s17 + $0xb18] sm:$0xff] %v1519_v9  ;;  %v1551_v9 = vadd.f32 1.0, %v527_v4  ;;  %v559_v4 = vld [vmem:[%s3574_s24 + $0xd18] sm:$0xff] }
 0x190   : > { %2544 = vst [vmem:[%s3587_s17 + $0xb20] sm:$0xff] %v1520_v11  ;;  %v1552_v11 = vadd.f32 1.0, %v528_v6  ;;  %v560_v6 = vld [vmem:[%s3574_s24 + $0xd20] sm:$0xff] }
 0x191   : > { %2545 = vst [vmem:[%s3587_s17 + $0xb28] sm:$0xff] %v1521_v13  ;;  %v1553_v13 = vadd.f32 1.0, %v529_v8  ;;  %v561_v8 = vld [vmem:[%s3574_s24 + $0xd28] sm:$0xff] }
 0x192   : > { %2546 = vst [vmem:[%s3587_s17 + $0xb30] sm:$0xff] %v1522_v15  ;;  %v1554_v15 = vadd.f32 1.0, %v530_v10  ;;  %v562_v10 = vld [vmem:[%s3574_s24 + $0xd30] sm:$0xff] }
 0x193   : > { %2547 = vst [vmem:[%s3587_s17 + $0xb38] sm:$0xff] %v1523_v17  ;;  %v1555_v17 = vadd.f32 1.0, %v531_v12  ;;  %v563_v12 = vld [vmem:[%s3574_s24 + $0xd38] sm:$0xff] }
 0x194   : > { %2548 = vst [vmem:[%s3587_s17 + $0xb40] sm:$0xff] %v1524_v19  ;;  %v1556_v19 = vadd.f32 1.0, %v532_v14  ;;  %v564_v14 = vld [vmem:[%s3574_s24 + $0xd40] sm:$0xff] }
 0x195   : > { %2549 = vst [vmem:[%s3587_s17 + $0xb48] sm:$0xff] %v1525_v21  ;;  %v1557_v21 = vadd.f32 1.0, %v533_v16  ;;  %v565_v16 = vld [vmem:[%s3574_s24 + $0xd48] sm:$0xff] }
 0x196   : > { %2550 = vst [vmem:[%s3587_s17 + $0xb50] sm:$0xff] %v1526_v23  ;;  %v1558_v23 = vadd.f32 1.0, %v534_v18  ;;  %v566_v18 = vld [vmem:[%s3574_s24 + $0xd50] sm:$0xff] }
 0x197   : > { %2551 = vst [vmem:[%s3587_s17 + $0xb58] sm:$0xff] %v1527_v25  ;;  %v1559_v25 = vadd.f32 1.0, %v535_v20  ;;  %v567_v20 = vld [vmem:[%s3574_s24 + $0xd58] sm:$0xff] }
 0x198   : > { %2552 = vst [vmem:[%s3587_s17 + $0xb60] sm:$0xff] %v1528_v27  ;;  %v1560_v27 = vadd.f32 1.0, %v536_v22  ;;  %v568_v22 = vld [vmem:[%s3574_s24 + $0xd60] sm:$0xff] }
 0x199   : > { %2553 = vst [vmem:[%s3587_s17 + $0xb68] sm:$0xff] %v1529_v29  ;;  %v1561_v29 = vadd.f32 1.0, %v537_v24  ;;  %v569_v24 = vld [vmem:[%s3574_s24 + $0xd68] sm:$0xff] }
 0x19a   : > { %2554 = vst [vmem:[%s3587_s17 + $0xb70] sm:$0xff] %v1530_v31  ;;  %v1562_v31 = vadd.f32 1.0, %v538_v26  ;;  %v570_v26 = vld [vmem:[%s3574_s24 + $0xd70] sm:$0xff] }
 0x19b   : > { %2555 = vst [vmem:[%s3587_s17 + $0xb78] sm:$0xff] %v1531_v33  ;;  %v1563_v33 = vadd.f32 1.0, %v539_v28  ;;  %v571_v28 = vld [vmem:[%s3574_s24 + $0xd78] sm:$0xff] }
 0x19c   : > { %2556 = vst [vmem:[%s3587_s17 + $0xb80] sm:$0xff] %v1532_v35  ;;  %v1564_v35 = vadd.f32 1.0, %v540_v30  ;;  %v572_v30 = vld [vmem:[%s3574_s24 + $0xd80] sm:$0xff] }
 0x19d   : > { %2557 = vst [vmem:[%s3587_s17 + $0xb88] sm:$0xff] %v1533_v37  ;;  %v1565_v37 = vadd.f32 1.0, %v541_v32  ;;  %v573_v32 = vld [vmem:[%s3574_s24 + $0xd88] sm:$0xff] }
 0x19e   : > { %2558 = vst [vmem:[%s3587_s17 + $0xb90] sm:$0xff] %v1534_v39  ;;  %v1566_v39 = vadd.f32 1.0, %v542_v34  ;;  %v574_v34 = vld [vmem:[%s3574_s24 + $0xd90] sm:$0xff] }
 0x19f   : > { %2559 = vst [vmem:[%s3587_s17 + $0xb98] sm:$0xff] %v1535_v41  ;;  %v1567_v41 = vadd.f32 1.0, %v543_v36  ;;  %v575_v36 = vld [vmem:[%s3574_s24 + $0xd98] sm:$0xff] }
 0x1a0   : > { %2560 = vst [vmem:[%s3587_s17 + $0xba0] sm:$0xff] %v1536_v43  ;;  %v1568_v43 = vadd.f32 1.0, %v544_v38  ;;  %v576_v38 = vld [vmem:[%s3574_s24 + $0xda0] sm:$0xff] }
 0x1a1   : > { %2561 = vst [vmem:[%s3587_s17 + $0xba8] sm:$0xff] %v1537_v45  ;;  %v1569_v45 = vadd.f32 1.0, %v545_v40  ;;  %v577_v40 = vld [vmem:[%s3574_s24 + $0xda8] sm:$0xff] }
 0x1a2   : > { %2562 = vst [vmem:[%s3587_s17 + $0xbb0] sm:$0xff] %v1538_v47  ;;  %v1570_v47 = vadd.f32 1.0, %v546_v42  ;;  %v578_v42 = vld [vmem:[%s3574_s24 + $0xdb0] sm:$0xff] }
 0x1a3   : > { %2563 = vst [vmem:[%s3587_s17 + $0xbb8] sm:$0xff] %v1539_v49  ;;  %v1571_v49 = vadd.f32 1.0, %v547_v44  ;;  %v579_v44 = vld [vmem:[%s3574_s24 + $0xdb8] sm:$0xff] }
 0x1a4   : > { %2564 = vst [vmem:[%s3587_s17 + $0xbc0] sm:$0xff] %v1540_v51  ;;  %v1572_v51 = vadd.f32 1.0, %v548_v46  ;;  %v580_v46 = vld [vmem:[%s3574_s24 + $0xdc0] sm:$0xff] }
 0x1a5   : > { %2565 = vst [vmem:[%s3587_s17 + $0xbc8] sm:$0xff] %v1541_v53  ;;  %v1573_v53 = vadd.f32 1.0, %v549_v48  ;;  %v581_v48 = vld [vmem:[%s3574_s24 + $0xdc8] sm:$0xff] }
 0x1a6   : > { %2566 = vst [vmem:[%s3587_s17 + $0xbd0] sm:$0xff] %v1542_v55  ;;  %v1574_v55 = vadd.f32 1.0, %v550_v50  ;;  %v582_v50 = vld [vmem:[%s3574_s24 + $0xdd0] sm:$0xff] }
 0x1a7   : > { %2567 = vst [vmem:[%s3587_s17 + $0xbd8] sm:$0xff] %v1543_v57  ;;  %v1575_v57 = vadd.f32 1.0, %v551_v52  ;;  %v583_v52 = vld [vmem:[%s3574_s24 + $0xdd8] sm:$0xff] }
 0x1a8   : > { %2568 = vst [vmem:[%s3587_s17 + $0xbe0] sm:$0xff] %v1544_v59  ;;  %v1576_v59 = vadd.f32 1.0, %v552_v54  ;;  %v584_v54 = vld [vmem:[%s3574_s24 + $0xde0] sm:$0xff] }
 0x1a9   : > { %2569 = vst [vmem:[%s3587_s17 + $0xbe8] sm:$0xff] %v1545_v61  ;;  %v1577_v61 = vadd.f32 1.0, %v553_v56  ;;  %v585_v56 = vld [vmem:[%s3574_s24 + $0xde8] sm:$0xff] }
 0x1aa   : > { %2570 = vst [vmem:[%s3587_s17 + $0xbf0] sm:$0xff] %v1546_v63  ;;  %v1578_v63 = vadd.f32 1.0, %v554_v58  ;;  %v586_v58 = vld [vmem:[%s3574_s24 + $0xdf0] sm:$0xff] }
 0x1ab   : > { %2571 = vst [vmem:[%s3587_s17 + $0xbf8] sm:$0xff] %v1547_v1  ;;  %v1579_v1 = vadd.f32 1.0, %v555_v60  ;;  %v587_v60 = vld [vmem:[%s3574_s24 + $0xdf8] sm:$0xff] }
 0x1ac   : > { %2572 = vst [vmem:[%s3587_s17 + $0xc00] sm:$0xff] %v1548_v3  ;;  %v1580_v3 = vadd.f32 1.0, %v556_v62  ;;  %v588_v62 = vld [vmem:[%s3574_s24 + $0xe00] sm:$0xff] }
 0x1ad   : > { %2573 = vst [vmem:[%s3587_s17 + $0xc08] sm:$0xff] %v1549_v5  ;;  %v1581_v5 = vadd.f32 1.0, %v557_v0  ;;  %v589_v0 = vld [vmem:[%s3574_s24 + $0xe08] sm:$0xff] }
 0x1ae   : > { %2574 = vst [vmem:[%s3587_s17 + $0xc10] sm:$0xff] %v1550_v7  ;;  %v1582_v7 = vadd.f32 1.0, %v558_v2  ;;  %v590_v2 = vld [vmem:[%s3574_s24 + $0xe10] sm:$0xff] }
 0x1af   : > { %2575 = vst [vmem:[%s3587_s17 + $0xc18] sm:$0xff] %v1551_v9  ;;  %v1583_v9 = vadd.f32 1.0, %v559_v4  ;;  %v591_v4 = vld [vmem:[%s3574_s24 + $0xe18] sm:$0xff] }
 0x1b0   : > { %2576 = vst [vmem:[%s3587_s17 + $0xc20] sm:$0xff] %v1552_v11  ;;  %v1584_v11 = vadd.f32 1.0, %v560_v6  ;;  %v592_v6 = vld [vmem:[%s3574_s24 + $0xe20] sm:$0xff] }
 0x1b1   : > { %2577 = vst [vmem:[%s3587_s17 + $0xc28] sm:$0xff] %v1553_v13  ;;  %v1585_v13 = vadd.f32 1.0, %v561_v8  ;;  %v593_v8 = vld [vmem:[%s3574_s24 + $0xe28] sm:$0xff] }
 0x1b2   : > { %2578 = vst [vmem:[%s3587_s17 + $0xc30] sm:$0xff] %v1554_v15  ;;  %v1586_v15 = vadd.f32 1.0, %v562_v10  ;;  %v594_v10 = vld [vmem:[%s3574_s24 + $0xe30] sm:$0xff] }
 0x1b3   : > { %2579 = vst [vmem:[%s3587_s17 + $0xc38] sm:$0xff] %v1555_v17  ;;  %v1587_v17 = vadd.f32 1.0, %v563_v12  ;;  %v595_v12 = vld [vmem:[%s3574_s24 + $0xe38] sm:$0xff] }
 0x1b4   : > { %2580 = vst [vmem:[%s3587_s17 + $0xc40] sm:$0xff] %v1556_v19  ;;  %v1588_v19 = vadd.f32 1.0, %v564_v14  ;;  %v596_v14 = vld [vmem:[%s3574_s24 + $0xe40] sm:$0xff] }
 0x1b5   : > { %2581 = vst [vmem:[%s3587_s17 + $0xc48] sm:$0xff] %v1557_v21  ;;  %v1589_v21 = vadd.f32 1.0, %v565_v16  ;;  %v597_v16 = vld [vmem:[%s3574_s24 + $0xe48] sm:$0xff] }
 0x1b6   : > { %2582 = vst [vmem:[%s3587_s17 + $0xc50] sm:$0xff] %v1558_v23  ;;  %v1590_v23 = vadd.f32 1.0, %v566_v18  ;;  %v598_v18 = vld [vmem:[%s3574_s24 + $0xe50] sm:$0xff] }
 0x1b7   : > { %2583 = vst [vmem:[%s3587_s17 + $0xc58] sm:$0xff] %v1559_v25  ;;  %v1591_v25 = vadd.f32 1.0, %v567_v20  ;;  %v599_v20 = vld [vmem:[%s3574_s24 + $0xe58] sm:$0xff] }
 0x1b8   : > { %2584 = vst [vmem:[%s3587_s17 + $0xc60] sm:$0xff] %v1560_v27  ;;  %v1592_v27 = vadd.f32 1.0, %v568_v22  ;;  %v600_v22 = vld [vmem:[%s3574_s24 + $0xe60] sm:$0xff] }
 0x1b9   : > { %2585 = vst [vmem:[%s3587_s17 + $0xc68] sm:$0xff] %v1561_v29  ;;  %v1593_v29 = vadd.f32 1.0, %v569_v24  ;;  %v601_v24 = vld [vmem:[%s3574_s24 + $0xe68] sm:$0xff] }
 0x1ba   : > { %2586 = vst [vmem:[%s3587_s17 + $0xc70] sm:$0xff] %v1562_v31  ;;  %v1594_v31 = vadd.f32 1.0, %v570_v26  ;;  %v602_v26 = vld [vmem:[%s3574_s24 + $0xe70] sm:$0xff] }
 0x1bb   : > { %2587 = vst [vmem:[%s3587_s17 + $0xc78] sm:$0xff] %v1563_v33  ;;  %v1595_v33 = vadd.f32 1.0, %v571_v28  ;;  %v603_v28 = vld [vmem:[%s3574_s24 + $0xe78] sm:$0xff] }
 0x1bc   : > { %2588 = vst [vmem:[%s3587_s17 + $0xc80] sm:$0xff] %v1564_v35  ;;  %v1596_v35 = vadd.f32 1.0, %v572_v30  ;;  %v604_v30 = vld [vmem:[%s3574_s24 + $0xe80] sm:$0xff] }
 0x1bd   : > { %2589 = vst [vmem:[%s3587_s17 + $0xc88] sm:$0xff] %v1565_v37  ;;  %v1597_v37 = vadd.f32 1.0, %v573_v32  ;;  %v605_v32 = vld [vmem:[%s3574_s24 + $0xe88] sm:$0xff] }
 0x1be   : > { %2590 = vst [vmem:[%s3587_s17 + $0xc90] sm:$0xff] %v1566_v39  ;;  %v1598_v39 = vadd.f32 1.0, %v574_v34  ;;  %v606_v34 = vld [vmem:[%s3574_s24 + $0xe90] sm:$0xff] }
 0x1bf   : > { %2591 = vst [vmem:[%s3587_s17 + $0xc98] sm:$0xff] %v1567_v41  ;;  %v1599_v41 = vadd.f32 1.0, %v575_v36  ;;  %v607_v36 = vld [vmem:[%s3574_s24 + $0xe98] sm:$0xff] }
 0x1c0   : > { %2592 = vst [vmem:[%s3587_s17 + $0xca0] sm:$0xff] %v1568_v43  ;;  %v1600_v43 = vadd.f32 1.0, %v576_v38  ;;  %v608_v38 = vld [vmem:[%s3574_s24 + $0xea0] sm:$0xff] }
 0x1c1   : > { %2593 = vst [vmem:[%s3587_s17 + $0xca8] sm:$0xff] %v1569_v45  ;;  %v1601_v45 = vadd.f32 1.0, %v577_v40  ;;  %v609_v40 = vld [vmem:[%s3574_s24 + $0xea8] sm:$0xff] }
 0x1c2   : > { %2594 = vst [vmem:[%s3587_s17 + $0xcb0] sm:$0xff] %v1570_v47  ;;  %v1602_v47 = vadd.f32 1.0, %v578_v42  ;;  %v610_v42 = vld [vmem:[%s3574_s24 + $0xeb0] sm:$0xff] }
 0x1c3   : > { %2595 = vst [vmem:[%s3587_s17 + $0xcb8] sm:$0xff] %v1571_v49  ;;  %v1603_v49 = vadd.f32 1.0, %v579_v44  ;;  %v611_v44 = vld [vmem:[%s3574_s24 + $0xeb8] sm:$0xff] }
 0x1c4   : > { %2596 = vst [vmem:[%s3587_s17 + $0xcc0] sm:$0xff] %v1572_v51  ;;  %v1604_v51 = vadd.f32 1.0, %v580_v46  ;;  %v612_v46 = vld [vmem:[%s3574_s24 + $0xec0] sm:$0xff] }
 0x1c5   : > { %2597 = vst [vmem:[%s3587_s17 + $0xcc8] sm:$0xff] %v1573_v53  ;;  %v1605_v53 = vadd.f32 1.0, %v581_v48  ;;  %v613_v48 = vld [vmem:[%s3574_s24 + $0xec8] sm:$0xff] }
 0x1c6   : > { %2598 = vst [vmem:[%s3587_s17 + $0xcd0] sm:$0xff] %v1574_v55  ;;  %v1606_v55 = vadd.f32 1.0, %v582_v50  ;;  %v614_v50 = vld [vmem:[%s3574_s24 + $0xed0] sm:$0xff] }
 0x1c7   : > { %2599 = vst [vmem:[%s3587_s17 + $0xcd8] sm:$0xff] %v1575_v57  ;;  %v1607_v57 = vadd.f32 1.0, %v583_v52  ;;  %v615_v52 = vld [vmem:[%s3574_s24 + $0xed8] sm:$0xff] }
 0x1c8   : > { %2600 = vst [vmem:[%s3587_s17 + $0xce0] sm:$0xff] %v1576_v59  ;;  %v1608_v59 = vadd.f32 1.0, %v584_v54  ;;  %v616_v54 = vld [vmem:[%s3574_s24 + $0xee0] sm:$0xff] }
 0x1c9   : > { %2601 = vst [vmem:[%s3587_s17 + $0xce8] sm:$0xff] %v1577_v61  ;;  %v1609_v61 = vadd.f32 1.0, %v585_v56  ;;  %v617_v56 = vld [vmem:[%s3574_s24 + $0xee8] sm:$0xff] }
 0x1ca   : > { %2602 = vst [vmem:[%s3587_s17 + $0xcf0] sm:$0xff] %v1578_v63  ;;  %v1610_v63 = vadd.f32 1.0, %v586_v58  ;;  %v618_v58 = vld [vmem:[%s3574_s24 + $0xef0] sm:$0xff] }
 0x1cb   : > { %2603 = vst [vmem:[%s3587_s17 + $0xcf8] sm:$0xff] %v1579_v1  ;;  %v1611_v1 = vadd.f32 1.0, %v587_v60  ;;  %v619_v60 = vld [vmem:[%s3574_s24 + $0xef8] sm:$0xff] }
 0x1cc   : > { %2604 = vst [vmem:[%s3587_s17 + $0xd00] sm:$0xff] %v1580_v3  ;;  %v1612_v3 = vadd.f32 1.0, %v588_v62  ;;  %v620_v62 = vld [vmem:[%s3574_s24 + $0xf00] sm:$0xff] }
 0x1cd   : > { %2605 = vst [vmem:[%s3587_s17 + $0xd08] sm:$0xff] %v1581_v5  ;;  %v1613_v5 = vadd.f32 1.0, %v589_v0  ;;  %v621_v0 = vld [vmem:[%s3574_s24 + $0xf08] sm:$0xff] }
 0x1ce   : > { %2606 = vst [vmem:[%s3587_s17 + $0xd10] sm:$0xff] %v1582_v7  ;;  %v1614_v7 = vadd.f32 1.0, %v590_v2  ;;  %v622_v2 = vld [vmem:[%s3574_s24 + $0xf10] sm:$0xff] }
 0x1cf   : > { %2607 = vst [vmem:[%s3587_s17 + $0xd18] sm:$0xff] %v1583_v9  ;;  %v1615_v9 = vadd.f32 1.0, %v591_v4  ;;  %v623_v4 = vld [vmem:[%s3574_s24 + $0xf18] sm:$0xff] }
 0x1d0   : > { %2608 = vst [vmem:[%s3587_s17 + $0xd20] sm:$0xff] %v1584_v11  ;;  %v1616_v11 = vadd.f32 1.0, %v592_v6  ;;  %v624_v6 = vld [vmem:[%s3574_s24 + $0xf20] sm:$0xff] }
 0x1d1   : > { %2609 = vst [vmem:[%s3587_s17 + $0xd28] sm:$0xff] %v1585_v13  ;;  %v1617_v13 = vadd.f32 1.0, %v593_v8  ;;  %v625_v8 = vld [vmem:[%s3574_s24 + $0xf28] sm:$0xff] }
 0x1d2   : > { %2610 = vst [vmem:[%s3587_s17 + $0xd30] sm:$0xff] %v1586_v15  ;;  %v1618_v15 = vadd.f32 1.0, %v594_v10  ;;  %v626_v10 = vld [vmem:[%s3574_s24 + $0xf30] sm:$0xff] }
 0x1d3   : > { %2611 = vst [vmem:[%s3587_s17 + $0xd38] sm:$0xff] %v1587_v17  ;;  %v1619_v17 = vadd.f32 1.0, %v595_v12  ;;  %v627_v12 = vld [vmem:[%s3574_s24 + $0xf38] sm:$0xff] }
 0x1d4   : > { %2612 = vst [vmem:[%s3587_s17 + $0xd40] sm:$0xff] %v1588_v19  ;;  %v1620_v19 = vadd.f32 1.0, %v596_v14  ;;  %v628_v14 = vld [vmem:[%s3574_s24 + $0xf40] sm:$0xff] }
 0x1d5   : > { %2613 = vst [vmem:[%s3587_s17 + $0xd48] sm:$0xff] %v1589_v21  ;;  %v1621_v21 = vadd.f32 1.0, %v597_v16  ;;  %v629_v16 = vld [vmem:[%s3574_s24 + $0xf48] sm:$0xff] }
 0x1d6   : > { %2614 = vst [vmem:[%s3587_s17 + $0xd50] sm:$0xff] %v1590_v23  ;;  %v1622_v23 = vadd.f32 1.0, %v598_v18  ;;  %v630_v18 = vld [vmem:[%s3574_s24 + $0xf50] sm:$0xff] }
 0x1d7   : > { %2615 = vst [vmem:[%s3587_s17 + $0xd58] sm:$0xff] %v1591_v25  ;;  %v1623_v25 = vadd.f32 1.0, %v599_v20  ;;  %v631_v20 = vld [vmem:[%s3574_s24 + $0xf58] sm:$0xff] }
 0x1d8   : > { %2616 = vst [vmem:[%s3587_s17 + $0xd60] sm:$0xff] %v1592_v27  ;;  %v1624_v27 = vadd.f32 1.0, %v600_v22  ;;  %v632_v22 = vld [vmem:[%s3574_s24 + $0xf60] sm:$0xff] }
 0x1d9   : > { %2617 = vst [vmem:[%s3587_s17 + $0xd68] sm:$0xff] %v1593_v29  ;;  %v1625_v29 = vadd.f32 1.0, %v601_v24  ;;  %v633_v24 = vld [vmem:[%s3574_s24 + $0xf68] sm:$0xff] }
 0x1da   : > { %2618 = vst [vmem:[%s3587_s17 + $0xd70] sm:$0xff] %v1594_v31  ;;  %v1626_v31 = vadd.f32 1.0, %v602_v26  ;;  %v634_v26 = vld [vmem:[%s3574_s24 + $0xf70] sm:$0xff] }
 0x1db   : > { %2619 = vst [vmem:[%s3587_s17 + $0xd78] sm:$0xff] %v1595_v33  ;;  %v1627_v33 = vadd.f32 1.0, %v603_v28  ;;  %v635_v28 = vld [vmem:[%s3574_s24 + $0xf78] sm:$0xff] }
 0x1dc   : > { %2620 = vst [vmem:[%s3587_s17 + $0xd80] sm:$0xff] %v1596_v35  ;;  %v1628_v35 = vadd.f32 1.0, %v604_v30  ;;  %v636_v30 = vld [vmem:[%s3574_s24 + $0xf80] sm:$0xff] }
 0x1dd   : > { %2621 = vst [vmem:[%s3587_s17 + $0xd88] sm:$0xff] %v1597_v37  ;;  %v1629_v37 = vadd.f32 1.0, %v605_v32  ;;  %v637_v32 = vld [vmem:[%s3574_s24 + $0xf88] sm:$0xff] }
 0x1de   : > { %2622 = vst [vmem:[%s3587_s17 + $0xd90] sm:$0xff] %v1598_v39  ;;  %v1630_v39 = vadd.f32 1.0, %v606_v34  ;;  %v638_v34 = vld [vmem:[%s3574_s24 + $0xf90] sm:$0xff] }
 0x1df   : > { %2623 = vst [vmem:[%s3587_s17 + $0xd98] sm:$0xff] %v1599_v41  ;;  %v1631_v41 = vadd.f32 1.0, %v607_v36  ;;  %v639_v36 = vld [vmem:[%s3574_s24 + $0xf98] sm:$0xff] }
 0x1e0   : > { %2624 = vst [vmem:[%s3587_s17 + $0xda0] sm:$0xff] %v1600_v43  ;;  %v1632_v43 = vadd.f32 1.0, %v608_v38  ;;  %v640_v38 = vld [vmem:[%s3574_s24 + $0xfa0] sm:$0xff] }
 0x1e1   : > { %2625 = vst [vmem:[%s3587_s17 + $0xda8] sm:$0xff] %v1601_v45  ;;  %v1633_v45 = vadd.f32 1.0, %v609_v40  ;;  %v641_v40 = vld [vmem:[%s3574_s24 + $0xfa8] sm:$0xff] }
 0x1e2   : > { %2626 = vst [vmem:[%s3587_s17 + $0xdb0] sm:$0xff] %v1602_v47  ;;  %v1634_v47 = vadd.f32 1.0, %v610_v42  ;;  %v642_v42 = vld [vmem:[%s3574_s24 + $0xfb0] sm:$0xff] }
 0x1e3   : > { %2627 = vst [vmem:[%s3587_s17 + $0xdb8] sm:$0xff] %v1603_v49  ;;  %v1635_v49 = vadd.f32 1.0, %v611_v44  ;;  %v643_v44 = vld [vmem:[%s3574_s24 + $0xfb8] sm:$0xff] }
 0x1e4   : > { %2628 = vst [vmem:[%s3587_s17 + $0xdc0] sm:$0xff] %v1604_v51  ;;  %v1636_v51 = vadd.f32 1.0, %v612_v46  ;;  %v644_v46 = vld [vmem:[%s3574_s24 + $0xfc0] sm:$0xff] }
 0x1e5   : > { %2629 = vst [vmem:[%s3587_s17 + $0xdc8] sm:$0xff] %v1605_v53  ;;  %v1637_v53 = vadd.f32 1.0, %v613_v48  ;;  %v645_v48 = vld [vmem:[%s3574_s24 + $0xfc8] sm:$0xff] }
 0x1e6   : > { %2630 = vst [vmem:[%s3587_s17 + $0xdd0] sm:$0xff] %v1606_v55  ;;  %v1638_v55 = vadd.f32 1.0, %v614_v50  ;;  %v646_v50 = vld [vmem:[%s3574_s24 + $0xfd0] sm:$0xff] }
 0x1e7   : > { %2631 = vst [vmem:[%s3587_s17 + $0xdd8] sm:$0xff] %v1607_v57  ;;  %v1639_v57 = vadd.f32 1.0, %v615_v52  ;;  %v647_v52 = vld [vmem:[%s3574_s24 + $0xfd8] sm:$0xff] }
 0x1e8   : > { %2632 = vst [vmem:[%s3587_s17 + $0xde0] sm:$0xff] %v1608_v59  ;;  %v1640_v59 = vadd.f32 1.0, %v616_v54  ;;  %v648_v54 = vld [vmem:[%s3574_s24 + $0xfe0] sm:$0xff] }
 0x1e9   : > { %2633 = vst [vmem:[%s3587_s17 + $0xde8] sm:$0xff] %v1609_v61  ;;  %v1641_v61 = vadd.f32 1.0, %v617_v56  ;;  %v649_v56 = vld [vmem:[%s3574_s24 + $0xfe8] sm:$0xff] }
 0x1ea   : > { %2634 = vst [vmem:[%s3587_s17 + $0xdf0] sm:$0xff] %v1610_v63  ;;  %v1642_v63 = vadd.f32 1.0, %v618_v58  ;;  %v650_v58 = vld [vmem:[%s3574_s24 + $0xff0] sm:$0xff] }
 0x1eb   : > { %2635 = vst [vmem:[%s3587_s17 + $0xdf8] sm:$0xff] %v1611_v1  ;;  %v1643_v1 = vadd.f32 1.0, %v619_v60  ;;  %v651_v60 = vld [vmem:[%s3574_s24 + $0xff8] sm:$0xff] }
 0x1ec   : > { %2636 = vst [vmem:[%s3587_s17 + $0xe00] sm:$0xff] %v1612_v3  ;;  %v1644_v3 = vadd.f32 1.0, %v620_v62  ;;  %v652_v62 = vld [vmem:[%s3574_s24 + $0x1000] sm:$0xff] }
 0x1ed   : > { %2637 = vst [vmem:[%s3587_s17 + $0xe08] sm:$0xff] %v1613_v5  ;;  %v1645_v5 = vadd.f32 1.0, %v621_v0  ;;  %v653_v0 = vld [vmem:[%s3574_s24 + $0x1008] sm:$0xff] }
 0x1ee   : > { %2638 = vst [vmem:[%s3587_s17 + $0xe10] sm:$0xff] %v1614_v7  ;;  %v1646_v7 = vadd.f32 1.0, %v622_v2  ;;  %v654_v2 = vld [vmem:[%s3574_s24 + $0x1010] sm:$0xff] }
 0x1ef   : > { %2639 = vst [vmem:[%s3587_s17 + $0xe18] sm:$0xff] %v1615_v9  ;;  %v1647_v9 = vadd.f32 1.0, %v623_v4  ;;  %v655_v4 = vld [vmem:[%s3574_s24 + $0x1018] sm:$0xff] }
 0x1f0   : > { %2640 = vst [vmem:[%s3587_s17 + $0xe20] sm:$0xff] %v1616_v11  ;;  %v1648_v11 = vadd.f32 1.0, %v624_v6  ;;  %v656_v6 = vld [vmem:[%s3574_s24 + $0x1020] sm:$0xff] }
 0x1f1   : > { %2641 = vst [vmem:[%s3587_s17 + $0xe28] sm:$0xff] %v1617_v13  ;;  %v1649_v13 = vadd.f32 1.0, %v625_v8  ;;  %v657_v8 = vld [vmem:[%s3574_s24 + $0x1028] sm:$0xff] }
 0x1f2   : > { %2642 = vst [vmem:[%s3587_s17 + $0xe30] sm:$0xff] %v1618_v15  ;;  %v1650_v15 = vadd.f32 1.0, %v626_v10  ;;  %v658_v10 = vld [vmem:[%s3574_s24 + $0x1030] sm:$0xff] }
 0x1f3   : > { %2643 = vst [vmem:[%s3587_s17 + $0xe38] sm:$0xff] %v1619_v17  ;;  %v1651_v17 = vadd.f32 1.0, %v627_v12  ;;  %v659_v12 = vld [vmem:[%s3574_s24 + $0x1038] sm:$0xff] }
 0x1f4   : > { %2644 = vst [vmem:[%s3587_s17 + $0xe40] sm:$0xff] %v1620_v19  ;;  %v1652_v19 = vadd.f32 1.0, %v628_v14  ;;  %v660_v14 = vld [vmem:[%s3574_s24 + $0x1040] sm:$0xff] }
 0x1f5   : > { %2645 = vst [vmem:[%s3587_s17 + $0xe48] sm:$0xff] %v1621_v21  ;;  %v1653_v21 = vadd.f32 1.0, %v629_v16  ;;  %v661_v16 = vld [vmem:[%s3574_s24 + $0x1048] sm:$0xff] }
 0x1f6   : > { %2646 = vst [vmem:[%s3587_s17 + $0xe50] sm:$0xff] %v1622_v23  ;;  %v1654_v23 = vadd.f32 1.0, %v630_v18  ;;  %v662_v18 = vld [vmem:[%s3574_s24 + $0x1050] sm:$0xff] }
 0x1f7   : > { %2647 = vst [vmem:[%s3587_s17 + $0xe58] sm:$0xff] %v1623_v25  ;;  %v1655_v25 = vadd.f32 1.0, %v631_v20  ;;  %v663_v20 = vld [vmem:[%s3574_s24 + $0x1058] sm:$0xff] }
 0x1f8   : > { %2648 = vst [vmem:[%s3587_s17 + $0xe60] sm:$0xff] %v1624_v27  ;;  %v1656_v27 = vadd.f32 1.0, %v632_v22  ;;  %v664_v22 = vld [vmem:[%s3574_s24 + $0x1060] sm:$0xff] }
 0x1f9   : > { %2649 = vst [vmem:[%s3587_s17 + $0xe68] sm:$0xff] %v1625_v29  ;;  %v1657_v29 = vadd.f32 1.0, %v633_v24  ;;  %v665_v24 = vld [vmem:[%s3574_s24 + $0x1068] sm:$0xff] }
 0x1fa   : > { %2650 = vst [vmem:[%s3587_s17 + $0xe70] sm:$0xff] %v1626_v31  ;;  %v1658_v31 = vadd.f32 1.0, %v634_v26  ;;  %v666_v26 = vld [vmem:[%s3574_s24 + $0x1070] sm:$0xff] }
 0x1fb   : > { %2651 = vst [vmem:[%s3587_s17 + $0xe78] sm:$0xff] %v1627_v33  ;;  %v1659_v33 = vadd.f32 1.0, %v635_v28  ;;  %v667_v28 = vld [vmem:[%s3574_s24 + $0x1078] sm:$0xff] }
 0x1fc   : > { %2652 = vst [vmem:[%s3587_s17 + $0xe80] sm:$0xff] %v1628_v35  ;;  %v1660_v35 = vadd.f32 1.0, %v636_v30  ;;  %v668_v30 = vld [vmem:[%s3574_s24 + $0x1080] sm:$0xff] }
 0x1fd   : > { %2653 = vst [vmem:[%s3587_s17 + $0xe88] sm:$0xff] %v1629_v37  ;;  %v1661_v37 = vadd.f32 1.0, %v637_v32  ;;  %v669_v32 = vld [vmem:[%s3574_s24 + $0x1088] sm:$0xff] }
 0x1fe   : > { %2654 = vst [vmem:[%s3587_s17 + $0xe90] sm:$0xff] %v1630_v39  ;;  %v1662_v39 = vadd.f32 1.0, %v638_v34  ;;  %v670_v34 = vld [vmem:[%s3574_s24 + $0x1090] sm:$0xff] }
 0x1ff   : > { %2655 = vst [vmem:[%s3587_s17 + $0xe98] sm:$0xff] %v1631_v41  ;;  %v1663_v41 = vadd.f32 1.0, %v639_v36  ;;  %v671_v36 = vld [vmem:[%s3574_s24 + $0x1098] sm:$0xff] }
 0x200   : > { %2656 = vst [vmem:[%s3587_s17 + $0xea0] sm:$0xff] %v1632_v43  ;;  %v1664_v43 = vadd.f32 1.0, %v640_v38  ;;  %v672_v38 = vld [vmem:[%s3574_s24 + $0x10a0] sm:$0xff] }
 0x201   : > { %2657 = vst [vmem:[%s3587_s17 + $0xea8] sm:$0xff] %v1633_v45  ;;  %v1665_v45 = vadd.f32 1.0, %v641_v40  ;;  %v673_v40 = vld [vmem:[%s3574_s24 + $0x10a8] sm:$0xff] }
 0x202   : > { %2658 = vst [vmem:[%s3587_s17 + $0xeb0] sm:$0xff] %v1634_v47  ;;  %v1666_v47 = vadd.f32 1.0, %v642_v42  ;;  %v674_v42 = vld [vmem:[%s3574_s24 + $0x10b0] sm:$0xff] }
 0x203   : > { %2659 = vst [vmem:[%s3587_s17 + $0xeb8] sm:$0xff] %v1635_v49  ;;  %v1667_v49 = vadd.f32 1.0, %v643_v44  ;;  %v675_v44 = vld [vmem:[%s3574_s24 + $0x10b8] sm:$0xff] }
 0x204   : > { %2660 = vst [vmem:[%s3587_s17 + $0xec0] sm:$0xff] %v1636_v51  ;;  %v1668_v51 = vadd.f32 1.0, %v644_v46  ;;  %v676_v46 = vld [vmem:[%s3574_s24 + $0x10c0] sm:$0xff] }
 0x205   : > { %2661 = vst [vmem:[%s3587_s17 + $0xec8] sm:$0xff] %v1637_v53  ;;  %v1669_v53 = vadd.f32 1.0, %v645_v48  ;;  %v677_v48 = vld [vmem:[%s3574_s24 + $0x10c8] sm:$0xff] }
 0x206   : > { %2662 = vst [vmem:[%s3587_s17 + $0xed0] sm:$0xff] %v1638_v55  ;;  %v1670_v55 = vadd.f32 1.0, %v646_v50  ;;  %v678_v50 = vld [vmem:[%s3574_s24 + $0x10d0] sm:$0xff] }
 0x207   : > { %2663 = vst [vmem:[%s3587_s17 + $0xed8] sm:$0xff] %v1639_v57  ;;  %v1671_v57 = vadd.f32 1.0, %v647_v52  ;;  %v679_v52 = vld [vmem:[%s3574_s24 + $0x10d8] sm:$0xff] }
 0x208   : > { %2664 = vst [vmem:[%s3587_s17 + $0xee0] sm:$0xff] %v1640_v59  ;;  %v1672_v59 = vadd.f32 1.0, %v648_v54  ;;  %v680_v54 = vld [vmem:[%s3574_s24 + $0x10e0] sm:$0xff] }
 0x209   : > { %2665 = vst [vmem:[%s3587_s17 + $0xee8] sm:$0xff] %v1641_v61  ;;  %v1673_v61 = vadd.f32 1.0, %v649_v56  ;;  %v681_v56 = vld [vmem:[%s3574_s24 + $0x10e8] sm:$0xff] }
 0x20a   : > { %2666 = vst [vmem:[%s3587_s17 + $0xef0] sm:$0xff] %v1642_v63  ;;  %v1674_v63 = vadd.f32 1.0, %v650_v58  ;;  %v682_v58 = vld [vmem:[%s3574_s24 + $0x10f0] sm:$0xff] }
 0x20b   : > { %2667 = vst [vmem:[%s3587_s17 + $0xef8] sm:$0xff] %v1643_v1  ;;  %v1675_v1 = vadd.f32 1.0, %v651_v60  ;;  %v683_v60 = vld [vmem:[%s3574_s24 + $0x10f8] sm:$0xff] }
 0x20c   : > { %2668 = vst [vmem:[%s3587_s17 + $0xf00] sm:$0xff] %v1644_v3  ;;  %v1676_v3 = vadd.f32 1.0, %v652_v62  ;;  %v684_v62 = vld [vmem:[%s3574_s24 + $0x1100] sm:$0xff] }
 0x20d   : > { %2669 = vst [vmem:[%s3587_s17 + $0xf08] sm:$0xff] %v1645_v5  ;;  %v1677_v5 = vadd.f32 1.0, %v653_v0  ;;  %v685_v0 = vld [vmem:[%s3574_s24 + $0x1108] sm:$0xff] }
 0x20e   : > { %2670 = vst [vmem:[%s3587_s17 + $0xf10] sm:$0xff] %v1646_v7  ;;  %v1678_v7 = vadd.f32 1.0, %v654_v2  ;;  %v686_v2 = vld [vmem:[%s3574_s24 + $0x1110] sm:$0xff] }
 0x20f   : > { %2671 = vst [vmem:[%s3587_s17 + $0xf18] sm:$0xff] %v1647_v9  ;;  %v1679_v9 = vadd.f32 1.0, %v655_v4  ;;  %v687_v4 = vld [vmem:[%s3574_s24 + $0x1118] sm:$0xff] }
 0x210   : > { %2672 = vst [vmem:[%s3587_s17 + $0xf20] sm:$0xff] %v1648_v11  ;;  %v1680_v11 = vadd.f32 1.0, %v656_v6  ;;  %v688_v6 = vld [vmem:[%s3574_s24 + $0x1120] sm:$0xff] }
 0x211   : > { %2673 = vst [vmem:[%s3587_s17 + $0xf28] sm:$0xff] %v1649_v13  ;;  %v1681_v13 = vadd.f32 1.0, %v657_v8  ;;  %v689_v8 = vld [vmem:[%s3574_s24 + $0x1128] sm:$0xff] }
 0x212   : > { %2674 = vst [vmem:[%s3587_s17 + $0xf30] sm:$0xff] %v1650_v15  ;;  %v1682_v15 = vadd.f32 1.0, %v658_v10  ;;  %v690_v10 = vld [vmem:[%s3574_s24 + $0x1130] sm:$0xff] }
 0x213   : > { %2675 = vst [vmem:[%s3587_s17 + $0xf38] sm:$0xff] %v1651_v17  ;;  %v1683_v17 = vadd.f32 1.0, %v659_v12  ;;  %v691_v12 = vld [vmem:[%s3574_s24 + $0x1138] sm:$0xff] }
 0x214   : > { %2676 = vst [vmem:[%s3587_s17 + $0xf40] sm:$0xff] %v1652_v19  ;;  %v1684_v19 = vadd.f32 1.0, %v660_v14  ;;  %v692_v14 = vld [vmem:[%s3574_s24 + $0x1140] sm:$0xff] }
 0x215   : > { %2677 = vst [vmem:[%s3587_s17 + $0xf48] sm:$0xff] %v1653_v21  ;;  %v1685_v21 = vadd.f32 1.0, %v661_v16  ;;  %v693_v16 = vld [vmem:[%s3574_s24 + $0x1148] sm:$0xff] }
 0x216   : > { %2678 = vst [vmem:[%s3587_s17 + $0xf50] sm:$0xff] %v1654_v23  ;;  %v1686_v23 = vadd.f32 1.0, %v662_v18  ;;  %v694_v18 = vld [vmem:[%s3574_s24 + $0x1150] sm:$0xff] }
 0x217   : > { %2679 = vst [vmem:[%s3587_s17 + $0xf58] sm:$0xff] %v1655_v25  ;;  %v1687_v25 = vadd.f32 1.0, %v663_v20  ;;  %v695_v20 = vld [vmem:[%s3574_s24 + $0x1158] sm:$0xff] }
 0x218   : > { %2680 = vst [vmem:[%s3587_s17 + $0xf60] sm:$0xff] %v1656_v27  ;;  %v1688_v27 = vadd.f32 1.0, %v664_v22  ;;  %v696_v22 = vld [vmem:[%s3574_s24 + $0x1160] sm:$0xff] }
 0x219   : > { %2681 = vst [vmem:[%s3587_s17 + $0xf68] sm:$0xff] %v1657_v29  ;;  %v1689_v29 = vadd.f32 1.0, %v665_v24  ;;  %v697_v24 = vld [vmem:[%s3574_s24 + $0x1168] sm:$0xff] }
 0x21a   : > { %2682 = vst [vmem:[%s3587_s17 + $0xf70] sm:$0xff] %v1658_v31  ;;  %v1690_v31 = vadd.f32 1.0, %v666_v26  ;;  %v698_v26 = vld [vmem:[%s3574_s24 + $0x1170] sm:$0xff] }
 0x21b   : > { %2683 = vst [vmem:[%s3587_s17 + $0xf78] sm:$0xff] %v1659_v33  ;;  %v1691_v33 = vadd.f32 1.0, %v667_v28  ;;  %v699_v28 = vld [vmem:[%s3574_s24 + $0x1178] sm:$0xff] }
 0x21c   : > { %2684 = vst [vmem:[%s3587_s17 + $0xf80] sm:$0xff] %v1660_v35  ;;  %v1692_v35 = vadd.f32 1.0, %v668_v30  ;;  %v700_v30 = vld [vmem:[%s3574_s24 + $0x1180] sm:$0xff] }
 0x21d   : > { %2685 = vst [vmem:[%s3587_s17 + $0xf88] sm:$0xff] %v1661_v37  ;;  %v1693_v37 = vadd.f32 1.0, %v669_v32  ;;  %v701_v32 = vld [vmem:[%s3574_s24 + $0x1188] sm:$0xff] }
 0x21e   : > { %2686 = vst [vmem:[%s3587_s17 + $0xf90] sm:$0xff] %v1662_v39  ;;  %v1694_v39 = vadd.f32 1.0, %v670_v34  ;;  %v702_v34 = vld [vmem:[%s3574_s24 + $0x1190] sm:$0xff] }
 0x21f   : > { %2687 = vst [vmem:[%s3587_s17 + $0xf98] sm:$0xff] %v1663_v41  ;;  %v1695_v41 = vadd.f32 1.0, %v671_v36  ;;  %v703_v36 = vld [vmem:[%s3574_s24 + $0x1198] sm:$0xff] }
 0x220   : > { %2688 = vst [vmem:[%s3587_s17 + $0xfa0] sm:$0xff] %v1664_v43  ;;  %v1696_v43 = vadd.f32 1.0, %v672_v38  ;;  %v704_v38 = vld [vmem:[%s3574_s24 + $0x11a0] sm:$0xff] }
 0x221   : > { %2689 = vst [vmem:[%s3587_s17 + $0xfa8] sm:$0xff] %v1665_v45  ;;  %v1697_v45 = vadd.f32 1.0, %v673_v40  ;;  %v705_v40 = vld [vmem:[%s3574_s24 + $0x11a8] sm:$0xff] }
 0x222   : > { %2690 = vst [vmem:[%s3587_s17 + $0xfb0] sm:$0xff] %v1666_v47  ;;  %v1698_v47 = vadd.f32 1.0, %v674_v42  ;;  %v706_v42 = vld [vmem:[%s3574_s24 + $0x11b0] sm:$0xff] }
 0x223   : > { %2691 = vst [vmem:[%s3587_s17 + $0xfb8] sm:$0xff] %v1667_v49  ;;  %v1699_v49 = vadd.f32 1.0, %v675_v44  ;;  %v707_v44 = vld [vmem:[%s3574_s24 + $0x11b8] sm:$0xff] }
 0x224   : > { %2692 = vst [vmem:[%s3587_s17 + $0xfc0] sm:$0xff] %v1668_v51  ;;  %v1700_v51 = vadd.f32 1.0, %v676_v46  ;;  %v708_v46 = vld [vmem:[%s3574_s24 + $0x11c0] sm:$0xff] }
 0x225   : > { %2693 = vst [vmem:[%s3587_s17 + $0xfc8] sm:$0xff] %v1669_v53  ;;  %v1701_v53 = vadd.f32 1.0, %v677_v48  ;;  %v709_v48 = vld [vmem:[%s3574_s24 + $0x11c8] sm:$0xff] }
 0x226   : > { %2694 = vst [vmem:[%s3587_s17 + $0xfd0] sm:$0xff] %v1670_v55  ;;  %v1702_v55 = vadd.f32 1.0, %v678_v50  ;;  %v710_v50 = vld [vmem:[%s3574_s24 + $0x11d0] sm:$0xff] }
 0x227   : > { %2695 = vst [vmem:[%s3587_s17 + $0xfd8] sm:$0xff] %v1671_v57  ;;  %v1703_v57 = vadd.f32 1.0, %v679_v52  ;;  %v711_v52 = vld [vmem:[%s3574_s24 + $0x11d8] sm:$0xff] }
 0x228   : > { %2696 = vst [vmem:[%s3587_s17 + $0xfe0] sm:$0xff] %v1672_v59  ;;  %v1704_v59 = vadd.f32 1.0, %v680_v54  ;;  %v712_v54 = vld [vmem:[%s3574_s24 + $0x11e0] sm:$0xff] }
 0x229   : > { %2697 = vst [vmem:[%s3587_s17 + $0xfe8] sm:$0xff] %v1673_v61  ;;  %v1705_v61 = vadd.f32 1.0, %v681_v56  ;;  %v713_v56 = vld [vmem:[%s3574_s24 + $0x11e8] sm:$0xff] }
 0x22a   : > { %2698 = vst [vmem:[%s3587_s17 + $0xff0] sm:$0xff] %v1674_v63  ;;  %v1706_v63 = vadd.f32 1.0, %v682_v58  ;;  %v714_v58 = vld [vmem:[%s3574_s24 + $0x11f0] sm:$0xff] }
 0x22b   : > { %2699 = vst [vmem:[%s3587_s17 + $0xff8] sm:$0xff] %v1675_v1  ;;  %v1707_v1 = vadd.f32 1.0, %v683_v60  ;;  %v715_v60 = vld [vmem:[%s3574_s24 + $0x11f8] sm:$0xff] }
 0x22c   : > { %2700 = vst [vmem:[%s3587_s17 + $0x1000] sm:$0xff] %v1676_v3  ;;  %v1708_v3 = vadd.f32 1.0, %v684_v62  ;;  %v716_v62 = vld [vmem:[%s3574_s24 + $0x1200] sm:$0xff] }
 0x22d   : > { %2701 = vst [vmem:[%s3587_s17 + $0x1008] sm:$0xff] %v1677_v5  ;;  %v1709_v5 = vadd.f32 1.0, %v685_v0  ;;  %v717_v0 = vld [vmem:[%s3574_s24 + $0x1208] sm:$0xff] }
 0x22e   : > { %2702 = vst [vmem:[%s3587_s17 + $0x1010] sm:$0xff] %v1678_v7  ;;  %v1710_v7 = vadd.f32 1.0, %v686_v2  ;;  %v718_v2 = vld [vmem:[%s3574_s24 + $0x1210] sm:$0xff] }
 0x22f   : > { %2703 = vst [vmem:[%s3587_s17 + $0x1018] sm:$0xff] %v1679_v9  ;;  %v1711_v9 = vadd.f32 1.0, %v687_v4  ;;  %v719_v4 = vld [vmem:[%s3574_s24 + $0x1218] sm:$0xff] }
 0x230   : > { %2704 = vst [vmem:[%s3587_s17 + $0x1020] sm:$0xff] %v1680_v11  ;;  %v1712_v11 = vadd.f32 1.0, %v688_v6  ;;  %v720_v6 = vld [vmem:[%s3574_s24 + $0x1220] sm:$0xff] }
 0x231   : > { %2705 = vst [vmem:[%s3587_s17 + $0x1028] sm:$0xff] %v1681_v13  ;;  %v1713_v13 = vadd.f32 1.0, %v689_v8  ;;  %v721_v8 = vld [vmem:[%s3574_s24 + $0x1228] sm:$0xff] }
 0x232   : > { %2706 = vst [vmem:[%s3587_s17 + $0x1030] sm:$0xff] %v1682_v15  ;;  %v1714_v15 = vadd.f32 1.0, %v690_v10  ;;  %v722_v10 = vld [vmem:[%s3574_s24 + $0x1230] sm:$0xff] }
 0x233   : > { %2707 = vst [vmem:[%s3587_s17 + $0x1038] sm:$0xff] %v1683_v17  ;;  %v1715_v17 = vadd.f32 1.0, %v691_v12  ;;  %v723_v12 = vld [vmem:[%s3574_s24 + $0x1238] sm:$0xff] }
 0x234   : > { %2708 = vst [vmem:[%s3587_s17 + $0x1040] sm:$0xff] %v1684_v19  ;;  %v1716_v19 = vadd.f32 1.0, %v692_v14  ;;  %v724_v14 = vld [vmem:[%s3574_s24 + $0x1240] sm:$0xff] }
 0x235   : > { %2709 = vst [vmem:[%s3587_s17 + $0x1048] sm:$0xff] %v1685_v21  ;;  %v1717_v21 = vadd.f32 1.0, %v693_v16  ;;  %v725_v16 = vld [vmem:[%s3574_s24 + $0x1248] sm:$0xff] }
 0x236   : > { %2710 = vst [vmem:[%s3587_s17 + $0x1050] sm:$0xff] %v1686_v23  ;;  %v1718_v23 = vadd.f32 1.0, %v694_v18  ;;  %v726_v18 = vld [vmem:[%s3574_s24 + $0x1250] sm:$0xff] }
 0x237   : > { %2711 = vst [vmem:[%s3587_s17 + $0x1058] sm:$0xff] %v1687_v25  ;;  %v1719_v25 = vadd.f32 1.0, %v695_v20  ;;  %v727_v20 = vld [vmem:[%s3574_s24 + $0x1258] sm:$0xff] }
 0x238   : > { %2712 = vst [vmem:[%s3587_s17 + $0x1060] sm:$0xff] %v1688_v27  ;;  %v1720_v27 = vadd.f32 1.0, %v696_v22  ;;  %v728_v22 = vld [vmem:[%s3574_s24 + $0x1260] sm:$0xff] }
 0x239   : > { %2713 = vst [vmem:[%s3587_s17 + $0x1068] sm:$0xff] %v1689_v29  ;;  %v1721_v29 = vadd.f32 1.0, %v697_v24  ;;  %v729_v24 = vld [vmem:[%s3574_s24 + $0x1268] sm:$0xff] }
 0x23a   : > { %2714 = vst [vmem:[%s3587_s17 + $0x1070] sm:$0xff] %v1690_v31  ;;  %v1722_v31 = vadd.f32 1.0, %v698_v26  ;;  %v730_v26 = vld [vmem:[%s3574_s24 + $0x1270] sm:$0xff] }
 0x23b   : > { %2715 = vst [vmem:[%s3587_s17 + $0x1078] sm:$0xff] %v1691_v33  ;;  %v1723_v33 = vadd.f32 1.0, %v699_v28  ;;  %v731_v28 = vld [vmem:[%s3574_s24 + $0x1278] sm:$0xff] }
 0x23c   : > { %2716 = vst [vmem:[%s3587_s17 + $0x1080] sm:$0xff] %v1692_v35  ;;  %v1724_v35 = vadd.f32 1.0, %v700_v30  ;;  %v732_v30 = vld [vmem:[%s3574_s24 + $0x1280] sm:$0xff] }
 0x23d   : > { %2717 = vst [vmem:[%s3587_s17 + $0x1088] sm:$0xff] %v1693_v37  ;;  %v1725_v37 = vadd.f32 1.0, %v701_v32  ;;  %v733_v32 = vld [vmem:[%s3574_s24 + $0x1288] sm:$0xff] }
 0x23e   : > { %2718 = vst [vmem:[%s3587_s17 + $0x1090] sm:$0xff] %v1694_v39  ;;  %v1726_v39 = vadd.f32 1.0, %v702_v34  ;;  %v734_v34 = vld [vmem:[%s3574_s24 + $0x1290] sm:$0xff] }
 0x23f   : > { %2719 = vst [vmem:[%s3587_s17 + $0x1098] sm:$0xff] %v1695_v41  ;;  %v1727_v41 = vadd.f32 1.0, %v703_v36  ;;  %v735_v36 = vld [vmem:[%s3574_s24 + $0x1298] sm:$0xff] }
 0x240   : > { %2720 = vst [vmem:[%s3587_s17 + $0x10a0] sm:$0xff] %v1696_v43  ;;  %v1728_v43 = vadd.f32 1.0, %v704_v38  ;;  %v736_v38 = vld [vmem:[%s3574_s24 + $0x12a0] sm:$0xff] }
 0x241   : > { %2721 = vst [vmem:[%s3587_s17 + $0x10a8] sm:$0xff] %v1697_v45  ;;  %v1729_v45 = vadd.f32 1.0, %v705_v40  ;;  %v737_v40 = vld [vmem:[%s3574_s24 + $0x12a8] sm:$0xff] }
 0x242   : > { %2722 = vst [vmem:[%s3587_s17 + $0x10b0] sm:$0xff] %v1698_v47  ;;  %v1730_v47 = vadd.f32 1.0, %v706_v42  ;;  %v738_v42 = vld [vmem:[%s3574_s24 + $0x12b0] sm:$0xff] }
 0x243   : > { %2723 = vst [vmem:[%s3587_s17 + $0x10b8] sm:$0xff] %v1699_v49  ;;  %v1731_v49 = vadd.f32 1.0, %v707_v44  ;;  %v739_v44 = vld [vmem:[%s3574_s24 + $0x12b8] sm:$0xff] }
 0x244   : > { %2724 = vst [vmem:[%s3587_s17 + $0x10c0] sm:$0xff] %v1700_v51  ;;  %v1732_v51 = vadd.f32 1.0, %v708_v46  ;;  %v740_v46 = vld [vmem:[%s3574_s24 + $0x12c0] sm:$0xff] }
 0x245   : > { %2725 = vst [vmem:[%s3587_s17 + $0x10c8] sm:$0xff] %v1701_v53  ;;  %v1733_v53 = vadd.f32 1.0, %v709_v48  ;;  %v741_v48 = vld [vmem:[%s3574_s24 + $0x12c8] sm:$0xff] }
 0x246   : > { %2726 = vst [vmem:[%s3587_s17 + $0x10d0] sm:$0xff] %v1702_v55  ;;  %v1734_v55 = vadd.f32 1.0, %v710_v50  ;;  %v742_v50 = vld [vmem:[%s3574_s24 + $0x12d0] sm:$0xff] }
 0x247   : > { %2727 = vst [vmem:[%s3587_s17 + $0x10d8] sm:$0xff] %v1703_v57  ;;  %v1735_v57 = vadd.f32 1.0, %v711_v52  ;;  %v743_v52 = vld [vmem:[%s3574_s24 + $0x12d8] sm:$0xff] }
 0x248   : > { %2728 = vst [vmem:[%s3587_s17 + $0x10e0] sm:$0xff] %v1704_v59  ;;  %v1736_v59 = vadd.f32 1.0, %v712_v54  ;;  %v744_v54 = vld [vmem:[%s3574_s24 + $0x12e0] sm:$0xff] }
 0x249   : > { %2729 = vst [vmem:[%s3587_s17 + $0x10e8] sm:$0xff] %v1705_v61  ;;  %v1737_v61 = vadd.f32 1.0, %v713_v56  ;;  %v745_v56 = vld [vmem:[%s3574_s24 + $0x12e8] sm:$0xff] }
 0x24a   : > { %2730 = vst [vmem:[%s3587_s17 + $0x10f0] sm:$0xff] %v1706_v63  ;;  %v1738_v63 = vadd.f32 1.0, %v714_v58  ;;  %v746_v58 = vld [vmem:[%s3574_s24 + $0x12f0] sm:$0xff] }
 0x24b   : > { %2731 = vst [vmem:[%s3587_s17 + $0x10f8] sm:$0xff] %v1707_v1  ;;  %v1739_v1 = vadd.f32 1.0, %v715_v60  ;;  %v747_v60 = vld [vmem:[%s3574_s24 + $0x12f8] sm:$0xff] }
 0x24c   : > { %2732 = vst [vmem:[%s3587_s17 + $0x1100] sm:$0xff] %v1708_v3  ;;  %v1740_v3 = vadd.f32 1.0, %v716_v62  ;;  %v748_v62 = vld [vmem:[%s3574_s24 + $0x1300] sm:$0xff] }
 0x24d   : > { %2733 = vst [vmem:[%s3587_s17 + $0x1108] sm:$0xff] %v1709_v5  ;;  %v1741_v5 = vadd.f32 1.0, %v717_v0  ;;  %v749_v0 = vld [vmem:[%s3574_s24 + $0x1308] sm:$0xff] }
 0x24e   : > { %2734 = vst [vmem:[%s3587_s17 + $0x1110] sm:$0xff] %v1710_v7  ;;  %v1742_v7 = vadd.f32 1.0, %v718_v2  ;;  %v750_v2 = vld [vmem:[%s3574_s24 + $0x1310] sm:$0xff] }
 0x24f   : > { %2735 = vst [vmem:[%s3587_s17 + $0x1118] sm:$0xff] %v1711_v9  ;;  %v1743_v9 = vadd.f32 1.0, %v719_v4  ;;  %v751_v4 = vld [vmem:[%s3574_s24 + $0x1318] sm:$0xff] }
 0x250   : > { %2736 = vst [vmem:[%s3587_s17 + $0x1120] sm:$0xff] %v1712_v11  ;;  %v1744_v11 = vadd.f32 1.0, %v720_v6  ;;  %v752_v6 = vld [vmem:[%s3574_s24 + $0x1320] sm:$0xff] }
 0x251   : > { %2737 = vst [vmem:[%s3587_s17 + $0x1128] sm:$0xff] %v1713_v13  ;;  %v1745_v13 = vadd.f32 1.0, %v721_v8  ;;  %v753_v8 = vld [vmem:[%s3574_s24 + $0x1328] sm:$0xff] }
 0x252   : > { %2738 = vst [vmem:[%s3587_s17 + $0x1130] sm:$0xff] %v1714_v15  ;;  %v1746_v15 = vadd.f32 1.0, %v722_v10  ;;  %v754_v10 = vld [vmem:[%s3574_s24 + $0x1330] sm:$0xff] }
 0x253   : > { %2739 = vst [vmem:[%s3587_s17 + $0x1138] sm:$0xff] %v1715_v17  ;;  %v1747_v17 = vadd.f32 1.0, %v723_v12  ;;  %v755_v12 = vld [vmem:[%s3574_s24 + $0x1338] sm:$0xff] }
 0x254   : > { %2740 = vst [vmem:[%s3587_s17 + $0x1140] sm:$0xff] %v1716_v19  ;;  %v1748_v19 = vadd.f32 1.0, %v724_v14  ;;  %v756_v14 = vld [vmem:[%s3574_s24 + $0x1340] sm:$0xff] }
 0x255   : > { %2741 = vst [vmem:[%s3587_s17 + $0x1148] sm:$0xff] %v1717_v21  ;;  %v1749_v21 = vadd.f32 1.0, %v725_v16  ;;  %v757_v16 = vld [vmem:[%s3574_s24 + $0x1348] sm:$0xff] }
 0x256   : > { %2742 = vst [vmem:[%s3587_s17 + $0x1150] sm:$0xff] %v1718_v23  ;;  %v1750_v23 = vadd.f32 1.0, %v726_v18  ;;  %v758_v18 = vld [vmem:[%s3574_s24 + $0x1350] sm:$0xff] }
 0x257   : > { %2743 = vst [vmem:[%s3587_s17 + $0x1158] sm:$0xff] %v1719_v25  ;;  %v1751_v25 = vadd.f32 1.0, %v727_v20  ;;  %v759_v20 = vld [vmem:[%s3574_s24 + $0x1358] sm:$0xff] }
 0x258   : > { %2744 = vst [vmem:[%s3587_s17 + $0x1160] sm:$0xff] %v1720_v27  ;;  %v1752_v27 = vadd.f32 1.0, %v728_v22  ;;  %v760_v22 = vld [vmem:[%s3574_s24 + $0x1360] sm:$0xff] }
 0x259   : > { %2745 = vst [vmem:[%s3587_s17 + $0x1168] sm:$0xff] %v1721_v29  ;;  %v1753_v29 = vadd.f32 1.0, %v729_v24  ;;  %v761_v24 = vld [vmem:[%s3574_s24 + $0x1368] sm:$0xff] }
 0x25a   : > { %2746 = vst [vmem:[%s3587_s17 + $0x1170] sm:$0xff] %v1722_v31  ;;  %v1754_v31 = vadd.f32 1.0, %v730_v26  ;;  %v762_v26 = vld [vmem:[%s3574_s24 + $0x1370] sm:$0xff] }
 0x25b   : > { %2747 = vst [vmem:[%s3587_s17 + $0x1178] sm:$0xff] %v1723_v33  ;;  %v1755_v33 = vadd.f32 1.0, %v731_v28  ;;  %v763_v28 = vld [vmem:[%s3574_s24 + $0x1378] sm:$0xff] }
 0x25c   : > { %2748 = vst [vmem:[%s3587_s17 + $0x1180] sm:$0xff] %v1724_v35  ;;  %v1756_v35 = vadd.f32 1.0, %v732_v30  ;;  %v764_v30 = vld [vmem:[%s3574_s24 + $0x1380] sm:$0xff] }
 0x25d   : > { %2749 = vst [vmem:[%s3587_s17 + $0x1188] sm:$0xff] %v1725_v37  ;;  %v1757_v37 = vadd.f32 1.0, %v733_v32  ;;  %v765_v32 = vld [vmem:[%s3574_s24 + $0x1388] sm:$0xff] }
 0x25e   : > { %2750 = vst [vmem:[%s3587_s17 + $0x1190] sm:$0xff] %v1726_v39  ;;  %v1758_v39 = vadd.f32 1.0, %v734_v34  ;;  %v766_v34 = vld [vmem:[%s3574_s24 + $0x1390] sm:$0xff] }
 0x25f   : > { %2751 = vst [vmem:[%s3587_s17 + $0x1198] sm:$0xff] %v1727_v41  ;;  %v1759_v41 = vadd.f32 1.0, %v735_v36  ;;  %v767_v36 = vld [vmem:[%s3574_s24 + $0x1398] sm:$0xff] }
 0x260   : > { %2752 = vst [vmem:[%s3587_s17 + $0x11a0] sm:$0xff] %v1728_v43  ;;  %v1760_v43 = vadd.f32 1.0, %v736_v38  ;;  %v768_v38 = vld [vmem:[%s3574_s24 + $0x13a0] sm:$0xff] }
 0x261   : > { %2753 = vst [vmem:[%s3587_s17 + $0x11a8] sm:$0xff] %v1729_v45  ;;  %v1761_v45 = vadd.f32 1.0, %v737_v40  ;;  %v769_v40 = vld [vmem:[%s3574_s24 + $0x13a8] sm:$0xff] }
 0x262   : > { %2754 = vst [vmem:[%s3587_s17 + $0x11b0] sm:$0xff] %v1730_v47  ;;  %v1762_v47 = vadd.f32 1.0, %v738_v42  ;;  %v770_v42 = vld [vmem:[%s3574_s24 + $0x13b0] sm:$0xff] }
 0x263   : > { %2755 = vst [vmem:[%s3587_s17 + $0x11b8] sm:$0xff] %v1731_v49  ;;  %v1763_v49 = vadd.f32 1.0, %v739_v44  ;;  %v771_v44 = vld [vmem:[%s3574_s24 + $0x13b8] sm:$0xff] }
 0x264   : > { %2756 = vst [vmem:[%s3587_s17 + $0x11c0] sm:$0xff] %v1732_v51  ;;  %v1764_v51 = vadd.f32 1.0, %v740_v46  ;;  %v772_v46 = vld [vmem:[%s3574_s24 + $0x13c0] sm:$0xff] }
 0x265   : > { %2757 = vst [vmem:[%s3587_s17 + $0x11c8] sm:$0xff] %v1733_v53  ;;  %v1765_v53 = vadd.f32 1.0, %v741_v48  ;;  %v773_v48 = vld [vmem:[%s3574_s24 + $0x13c8] sm:$0xff] }
 0x266   : > { %2758 = vst [vmem:[%s3587_s17 + $0x11d0] sm:$0xff] %v1734_v55  ;;  %v1766_v55 = vadd.f32 1.0, %v742_v50  ;;  %v774_v50 = vld [vmem:[%s3574_s24 + $0x13d0] sm:$0xff] }
 0x267   : > { %2759 = vst [vmem:[%s3587_s17 + $0x11d8] sm:$0xff] %v1735_v57  ;;  %v1767_v57 = vadd.f32 1.0, %v743_v52  ;;  %v775_v52 = vld [vmem:[%s3574_s24 + $0x13d8] sm:$0xff] }
 0x268   : > { %2760 = vst [vmem:[%s3587_s17 + $0x11e0] sm:$0xff] %v1736_v59  ;;  %v1768_v59 = vadd.f32 1.0, %v744_v54  ;;  %v776_v54 = vld [vmem:[%s3574_s24 + $0x13e0] sm:$0xff] }
 0x269   : > { %2761 = vst [vmem:[%s3587_s17 + $0x11e8] sm:$0xff] %v1737_v61  ;;  %v1769_v61 = vadd.f32 1.0, %v745_v56  ;;  %v777_v56 = vld [vmem:[%s3574_s24 + $0x13e8] sm:$0xff] }
 0x26a   : > { %2762 = vst [vmem:[%s3587_s17 + $0x11f0] sm:$0xff] %v1738_v63  ;;  %v1770_v63 = vadd.f32 1.0, %v746_v58  ;;  %v778_v58 = vld [vmem:[%s3574_s24 + $0x13f0] sm:$0xff] }
 0x26b   : > { %2763 = vst [vmem:[%s3587_s17 + $0x11f8] sm:$0xff] %v1739_v1  ;;  %v1771_v1 = vadd.f32 1.0, %v747_v60  ;;  %v779_v60 = vld [vmem:[%s3574_s24 + $0x13f8] sm:$0xff] }
 0x26c   : > { %2764 = vst [vmem:[%s3587_s17 + $0x1200] sm:$0xff] %v1740_v3  ;;  %v1772_v3 = vadd.f32 1.0, %v748_v62  ;;  %v780_v62 = vld [vmem:[%s3574_s24 + $0x1400] sm:$0xff] }
 0x26d   : > { %2765 = vst [vmem:[%s3587_s17 + $0x1208] sm:$0xff] %v1741_v5  ;;  %v1773_v5 = vadd.f32 1.0, %v749_v0  ;;  %v781_v0 = vld [vmem:[%s3574_s24 + $0x1408] sm:$0xff] }
 0x26e   : > { %2766 = vst [vmem:[%s3587_s17 + $0x1210] sm:$0xff] %v1742_v7  ;;  %v1774_v7 = vadd.f32 1.0, %v750_v2  ;;  %v782_v2 = vld [vmem:[%s3574_s24 + $0x1410] sm:$0xff] }
 0x26f   : > { %2767 = vst [vmem:[%s3587_s17 + $0x1218] sm:$0xff] %v1743_v9  ;;  %v1775_v9 = vadd.f32 1.0, %v751_v4  ;;  %v783_v4 = vld [vmem:[%s3574_s24 + $0x1418] sm:$0xff] }
 0x270   : > { %2768 = vst [vmem:[%s3587_s17 + $0x1220] sm:$0xff] %v1744_v11  ;;  %v1776_v11 = vadd.f32 1.0, %v752_v6  ;;  %v784_v6 = vld [vmem:[%s3574_s24 + $0x1420] sm:$0xff] }
 0x271   : > { %2769 = vst [vmem:[%s3587_s17 + $0x1228] sm:$0xff] %v1745_v13  ;;  %v1777_v13 = vadd.f32 1.0, %v753_v8  ;;  %v785_v8 = vld [vmem:[%s3574_s24 + $0x1428] sm:$0xff] }
 0x272   : > { %2770 = vst [vmem:[%s3587_s17 + $0x1230] sm:$0xff] %v1746_v15  ;;  %v1778_v15 = vadd.f32 1.0, %v754_v10  ;;  %v786_v10 = vld [vmem:[%s3574_s24 + $0x1430] sm:$0xff] }
 0x273   : > { %2771 = vst [vmem:[%s3587_s17 + $0x1238] sm:$0xff] %v1747_v17  ;;  %v1779_v17 = vadd.f32 1.0, %v755_v12  ;;  %v787_v12 = vld [vmem:[%s3574_s24 + $0x1438] sm:$0xff] }
 0x274   : > { %2772 = vst [vmem:[%s3587_s17 + $0x1240] sm:$0xff] %v1748_v19  ;;  %v1780_v19 = vadd.f32 1.0, %v756_v14  ;;  %v788_v14 = vld [vmem:[%s3574_s24 + $0x1440] sm:$0xff] }
 0x275   : > { %2773 = vst [vmem:[%s3587_s17 + $0x1248] sm:$0xff] %v1749_v21  ;;  %v1781_v21 = vadd.f32 1.0, %v757_v16  ;;  %v789_v16 = vld [vmem:[%s3574_s24 + $0x1448] sm:$0xff] }
 0x276   : > { %2774 = vst [vmem:[%s3587_s17 + $0x1250] sm:$0xff] %v1750_v23  ;;  %v1782_v23 = vadd.f32 1.0, %v758_v18  ;;  %v790_v18 = vld [vmem:[%s3574_s24 + $0x1450] sm:$0xff] }
 0x277   : > { %2775 = vst [vmem:[%s3587_s17 + $0x1258] sm:$0xff] %v1751_v25  ;;  %v1783_v25 = vadd.f32 1.0, %v759_v20  ;;  %v791_v20 = vld [vmem:[%s3574_s24 + $0x1458] sm:$0xff] }
 0x278   : > { %2776 = vst [vmem:[%s3587_s17 + $0x1260] sm:$0xff] %v1752_v27  ;;  %v1784_v27 = vadd.f32 1.0, %v760_v22  ;;  %v792_v22 = vld [vmem:[%s3574_s24 + $0x1460] sm:$0xff] }
 0x279   : > { %2777 = vst [vmem:[%s3587_s17 + $0x1268] sm:$0xff] %v1753_v29  ;;  %v1785_v29 = vadd.f32 1.0, %v761_v24  ;;  %v793_v24 = vld [vmem:[%s3574_s24 + $0x1468] sm:$0xff] }
 0x27a   : > { %2778 = vst [vmem:[%s3587_s17 + $0x1270] sm:$0xff] %v1754_v31  ;;  %v1786_v31 = vadd.f32 1.0, %v762_v26  ;;  %v794_v26 = vld [vmem:[%s3574_s24 + $0x1470] sm:$0xff] }
 0x27b   : > { %2779 = vst [vmem:[%s3587_s17 + $0x1278] sm:$0xff] %v1755_v33  ;;  %v1787_v33 = vadd.f32 1.0, %v763_v28  ;;  %v795_v28 = vld [vmem:[%s3574_s24 + $0x1478] sm:$0xff] }
 0x27c   : > { %2780 = vst [vmem:[%s3587_s17 + $0x1280] sm:$0xff] %v1756_v35  ;;  %v1788_v35 = vadd.f32 1.0, %v764_v30  ;;  %v796_v30 = vld [vmem:[%s3574_s24 + $0x1480] sm:$0xff] }
 0x27d   : > { %2781 = vst [vmem:[%s3587_s17 + $0x1288] sm:$0xff] %v1757_v37  ;;  %v1789_v37 = vadd.f32 1.0, %v765_v32  ;;  %v797_v32 = vld [vmem:[%s3574_s24 + $0x1488] sm:$0xff] }
 0x27e   : > { %2782 = vst [vmem:[%s3587_s17 + $0x1290] sm:$0xff] %v1758_v39  ;;  %v1790_v39 = vadd.f32 1.0, %v766_v34  ;;  %v798_v34 = vld [vmem:[%s3574_s24 + $0x1490] sm:$0xff] }
 0x27f   : > { %2783 = vst [vmem:[%s3587_s17 + $0x1298] sm:$0xff] %v1759_v41  ;;  %v1791_v41 = vadd.f32 1.0, %v767_v36  ;;  %v799_v36 = vld [vmem:[%s3574_s24 + $0x1498] sm:$0xff] }
 0x280   : > { %2784 = vst [vmem:[%s3587_s17 + $0x12a0] sm:$0xff] %v1760_v43  ;;  %v1792_v43 = vadd.f32 1.0, %v768_v38  ;;  %v800_v38 = vld [vmem:[%s3574_s24 + $0x14a0] sm:$0xff] }
 0x281   : > { %2785 = vst [vmem:[%s3587_s17 + $0x12a8] sm:$0xff] %v1761_v45  ;;  %v1793_v45 = vadd.f32 1.0, %v769_v40  ;;  %v801_v40 = vld [vmem:[%s3574_s24 + $0x14a8] sm:$0xff] }
 0x282   : > { %2786 = vst [vmem:[%s3587_s17 + $0x12b0] sm:$0xff] %v1762_v47  ;;  %v1794_v47 = vadd.f32 1.0, %v770_v42  ;;  %v802_v42 = vld [vmem:[%s3574_s24 + $0x14b0] sm:$0xff] }
 0x283   : > { %2787 = vst [vmem:[%s3587_s17 + $0x12b8] sm:$0xff] %v1763_v49  ;;  %v1795_v49 = vadd.f32 1.0, %v771_v44  ;;  %v803_v44 = vld [vmem:[%s3574_s24 + $0x14b8] sm:$0xff] }
 0x284   : > { %2788 = vst [vmem:[%s3587_s17 + $0x12c0] sm:$0xff] %v1764_v51  ;;  %v1796_v51 = vadd.f32 1.0, %v772_v46  ;;  %v804_v46 = vld [vmem:[%s3574_s24 + $0x14c0] sm:$0xff] }
 0x285   : > { %2789 = vst [vmem:[%s3587_s17 + $0x12c8] sm:$0xff] %v1765_v53  ;;  %v1797_v53 = vadd.f32 1.0, %v773_v48  ;;  %v805_v48 = vld [vmem:[%s3574_s24 + $0x14c8] sm:$0xff] }
 0x286   : > { %2790 = vst [vmem:[%s3587_s17 + $0x12d0] sm:$0xff] %v1766_v55  ;;  %v1798_v55 = vadd.f32 1.0, %v774_v50  ;;  %v806_v50 = vld [vmem:[%s3574_s24 + $0x14d0] sm:$0xff] }
 0x287   : > { %2791 = vst [vmem:[%s3587_s17 + $0x12d8] sm:$0xff] %v1767_v57  ;;  %v1799_v57 = vadd.f32 1.0, %v775_v52  ;;  %v807_v52 = vld [vmem:[%s3574_s24 + $0x14d8] sm:$0xff] }
 0x288   : > { %2792 = vst [vmem:[%s3587_s17 + $0x12e0] sm:$0xff] %v1768_v59  ;;  %v1800_v59 = vadd.f32 1.0, %v776_v54  ;;  %v808_v54 = vld [vmem:[%s3574_s24 + $0x14e0] sm:$0xff] }
 0x289   : > { %2793 = vst [vmem:[%s3587_s17 + $0x12e8] sm:$0xff] %v1769_v61  ;;  %v1801_v61 = vadd.f32 1.0, %v777_v56  ;;  %v809_v56 = vld [vmem:[%s3574_s24 + $0x14e8] sm:$0xff] }
 0x28a   : > { %2794 = vst [vmem:[%s3587_s17 + $0x12f0] sm:$0xff] %v1770_v63  ;;  %v1802_v63 = vadd.f32 1.0, %v778_v58  ;;  %v810_v58 = vld [vmem:[%s3574_s24 + $0x14f0] sm:$0xff] }
 0x28b   : > { %2795 = vst [vmem:[%s3587_s17 + $0x12f8] sm:$0xff] %v1771_v1  ;;  %v1803_v1 = vadd.f32 1.0, %v779_v60  ;;  %v811_v60 = vld [vmem:[%s3574_s24 + $0x14f8] sm:$0xff] }
 0x28c   : > { %2796 = vst [vmem:[%s3587_s17 + $0x1300] sm:$0xff] %v1772_v3  ;;  %v1804_v3 = vadd.f32 1.0, %v780_v62  ;;  %v812_v62 = vld [vmem:[%s3574_s24 + $0x1500] sm:$0xff] }
 0x28d   : > { %2797 = vst [vmem:[%s3587_s17 + $0x1308] sm:$0xff] %v1773_v5  ;;  %v1805_v5 = vadd.f32 1.0, %v781_v0  ;;  %v813_v0 = vld [vmem:[%s3574_s24 + $0x1508] sm:$0xff] }
 0x28e   : > { %2798 = vst [vmem:[%s3587_s17 + $0x1310] sm:$0xff] %v1774_v7  ;;  %v1806_v7 = vadd.f32 1.0, %v782_v2  ;;  %v814_v2 = vld [vmem:[%s3574_s24 + $0x1510] sm:$0xff] }
 0x28f   : > { %2799 = vst [vmem:[%s3587_s17 + $0x1318] sm:$0xff] %v1775_v9  ;;  %v1807_v9 = vadd.f32 1.0, %v783_v4  ;;  %v815_v4 = vld [vmem:[%s3574_s24 + $0x1518] sm:$0xff] }
 0x290   : > { %2800 = vst [vmem:[%s3587_s17 + $0x1320] sm:$0xff] %v1776_v11  ;;  %v1808_v11 = vadd.f32 1.0, %v784_v6  ;;  %v816_v6 = vld [vmem:[%s3574_s24 + $0x1520] sm:$0xff] }
 0x291   : > { %2801 = vst [vmem:[%s3587_s17 + $0x1328] sm:$0xff] %v1777_v13  ;;  %v1809_v13 = vadd.f32 1.0, %v785_v8  ;;  %v817_v8 = vld [vmem:[%s3574_s24 + $0x1528] sm:$0xff] }
 0x292   : > { %2802 = vst [vmem:[%s3587_s17 + $0x1330] sm:$0xff] %v1778_v15  ;;  %v1810_v15 = vadd.f32 1.0, %v786_v10  ;;  %v818_v10 = vld [vmem:[%s3574_s24 + $0x1530] sm:$0xff] }
 0x293   : > { %2803 = vst [vmem:[%s3587_s17 + $0x1338] sm:$0xff] %v1779_v17  ;;  %v1811_v17 = vadd.f32 1.0, %v787_v12  ;;  %v819_v12 = vld [vmem:[%s3574_s24 + $0x1538] sm:$0xff] }
 0x294   : > { %2804 = vst [vmem:[%s3587_s17 + $0x1340] sm:$0xff] %v1780_v19  ;;  %v1812_v19 = vadd.f32 1.0, %v788_v14  ;;  %v820_v14 = vld [vmem:[%s3574_s24 + $0x1540] sm:$0xff] }
 0x295   : > { %2805 = vst [vmem:[%s3587_s17 + $0x1348] sm:$0xff] %v1781_v21  ;;  %v1813_v21 = vadd.f32 1.0, %v789_v16  ;;  %v821_v16 = vld [vmem:[%s3574_s24 + $0x1548] sm:$0xff] }
 0x296   : > { %2806 = vst [vmem:[%s3587_s17 + $0x1350] sm:$0xff] %v1782_v23  ;;  %v1814_v23 = vadd.f32 1.0, %v790_v18  ;;  %v822_v18 = vld [vmem:[%s3574_s24 + $0x1550] sm:$0xff] }
 0x297   : > { %2807 = vst [vmem:[%s3587_s17 + $0x1358] sm:$0xff] %v1783_v25  ;;  %v1815_v25 = vadd.f32 1.0, %v791_v20  ;;  %v823_v20 = vld [vmem:[%s3574_s24 + $0x1558] sm:$0xff] }
 0x298   : > { %2808 = vst [vmem:[%s3587_s17 + $0x1360] sm:$0xff] %v1784_v27  ;;  %v1816_v27 = vadd.f32 1.0, %v792_v22  ;;  %v824_v22 = vld [vmem:[%s3574_s24 + $0x1560] sm:$0xff] }
 0x299   : > { %2809 = vst [vmem:[%s3587_s17 + $0x1368] sm:$0xff] %v1785_v29  ;;  %v1817_v29 = vadd.f32 1.0, %v793_v24  ;;  %v825_v24 = vld [vmem:[%s3574_s24 + $0x1568] sm:$0xff] }
 0x29a   : > { %2810 = vst [vmem:[%s3587_s17 + $0x1370] sm:$0xff] %v1786_v31  ;;  %v1818_v31 = vadd.f32 1.0, %v794_v26  ;;  %v826_v26 = vld [vmem:[%s3574_s24 + $0x1570] sm:$0xff] }
 0x29b   : > { %2811 = vst [vmem:[%s3587_s17 + $0x1378] sm:$0xff] %v1787_v33  ;;  %v1819_v33 = vadd.f32 1.0, %v795_v28  ;;  %v827_v28 = vld [vmem:[%s3574_s24 + $0x1578] sm:$0xff] }
 0x29c   : > { %2812 = vst [vmem:[%s3587_s17 + $0x1380] sm:$0xff] %v1788_v35  ;;  %v1820_v35 = vadd.f32 1.0, %v796_v30  ;;  %v828_v30 = vld [vmem:[%s3574_s24 + $0x1580] sm:$0xff] }
 0x29d   : > { %2813 = vst [vmem:[%s3587_s17 + $0x1388] sm:$0xff] %v1789_v37  ;;  %v1821_v37 = vadd.f32 1.0, %v797_v32  ;;  %v829_v32 = vld [vmem:[%s3574_s24 + $0x1588] sm:$0xff] }
 0x29e   : > { %2814 = vst [vmem:[%s3587_s17 + $0x1390] sm:$0xff] %v1790_v39  ;;  %v1822_v39 = vadd.f32 1.0, %v798_v34  ;;  %v830_v34 = vld [vmem:[%s3574_s24 + $0x1590] sm:$0xff] }
 0x29f   : > { %2815 = vst [vmem:[%s3587_s17 + $0x1398] sm:$0xff] %v1791_v41  ;;  %v1823_v41 = vadd.f32 1.0, %v799_v36  ;;  %v831_v36 = vld [vmem:[%s3574_s24 + $0x1598] sm:$0xff] }
 0x2a0   : > { %2816 = vst [vmem:[%s3587_s17 + $0x13a0] sm:$0xff] %v1792_v43  ;;  %v1824_v43 = vadd.f32 1.0, %v800_v38  ;;  %v832_v38 = vld [vmem:[%s3574_s24 + $0x15a0] sm:$0xff] }
 0x2a1   : > { %2817 = vst [vmem:[%s3587_s17 + $0x13a8] sm:$0xff] %v1793_v45  ;;  %v1825_v45 = vadd.f32 1.0, %v801_v40  ;;  %v833_v40 = vld [vmem:[%s3574_s24 + $0x15a8] sm:$0xff] }
 0x2a2   : > { %2818 = vst [vmem:[%s3587_s17 + $0x13b0] sm:$0xff] %v1794_v47  ;;  %v1826_v47 = vadd.f32 1.0, %v802_v42  ;;  %v834_v42 = vld [vmem:[%s3574_s24 + $0x15b0] sm:$0xff] }
 0x2a3   : > { %2819 = vst [vmem:[%s3587_s17 + $0x13b8] sm:$0xff] %v1795_v49  ;;  %v1827_v49 = vadd.f32 1.0, %v803_v44  ;;  %v835_v44 = vld [vmem:[%s3574_s24 + $0x15b8] sm:$0xff] }
 0x2a4   : > { %2820 = vst [vmem:[%s3587_s17 + $0x13c0] sm:$0xff] %v1796_v51  ;;  %v1828_v51 = vadd.f32 1.0, %v804_v46  ;;  %v836_v46 = vld [vmem:[%s3574_s24 + $0x15c0] sm:$0xff] }
 0x2a5   : > { %2821 = vst [vmem:[%s3587_s17 + $0x13c8] sm:$0xff] %v1797_v53  ;;  %v1829_v53 = vadd.f32 1.0, %v805_v48  ;;  %v837_v48 = vld [vmem:[%s3574_s24 + $0x15c8] sm:$0xff] }
 0x2a6   : > { %2822 = vst [vmem:[%s3587_s17 + $0x13d0] sm:$0xff] %v1798_v55  ;;  %v1830_v55 = vadd.f32 1.0, %v806_v50  ;;  %v838_v50 = vld [vmem:[%s3574_s24 + $0x15d0] sm:$0xff] }
 0x2a7   : > { %2823 = vst [vmem:[%s3587_s17 + $0x13d8] sm:$0xff] %v1799_v57  ;;  %v1831_v57 = vadd.f32 1.0, %v807_v52  ;;  %v839_v52 = vld [vmem:[%s3574_s24 + $0x15d8] sm:$0xff] }
 0x2a8   : > { %2824 = vst [vmem:[%s3587_s17 + $0x13e0] sm:$0xff] %v1800_v59  ;;  %v1832_v59 = vadd.f32 1.0, %v808_v54  ;;  %v840_v54 = vld [vmem:[%s3574_s24 + $0x15e0] sm:$0xff] }
 0x2a9   : > { %2825 = vst [vmem:[%s3587_s17 + $0x13e8] sm:$0xff] %v1801_v61  ;;  %v1833_v61 = vadd.f32 1.0, %v809_v56  ;;  %v841_v56 = vld [vmem:[%s3574_s24 + $0x15e8] sm:$0xff] }
 0x2aa   : > { %2826 = vst [vmem:[%s3587_s17 + $0x13f0] sm:$0xff] %v1802_v63  ;;  %v1834_v63 = vadd.f32 1.0, %v810_v58  ;;  %v842_v58 = vld [vmem:[%s3574_s24 + $0x15f0] sm:$0xff] }
 0x2ab   : > { %2827 = vst [vmem:[%s3587_s17 + $0x13f8] sm:$0xff] %v1803_v1  ;;  %v1835_v1 = vadd.f32 1.0, %v811_v60  ;;  %v843_v60 = vld [vmem:[%s3574_s24 + $0x15f8] sm:$0xff] }
 0x2ac   : > { %2828 = vst [vmem:[%s3587_s17 + $0x1400] sm:$0xff] %v1804_v3  ;;  %v1836_v3 = vadd.f32 1.0, %v812_v62  ;;  %v844_v62 = vld [vmem:[%s3574_s24 + $0x1600] sm:$0xff] }
 0x2ad   : > { %2829 = vst [vmem:[%s3587_s17 + $0x1408] sm:$0xff] %v1805_v5  ;;  %v1837_v5 = vadd.f32 1.0, %v813_v0  ;;  %v845_v0 = vld [vmem:[%s3574_s24 + $0x1608] sm:$0xff] }
 0x2ae   : > { %2830 = vst [vmem:[%s3587_s17 + $0x1410] sm:$0xff] %v1806_v7  ;;  %v1838_v7 = vadd.f32 1.0, %v814_v2  ;;  %v846_v2 = vld [vmem:[%s3574_s24 + $0x1610] sm:$0xff] }
 0x2af   : > { %2831 = vst [vmem:[%s3587_s17 + $0x1418] sm:$0xff] %v1807_v9  ;;  %v1839_v9 = vadd.f32 1.0, %v815_v4  ;;  %v847_v4 = vld [vmem:[%s3574_s24 + $0x1618] sm:$0xff] }
 0x2b0   : > { %2832 = vst [vmem:[%s3587_s17 + $0x1420] sm:$0xff] %v1808_v11  ;;  %v1840_v11 = vadd.f32 1.0, %v816_v6  ;;  %v848_v6 = vld [vmem:[%s3574_s24 + $0x1620] sm:$0xff] }
 0x2b1   : > { %2833 = vst [vmem:[%s3587_s17 + $0x1428] sm:$0xff] %v1809_v13  ;;  %v1841_v13 = vadd.f32 1.0, %v817_v8  ;;  %v849_v8 = vld [vmem:[%s3574_s24 + $0x1628] sm:$0xff] }
 0x2b2   : > { %2834 = vst [vmem:[%s3587_s17 + $0x1430] sm:$0xff] %v1810_v15  ;;  %v1842_v15 = vadd.f32 1.0, %v818_v10  ;;  %v850_v10 = vld [vmem:[%s3574_s24 + $0x1630] sm:$0xff] }
 0x2b3   : > { %2835 = vst [vmem:[%s3587_s17 + $0x1438] sm:$0xff] %v1811_v17  ;;  %v1843_v17 = vadd.f32 1.0, %v819_v12  ;;  %v851_v12 = vld [vmem:[%s3574_s24 + $0x1638] sm:$0xff] }
 0x2b4   : > { %2836 = vst [vmem:[%s3587_s17 + $0x1440] sm:$0xff] %v1812_v19  ;;  %v1844_v19 = vadd.f32 1.0, %v820_v14  ;;  %v852_v14 = vld [vmem:[%s3574_s24 + $0x1640] sm:$0xff] }
 0x2b5   : > { %2837 = vst [vmem:[%s3587_s17 + $0x1448] sm:$0xff] %v1813_v21  ;;  %v1845_v21 = vadd.f32 1.0, %v821_v16  ;;  %v853_v16 = vld [vmem:[%s3574_s24 + $0x1648] sm:$0xff] }
 0x2b6   : > { %2838 = vst [vmem:[%s3587_s17 + $0x1450] sm:$0xff] %v1814_v23  ;;  %v1846_v23 = vadd.f32 1.0, %v822_v18  ;;  %v854_v18 = vld [vmem:[%s3574_s24 + $0x1650] sm:$0xff] }
 0x2b7   : > { %2839 = vst [vmem:[%s3587_s17 + $0x1458] sm:$0xff] %v1815_v25  ;;  %v1847_v25 = vadd.f32 1.0, %v823_v20  ;;  %v855_v20 = vld [vmem:[%s3574_s24 + $0x1658] sm:$0xff] }
 0x2b8   : > { %2840 = vst [vmem:[%s3587_s17 + $0x1460] sm:$0xff] %v1816_v27  ;;  %v1848_v27 = vadd.f32 1.0, %v824_v22  ;;  %v856_v22 = vld [vmem:[%s3574_s24 + $0x1660] sm:$0xff] }
 0x2b9   : > { %2841 = vst [vmem:[%s3587_s17 + $0x1468] sm:$0xff] %v1817_v29  ;;  %v1849_v29 = vadd.f32 1.0, %v825_v24  ;;  %v857_v24 = vld [vmem:[%s3574_s24 + $0x1668] sm:$0xff] }
 0x2ba   : > { %2842 = vst [vmem:[%s3587_s17 + $0x1470] sm:$0xff] %v1818_v31  ;;  %v1850_v31 = vadd.f32 1.0, %v826_v26  ;;  %v858_v26 = vld [vmem:[%s3574_s24 + $0x1670] sm:$0xff] }
 0x2bb   : > { %2843 = vst [vmem:[%s3587_s17 + $0x1478] sm:$0xff] %v1819_v33  ;;  %v1851_v33 = vadd.f32 1.0, %v827_v28  ;;  %v859_v28 = vld [vmem:[%s3574_s24 + $0x1678] sm:$0xff] }
 0x2bc   : > { %2844 = vst [vmem:[%s3587_s17 + $0x1480] sm:$0xff] %v1820_v35  ;;  %v1852_v35 = vadd.f32 1.0, %v828_v30  ;;  %v860_v30 = vld [vmem:[%s3574_s24 + $0x1680] sm:$0xff] }
 0x2bd   : > { %2845 = vst [vmem:[%s3587_s17 + $0x1488] sm:$0xff] %v1821_v37  ;;  %v1853_v37 = vadd.f32 1.0, %v829_v32  ;;  %v861_v32 = vld [vmem:[%s3574_s24 + $0x1688] sm:$0xff] }
 0x2be   : > { %2846 = vst [vmem:[%s3587_s17 + $0x1490] sm:$0xff] %v1822_v39  ;;  %v1854_v39 = vadd.f32 1.0, %v830_v34  ;;  %v862_v34 = vld [vmem:[%s3574_s24 + $0x1690] sm:$0xff] }
 0x2bf   : > { %2847 = vst [vmem:[%s3587_s17 + $0x1498] sm:$0xff] %v1823_v41  ;;  %v1855_v41 = vadd.f32 1.0, %v831_v36  ;;  %v863_v36 = vld [vmem:[%s3574_s24 + $0x1698] sm:$0xff] }
 0x2c0   : > { %2848 = vst [vmem:[%s3587_s17 + $0x14a0] sm:$0xff] %v1824_v43  ;;  %v1856_v43 = vadd.f32 1.0, %v832_v38  ;;  %v864_v38 = vld [vmem:[%s3574_s24 + $0x16a0] sm:$0xff] }
 0x2c1   : > { %2849 = vst [vmem:[%s3587_s17 + $0x14a8] sm:$0xff] %v1825_v45  ;;  %v1857_v45 = vadd.f32 1.0, %v833_v40  ;;  %v865_v40 = vld [vmem:[%s3574_s24 + $0x16a8] sm:$0xff] }
 0x2c2   : > { %2850 = vst [vmem:[%s3587_s17 + $0x14b0] sm:$0xff] %v1826_v47  ;;  %v1858_v47 = vadd.f32 1.0, %v834_v42  ;;  %v866_v42 = vld [vmem:[%s3574_s24 + $0x16b0] sm:$0xff] }
 0x2c3   : > { %2851 = vst [vmem:[%s3587_s17 + $0x14b8] sm:$0xff] %v1827_v49  ;;  %v1859_v49 = vadd.f32 1.0, %v835_v44  ;;  %v867_v44 = vld [vmem:[%s3574_s24 + $0x16b8] sm:$0xff] }
 0x2c4   : > { %2852 = vst [vmem:[%s3587_s17 + $0x14c0] sm:$0xff] %v1828_v51  ;;  %v1860_v51 = vadd.f32 1.0, %v836_v46  ;;  %v868_v46 = vld [vmem:[%s3574_s24 + $0x16c0] sm:$0xff] }
 0x2c5   : > { %2853 = vst [vmem:[%s3587_s17 + $0x14c8] sm:$0xff] %v1829_v53  ;;  %v1861_v53 = vadd.f32 1.0, %v837_v48  ;;  %v869_v48 = vld [vmem:[%s3574_s24 + $0x16c8] sm:$0xff] }
 0x2c6   : > { %2854 = vst [vmem:[%s3587_s17 + $0x14d0] sm:$0xff] %v1830_v55  ;;  %v1862_v55 = vadd.f32 1.0, %v838_v50  ;;  %v870_v50 = vld [vmem:[%s3574_s24 + $0x16d0] sm:$0xff] }
 0x2c7   : > { %2855 = vst [vmem:[%s3587_s17 + $0x14d8] sm:$0xff] %v1831_v57  ;;  %v1863_v57 = vadd.f32 1.0, %v839_v52  ;;  %v871_v52 = vld [vmem:[%s3574_s24 + $0x16d8] sm:$0xff] }
 0x2c8   : > { %2856 = vst [vmem:[%s3587_s17 + $0x14e0] sm:$0xff] %v1832_v59  ;;  %v1864_v59 = vadd.f32 1.0, %v840_v54  ;;  %v872_v54 = vld [vmem:[%s3574_s24 + $0x16e0] sm:$0xff] }
 0x2c9   : > { %2857 = vst [vmem:[%s3587_s17 + $0x14e8] sm:$0xff] %v1833_v61  ;;  %v1865_v61 = vadd.f32 1.0, %v841_v56  ;;  %v873_v56 = vld [vmem:[%s3574_s24 + $0x16e8] sm:$0xff] }
 0x2ca   : > { %2858 = vst [vmem:[%s3587_s17 + $0x14f0] sm:$0xff] %v1834_v63  ;;  %v1866_v63 = vadd.f32 1.0, %v842_v58  ;;  %v874_v58 = vld [vmem:[%s3574_s24 + $0x16f0] sm:$0xff] }
 0x2cb   : > { %2859 = vst [vmem:[%s3587_s17 + $0x14f8] sm:$0xff] %v1835_v1  ;;  %v1867_v1 = vadd.f32 1.0, %v843_v60  ;;  %v875_v60 = vld [vmem:[%s3574_s24 + $0x16f8] sm:$0xff] }
 0x2cc   : > { %2860 = vst [vmem:[%s3587_s17 + $0x1500] sm:$0xff] %v1836_v3  ;;  %v1868_v3 = vadd.f32 1.0, %v844_v62  ;;  %v876_v62 = vld [vmem:[%s3574_s24 + $0x1700] sm:$0xff] }
 0x2cd   : > { %2861 = vst [vmem:[%s3587_s17 + $0x1508] sm:$0xff] %v1837_v5  ;;  %v1869_v5 = vadd.f32 1.0, %v845_v0  ;;  %v877_v0 = vld [vmem:[%s3574_s24 + $0x1708] sm:$0xff] }
 0x2ce   : > { %2862 = vst [vmem:[%s3587_s17 + $0x1510] sm:$0xff] %v1838_v7  ;;  %v1870_v7 = vadd.f32 1.0, %v846_v2  ;;  %v878_v2 = vld [vmem:[%s3574_s24 + $0x1710] sm:$0xff] }
 0x2cf   : > { %2863 = vst [vmem:[%s3587_s17 + $0x1518] sm:$0xff] %v1839_v9  ;;  %v1871_v9 = vadd.f32 1.0, %v847_v4  ;;  %v879_v4 = vld [vmem:[%s3574_s24 + $0x1718] sm:$0xff] }
 0x2d0   : > { %2864 = vst [vmem:[%s3587_s17 + $0x1520] sm:$0xff] %v1840_v11  ;;  %v1872_v11 = vadd.f32 1.0, %v848_v6  ;;  %v880_v6 = vld [vmem:[%s3574_s24 + $0x1720] sm:$0xff] }
 0x2d1   : > { %2865 = vst [vmem:[%s3587_s17 + $0x1528] sm:$0xff] %v1841_v13  ;;  %v1873_v13 = vadd.f32 1.0, %v849_v8  ;;  %v881_v8 = vld [vmem:[%s3574_s24 + $0x1728] sm:$0xff] }
 0x2d2   : > { %2866 = vst [vmem:[%s3587_s17 + $0x1530] sm:$0xff] %v1842_v15  ;;  %v1874_v15 = vadd.f32 1.0, %v850_v10  ;;  %v882_v10 = vld [vmem:[%s3574_s24 + $0x1730] sm:$0xff] }
 0x2d3   : > { %2867 = vst [vmem:[%s3587_s17 + $0x1538] sm:$0xff] %v1843_v17  ;;  %v1875_v17 = vadd.f32 1.0, %v851_v12  ;;  %v883_v12 = vld [vmem:[%s3574_s24 + $0x1738] sm:$0xff] }
 0x2d4   : > { %2868 = vst [vmem:[%s3587_s17 + $0x1540] sm:$0xff] %v1844_v19  ;;  %v1876_v19 = vadd.f32 1.0, %v852_v14  ;;  %v884_v14 = vld [vmem:[%s3574_s24 + $0x1740] sm:$0xff] }
 0x2d5   : > { %2869 = vst [vmem:[%s3587_s17 + $0x1548] sm:$0xff] %v1845_v21  ;;  %v1877_v21 = vadd.f32 1.0, %v853_v16  ;;  %v885_v16 = vld [vmem:[%s3574_s24 + $0x1748] sm:$0xff] }
 0x2d6   : > { %2870 = vst [vmem:[%s3587_s17 + $0x1550] sm:$0xff] %v1846_v23  ;;  %v1878_v23 = vadd.f32 1.0, %v854_v18  ;;  %v886_v18 = vld [vmem:[%s3574_s24 + $0x1750] sm:$0xff] }
 0x2d7   : > { %2871 = vst [vmem:[%s3587_s17 + $0x1558] sm:$0xff] %v1847_v25  ;;  %v1879_v25 = vadd.f32 1.0, %v855_v20  ;;  %v887_v20 = vld [vmem:[%s3574_s24 + $0x1758] sm:$0xff] }
 0x2d8   : > { %2872 = vst [vmem:[%s3587_s17 + $0x1560] sm:$0xff] %v1848_v27  ;;  %v1880_v27 = vadd.f32 1.0, %v856_v22  ;;  %v888_v22 = vld [vmem:[%s3574_s24 + $0x1760] sm:$0xff] }
 0x2d9   : > { %2873 = vst [vmem:[%s3587_s17 + $0x1568] sm:$0xff] %v1849_v29  ;;  %v1881_v29 = vadd.f32 1.0, %v857_v24  ;;  %v889_v24 = vld [vmem:[%s3574_s24 + $0x1768] sm:$0xff] }
 0x2da   : > { %2874 = vst [vmem:[%s3587_s17 + $0x1570] sm:$0xff] %v1850_v31  ;;  %v1882_v31 = vadd.f32 1.0, %v858_v26  ;;  %v890_v26 = vld [vmem:[%s3574_s24 + $0x1770] sm:$0xff] }
 0x2db   : > { %2875 = vst [vmem:[%s3587_s17 + $0x1578] sm:$0xff] %v1851_v33  ;;  %v1883_v33 = vadd.f32 1.0, %v859_v28  ;;  %v891_v28 = vld [vmem:[%s3574_s24 + $0x1778] sm:$0xff] }
 0x2dc   : > { %2876 = vst [vmem:[%s3587_s17 + $0x1580] sm:$0xff] %v1852_v35  ;;  %v1884_v35 = vadd.f32 1.0, %v860_v30  ;;  %v892_v30 = vld [vmem:[%s3574_s24 + $0x1780] sm:$0xff] }
 0x2dd   : > { %2877 = vst [vmem:[%s3587_s17 + $0x1588] sm:$0xff] %v1853_v37  ;;  %v1885_v37 = vadd.f32 1.0, %v861_v32  ;;  %v893_v32 = vld [vmem:[%s3574_s24 + $0x1788] sm:$0xff] }
 0x2de   : > { %2878 = vst [vmem:[%s3587_s17 + $0x1590] sm:$0xff] %v1854_v39  ;;  %v1886_v39 = vadd.f32 1.0, %v862_v34  ;;  %v894_v34 = vld [vmem:[%s3574_s24 + $0x1790] sm:$0xff] }
 0x2df   : > { %2879 = vst [vmem:[%s3587_s17 + $0x1598] sm:$0xff] %v1855_v41  ;;  %v1887_v41 = vadd.f32 1.0, %v863_v36  ;;  %v895_v36 = vld [vmem:[%s3574_s24 + $0x1798] sm:$0xff] }
 0x2e0   : > { %2880 = vst [vmem:[%s3587_s17 + $0x15a0] sm:$0xff] %v1856_v43  ;;  %v1888_v43 = vadd.f32 1.0, %v864_v38  ;;  %v896_v38 = vld [vmem:[%s3574_s24 + $0x17a0] sm:$0xff] }
 0x2e1   : > { %2881 = vst [vmem:[%s3587_s17 + $0x15a8] sm:$0xff] %v1857_v45  ;;  %v1889_v45 = vadd.f32 1.0, %v865_v40  ;;  %v897_v40 = vld [vmem:[%s3574_s24 + $0x17a8] sm:$0xff] }
 0x2e2   : > { %2882 = vst [vmem:[%s3587_s17 + $0x15b0] sm:$0xff] %v1858_v47  ;;  %v1890_v47 = vadd.f32 1.0, %v866_v42  ;;  %v898_v42 = vld [vmem:[%s3574_s24 + $0x17b0] sm:$0xff] }
 0x2e3   : > { %2883 = vst [vmem:[%s3587_s17 + $0x15b8] sm:$0xff] %v1859_v49  ;;  %v1891_v49 = vadd.f32 1.0, %v867_v44  ;;  %v899_v44 = vld [vmem:[%s3574_s24 + $0x17b8] sm:$0xff] }
 0x2e4   : > { %2884 = vst [vmem:[%s3587_s17 + $0x15c0] sm:$0xff] %v1860_v51  ;;  %v1892_v51 = vadd.f32 1.0, %v868_v46  ;;  %v900_v46 = vld [vmem:[%s3574_s24 + $0x17c0] sm:$0xff] }
 0x2e5   : > { %2885 = vst [vmem:[%s3587_s17 + $0x15c8] sm:$0xff] %v1861_v53  ;;  %v1893_v53 = vadd.f32 1.0, %v869_v48  ;;  %v901_v48 = vld [vmem:[%s3574_s24 + $0x17c8] sm:$0xff] }
 0x2e6   : > { %2886 = vst [vmem:[%s3587_s17 + $0x15d0] sm:$0xff] %v1862_v55  ;;  %v1894_v55 = vadd.f32 1.0, %v870_v50  ;;  %v902_v50 = vld [vmem:[%s3574_s24 + $0x17d0] sm:$0xff] }
 0x2e7   : > { %2887 = vst [vmem:[%s3587_s17 + $0x15d8] sm:$0xff] %v1863_v57  ;;  %v1895_v57 = vadd.f32 1.0, %v871_v52  ;;  %v903_v52 = vld [vmem:[%s3574_s24 + $0x17d8] sm:$0xff] }
 0x2e8   : > { %2888 = vst [vmem:[%s3587_s17 + $0x15e0] sm:$0xff] %v1864_v59  ;;  %v1896_v59 = vadd.f32 1.0, %v872_v54  ;;  %v904_v54 = vld [vmem:[%s3574_s24 + $0x17e0] sm:$0xff] }
 0x2e9   : > { %2889 = vst [vmem:[%s3587_s17 + $0x15e8] sm:$0xff] %v1865_v61  ;;  %v1897_v61 = vadd.f32 1.0, %v873_v56  ;;  %v905_v56 = vld [vmem:[%s3574_s24 + $0x17e8] sm:$0xff] }
 0x2ea   : > { %2890 = vst [vmem:[%s3587_s17 + $0x15f0] sm:$0xff] %v1866_v63  ;;  %v1898_v63 = vadd.f32 1.0, %v874_v58  ;;  %v906_v58 = vld [vmem:[%s3574_s24 + $0x17f0] sm:$0xff] }
 0x2eb   : > { %2891 = vst [vmem:[%s3587_s17 + $0x15f8] sm:$0xff] %v1867_v1  ;;  %v1899_v1 = vadd.f32 1.0, %v875_v60  ;;  %v907_v60 = vld [vmem:[%s3574_s24 + $0x17f8] sm:$0xff] }
 0x2ec   : > { %2892 = vst [vmem:[%s3587_s17 + $0x1600] sm:$0xff] %v1868_v3  ;;  %v1900_v3 = vadd.f32 1.0, %v876_v62  ;;  %v908_v62 = vld [vmem:[%s3574_s24 + $0x1800] sm:$0xff] }
 0x2ed   : > { %2893 = vst [vmem:[%s3587_s17 + $0x1608] sm:$0xff] %v1869_v5  ;;  %v1901_v5 = vadd.f32 1.0, %v877_v0  ;;  %v909_v0 = vld [vmem:[%s3574_s24 + $0x1808] sm:$0xff] }
 0x2ee   : > { %2894 = vst [vmem:[%s3587_s17 + $0x1610] sm:$0xff] %v1870_v7  ;;  %v1902_v7 = vadd.f32 1.0, %v878_v2  ;;  %v910_v2 = vld [vmem:[%s3574_s24 + $0x1810] sm:$0xff] }
 0x2ef   : > { %2895 = vst [vmem:[%s3587_s17 + $0x1618] sm:$0xff] %v1871_v9  ;;  %v1903_v9 = vadd.f32 1.0, %v879_v4  ;;  %v911_v4 = vld [vmem:[%s3574_s24 + $0x1818] sm:$0xff] }
 0x2f0   : > { %2896 = vst [vmem:[%s3587_s17 + $0x1620] sm:$0xff] %v1872_v11  ;;  %v1904_v11 = vadd.f32 1.0, %v880_v6  ;;  %v912_v6 = vld [vmem:[%s3574_s24 + $0x1820] sm:$0xff] }
 0x2f1   : > { %2897 = vst [vmem:[%s3587_s17 + $0x1628] sm:$0xff] %v1873_v13  ;;  %v1905_v13 = vadd.f32 1.0, %v881_v8  ;;  %v913_v8 = vld [vmem:[%s3574_s24 + $0x1828] sm:$0xff] }
 0x2f2   : > { %2898 = vst [vmem:[%s3587_s17 + $0x1630] sm:$0xff] %v1874_v15  ;;  %v1906_v15 = vadd.f32 1.0, %v882_v10  ;;  %v914_v10 = vld [vmem:[%s3574_s24 + $0x1830] sm:$0xff] }
 0x2f3   : > { %2899 = vst [vmem:[%s3587_s17 + $0x1638] sm:$0xff] %v1875_v17  ;;  %v1907_v17 = vadd.f32 1.0, %v883_v12  ;;  %v915_v12 = vld [vmem:[%s3574_s24 + $0x1838] sm:$0xff] }
 0x2f4   : > { %2900 = vst [vmem:[%s3587_s17 + $0x1640] sm:$0xff] %v1876_v19  ;;  %v1908_v19 = vadd.f32 1.0, %v884_v14  ;;  %v916_v14 = vld [vmem:[%s3574_s24 + $0x1840] sm:$0xff] }
 0x2f5   : > { %2901 = vst [vmem:[%s3587_s17 + $0x1648] sm:$0xff] %v1877_v21  ;;  %v1909_v21 = vadd.f32 1.0, %v885_v16  ;;  %v917_v16 = vld [vmem:[%s3574_s24 + $0x1848] sm:$0xff] }
 0x2f6   : > { %2902 = vst [vmem:[%s3587_s17 + $0x1650] sm:$0xff] %v1878_v23  ;;  %v1910_v23 = vadd.f32 1.0, %v886_v18  ;;  %v918_v18 = vld [vmem:[%s3574_s24 + $0x1850] sm:$0xff] }
 0x2f7   : > { %2903 = vst [vmem:[%s3587_s17 + $0x1658] sm:$0xff] %v1879_v25  ;;  %v1911_v25 = vadd.f32 1.0, %v887_v20  ;;  %v919_v20 = vld [vmem:[%s3574_s24 + $0x1858] sm:$0xff] }
 0x2f8   : > { %2904 = vst [vmem:[%s3587_s17 + $0x1660] sm:$0xff] %v1880_v27  ;;  %v1912_v27 = vadd.f32 1.0, %v888_v22  ;;  %v920_v22 = vld [vmem:[%s3574_s24 + $0x1860] sm:$0xff] }
 0x2f9   : > { %2905 = vst [vmem:[%s3587_s17 + $0x1668] sm:$0xff] %v1881_v29  ;;  %v1913_v29 = vadd.f32 1.0, %v889_v24  ;;  %v921_v24 = vld [vmem:[%s3574_s24 + $0x1868] sm:$0xff] }
 0x2fa   : > { %2906 = vst [vmem:[%s3587_s17 + $0x1670] sm:$0xff] %v1882_v31  ;;  %v1914_v31 = vadd.f32 1.0, %v890_v26  ;;  %v922_v26 = vld [vmem:[%s3574_s24 + $0x1870] sm:$0xff] }
 0x2fb   : > { %2907 = vst [vmem:[%s3587_s17 + $0x1678] sm:$0xff] %v1883_v33  ;;  %v1915_v33 = vadd.f32 1.0, %v891_v28  ;;  %v923_v28 = vld [vmem:[%s3574_s24 + $0x1878] sm:$0xff] }
 0x2fc   : > { %2908 = vst [vmem:[%s3587_s17 + $0x1680] sm:$0xff] %v1884_v35  ;;  %v1916_v35 = vadd.f32 1.0, %v892_v30  ;;  %v924_v30 = vld [vmem:[%s3574_s24 + $0x1880] sm:$0xff] }
 0x2fd   : > { %2909 = vst [vmem:[%s3587_s17 + $0x1688] sm:$0xff] %v1885_v37  ;;  %v1917_v37 = vadd.f32 1.0, %v893_v32  ;;  %v925_v32 = vld [vmem:[%s3574_s24 + $0x1888] sm:$0xff] }
 0x2fe   : > { %2910 = vst [vmem:[%s3587_s17 + $0x1690] sm:$0xff] %v1886_v39  ;;  %v1918_v39 = vadd.f32 1.0, %v894_v34  ;;  %v926_v34 = vld [vmem:[%s3574_s24 + $0x1890] sm:$0xff] }
 0x2ff   : > { %2911 = vst [vmem:[%s3587_s17 + $0x1698] sm:$0xff] %v1887_v41  ;;  %v1919_v41 = vadd.f32 1.0, %v895_v36  ;;  %v927_v36 = vld [vmem:[%s3574_s24 + $0x1898] sm:$0xff] }
 0x300   : > { %2912 = vst [vmem:[%s3587_s17 + $0x16a0] sm:$0xff] %v1888_v43  ;;  %v1920_v43 = vadd.f32 1.0, %v896_v38  ;;  %v928_v38 = vld [vmem:[%s3574_s24 + $0x18a0] sm:$0xff] }
 0x301   : > { %2913 = vst [vmem:[%s3587_s17 + $0x16a8] sm:$0xff] %v1889_v45  ;;  %v1921_v45 = vadd.f32 1.0, %v897_v40  ;;  %v929_v40 = vld [vmem:[%s3574_s24 + $0x18a8] sm:$0xff] }
 0x302   : > { %2914 = vst [vmem:[%s3587_s17 + $0x16b0] sm:$0xff] %v1890_v47  ;;  %v1922_v47 = vadd.f32 1.0, %v898_v42  ;;  %v930_v42 = vld [vmem:[%s3574_s24 + $0x18b0] sm:$0xff] }
 0x303   : > { %2915 = vst [vmem:[%s3587_s17 + $0x16b8] sm:$0xff] %v1891_v49  ;;  %v1923_v49 = vadd.f32 1.0, %v899_v44  ;;  %v931_v44 = vld [vmem:[%s3574_s24 + $0x18b8] sm:$0xff] }
 0x304   : > { %2916 = vst [vmem:[%s3587_s17 + $0x16c0] sm:$0xff] %v1892_v51  ;;  %v1924_v51 = vadd.f32 1.0, %v900_v46  ;;  %v932_v46 = vld [vmem:[%s3574_s24 + $0x18c0] sm:$0xff] }
 0x305   : > { %2917 = vst [vmem:[%s3587_s17 + $0x16c8] sm:$0xff] %v1893_v53  ;;  %v1925_v53 = vadd.f32 1.0, %v901_v48  ;;  %v933_v48 = vld [vmem:[%s3574_s24 + $0x18c8] sm:$0xff] }
 0x306   : > { %2918 = vst [vmem:[%s3587_s17 + $0x16d0] sm:$0xff] %v1894_v55  ;;  %v1926_v55 = vadd.f32 1.0, %v902_v50  ;;  %v934_v50 = vld [vmem:[%s3574_s24 + $0x18d0] sm:$0xff] }
 0x307   : > { %2919 = vst [vmem:[%s3587_s17 + $0x16d8] sm:$0xff] %v1895_v57  ;;  %v1927_v57 = vadd.f32 1.0, %v903_v52  ;;  %v935_v52 = vld [vmem:[%s3574_s24 + $0x18d8] sm:$0xff] }
 0x308   : > { %2920 = vst [vmem:[%s3587_s17 + $0x16e0] sm:$0xff] %v1896_v59  ;;  %v1928_v59 = vadd.f32 1.0, %v904_v54  ;;  %v936_v54 = vld [vmem:[%s3574_s24 + $0x18e0] sm:$0xff] }
 0x309   : > { %2921 = vst [vmem:[%s3587_s17 + $0x16e8] sm:$0xff] %v1897_v61  ;;  %v1929_v61 = vadd.f32 1.0, %v905_v56  ;;  %v937_v56 = vld [vmem:[%s3574_s24 + $0x18e8] sm:$0xff] }
 0x30a   : > { %2922 = vst [vmem:[%s3587_s17 + $0x16f0] sm:$0xff] %v1898_v63  ;;  %v1930_v63 = vadd.f32 1.0, %v906_v58  ;;  %v938_v58 = vld [vmem:[%s3574_s24 + $0x18f0] sm:$0xff] }
 0x30b   : > { %2923 = vst [vmem:[%s3587_s17 + $0x16f8] sm:$0xff] %v1899_v1  ;;  %v1931_v1 = vadd.f32 1.0, %v907_v60  ;;  %v939_v60 = vld [vmem:[%s3574_s24 + $0x18f8] sm:$0xff] }
 0x30c   : > { %2924 = vst [vmem:[%s3587_s17 + $0x1700] sm:$0xff] %v1900_v3  ;;  %v1932_v3 = vadd.f32 1.0, %v908_v62  ;;  %v940_v62 = vld [vmem:[%s3574_s24 + $0x1900] sm:$0xff] }
 0x30d   : > { %2925 = vst [vmem:[%s3587_s17 + $0x1708] sm:$0xff] %v1901_v5  ;;  %v1933_v5 = vadd.f32 1.0, %v909_v0  ;;  %v941_v0 = vld [vmem:[%s3574_s24 + $0x1908] sm:$0xff] }
 0x30e   : > { %2926 = vst [vmem:[%s3587_s17 + $0x1710] sm:$0xff] %v1902_v7  ;;  %v1934_v7 = vadd.f32 1.0, %v910_v2  ;;  %v942_v2 = vld [vmem:[%s3574_s24 + $0x1910] sm:$0xff] }
 0x30f   : > { %2927 = vst [vmem:[%s3587_s17 + $0x1718] sm:$0xff] %v1903_v9  ;;  %v1935_v9 = vadd.f32 1.0, %v911_v4  ;;  %v943_v4 = vld [vmem:[%s3574_s24 + $0x1918] sm:$0xff] }
 0x310   : > { %2928 = vst [vmem:[%s3587_s17 + $0x1720] sm:$0xff] %v1904_v11  ;;  %v1936_v11 = vadd.f32 1.0, %v912_v6  ;;  %v944_v6 = vld [vmem:[%s3574_s24 + $0x1920] sm:$0xff] }
 0x311   : > { %2929 = vst [vmem:[%s3587_s17 + $0x1728] sm:$0xff] %v1905_v13  ;;  %v1937_v13 = vadd.f32 1.0, %v913_v8  ;;  %v945_v8 = vld [vmem:[%s3574_s24 + $0x1928] sm:$0xff] }
 0x312   : > { %2930 = vst [vmem:[%s3587_s17 + $0x1730] sm:$0xff] %v1906_v15  ;;  %v1938_v15 = vadd.f32 1.0, %v914_v10  ;;  %v946_v10 = vld [vmem:[%s3574_s24 + $0x1930] sm:$0xff] }
 0x313   : > { %2931 = vst [vmem:[%s3587_s17 + $0x1738] sm:$0xff] %v1907_v17  ;;  %v1939_v17 = vadd.f32 1.0, %v915_v12  ;;  %v947_v12 = vld [vmem:[%s3574_s24 + $0x1938] sm:$0xff] }
 0x314   : > { %2932 = vst [vmem:[%s3587_s17 + $0x1740] sm:$0xff] %v1908_v19  ;;  %v1940_v19 = vadd.f32 1.0, %v916_v14  ;;  %v948_v14 = vld [vmem:[%s3574_s24 + $0x1940] sm:$0xff] }
 0x315   : > { %2933 = vst [vmem:[%s3587_s17 + $0x1748] sm:$0xff] %v1909_v21  ;;  %v1941_v21 = vadd.f32 1.0, %v917_v16  ;;  %v949_v16 = vld [vmem:[%s3574_s24 + $0x1948] sm:$0xff] }
 0x316   : > { %2934 = vst [vmem:[%s3587_s17 + $0x1750] sm:$0xff] %v1910_v23  ;;  %v1942_v23 = vadd.f32 1.0, %v918_v18  ;;  %v950_v18 = vld [vmem:[%s3574_s24 + $0x1950] sm:$0xff] }
 0x317   : > { %2935 = vst [vmem:[%s3587_s17 + $0x1758] sm:$0xff] %v1911_v25  ;;  %v1943_v25 = vadd.f32 1.0, %v919_v20  ;;  %v951_v20 = vld [vmem:[%s3574_s24 + $0x1958] sm:$0xff] }
 0x318   : > { %2936 = vst [vmem:[%s3587_s17 + $0x1760] sm:$0xff] %v1912_v27  ;;  %v1944_v27 = vadd.f32 1.0, %v920_v22  ;;  %v952_v22 = vld [vmem:[%s3574_s24 + $0x1960] sm:$0xff] }
 0x319   : > { %2937 = vst [vmem:[%s3587_s17 + $0x1768] sm:$0xff] %v1913_v29  ;;  %v1945_v29 = vadd.f32 1.0, %v921_v24  ;;  %v953_v24 = vld [vmem:[%s3574_s24 + $0x1968] sm:$0xff] }
 0x31a   : > { %2938 = vst [vmem:[%s3587_s17 + $0x1770] sm:$0xff] %v1914_v31  ;;  %v1946_v31 = vadd.f32 1.0, %v922_v26  ;;  %v954_v26 = vld [vmem:[%s3574_s24 + $0x1970] sm:$0xff] }
 0x31b   : > { %2939 = vst [vmem:[%s3587_s17 + $0x1778] sm:$0xff] %v1915_v33  ;;  %v1947_v33 = vadd.f32 1.0, %v923_v28  ;;  %v955_v28 = vld [vmem:[%s3574_s24 + $0x1978] sm:$0xff] }
 0x31c   : > { %2940 = vst [vmem:[%s3587_s17 + $0x1780] sm:$0xff] %v1916_v35  ;;  %v1948_v35 = vadd.f32 1.0, %v924_v30  ;;  %v956_v30 = vld [vmem:[%s3574_s24 + $0x1980] sm:$0xff] }
 0x31d   : > { %2941 = vst [vmem:[%s3587_s17 + $0x1788] sm:$0xff] %v1917_v37  ;;  %v1949_v37 = vadd.f32 1.0, %v925_v32  ;;  %v957_v32 = vld [vmem:[%s3574_s24 + $0x1988] sm:$0xff] }
 0x31e   : > { %2942 = vst [vmem:[%s3587_s17 + $0x1790] sm:$0xff] %v1918_v39  ;;  %v1950_v39 = vadd.f32 1.0, %v926_v34  ;;  %v958_v34 = vld [vmem:[%s3574_s24 + $0x1990] sm:$0xff] }
 0x31f   : > { %2943 = vst [vmem:[%s3587_s17 + $0x1798] sm:$0xff] %v1919_v41  ;;  %v1951_v41 = vadd.f32 1.0, %v927_v36  ;;  %v959_v36 = vld [vmem:[%s3574_s24 + $0x1998] sm:$0xff] }
 0x320   : > { %2944 = vst [vmem:[%s3587_s17 + $0x17a0] sm:$0xff] %v1920_v43  ;;  %v1952_v43 = vadd.f32 1.0, %v928_v38  ;;  %v960_v38 = vld [vmem:[%s3574_s24 + $0x19a0] sm:$0xff] }
 0x321   : > { %2945 = vst [vmem:[%s3587_s17 + $0x17a8] sm:$0xff] %v1921_v45  ;;  %v1953_v45 = vadd.f32 1.0, %v929_v40  ;;  %v961_v40 = vld [vmem:[%s3574_s24 + $0x19a8] sm:$0xff] }
 0x322   : > { %2946 = vst [vmem:[%s3587_s17 + $0x17b0] sm:$0xff] %v1922_v47  ;;  %v1954_v47 = vadd.f32 1.0, %v930_v42  ;;  %v962_v42 = vld [vmem:[%s3574_s24 + $0x19b0] sm:$0xff] }
 0x323   : > { %2947 = vst [vmem:[%s3587_s17 + $0x17b8] sm:$0xff] %v1923_v49  ;;  %v1955_v49 = vadd.f32 1.0, %v931_v44  ;;  %v963_v44 = vld [vmem:[%s3574_s24 + $0x19b8] sm:$0xff] }
 0x324   : > { %2948 = vst [vmem:[%s3587_s17 + $0x17c0] sm:$0xff] %v1924_v51  ;;  %v1956_v51 = vadd.f32 1.0, %v932_v46  ;;  %v964_v46 = vld [vmem:[%s3574_s24 + $0x19c0] sm:$0xff] }
 0x325   : > { %2949 = vst [vmem:[%s3587_s17 + $0x17c8] sm:$0xff] %v1925_v53  ;;  %v1957_v53 = vadd.f32 1.0, %v933_v48  ;;  %v965_v48 = vld [vmem:[%s3574_s24 + $0x19c8] sm:$0xff] }
 0x326   : > { %2950 = vst [vmem:[%s3587_s17 + $0x17d0] sm:$0xff] %v1926_v55  ;;  %v1958_v55 = vadd.f32 1.0, %v934_v50  ;;  %v966_v50 = vld [vmem:[%s3574_s24 + $0x19d0] sm:$0xff] }
 0x327   : > { %2951 = vst [vmem:[%s3587_s17 + $0x17d8] sm:$0xff] %v1927_v57  ;;  %v1959_v57 = vadd.f32 1.0, %v935_v52  ;;  %v967_v52 = vld [vmem:[%s3574_s24 + $0x19d8] sm:$0xff] }
 0x328   : > { %2952 = vst [vmem:[%s3587_s17 + $0x17e0] sm:$0xff] %v1928_v59  ;;  %v1960_v59 = vadd.f32 1.0, %v936_v54  ;;  %v968_v54 = vld [vmem:[%s3574_s24 + $0x19e0] sm:$0xff] }
 0x329   : > { %2953 = vst [vmem:[%s3587_s17 + $0x17e8] sm:$0xff] %v1929_v61  ;;  %v1961_v61 = vadd.f32 1.0, %v937_v56  ;;  %v969_v56 = vld [vmem:[%s3574_s24 + $0x19e8] sm:$0xff] }
 0x32a   : > { %2954 = vst [vmem:[%s3587_s17 + $0x17f0] sm:$0xff] %v1930_v63  ;;  %v1962_v63 = vadd.f32 1.0, %v938_v58  ;;  %v970_v58 = vld [vmem:[%s3574_s24 + $0x19f0] sm:$0xff] }
 0x32b   : > { %2955 = vst [vmem:[%s3587_s17 + $0x17f8] sm:$0xff] %v1931_v1  ;;  %v1963_v1 = vadd.f32 1.0, %v939_v60  ;;  %v971_v60 = vld [vmem:[%s3574_s24 + $0x19f8] sm:$0xff] }
 0x32c   : > { %2956 = vst [vmem:[%s3587_s17 + $0x1800] sm:$0xff] %v1932_v3  ;;  %v1964_v3 = vadd.f32 1.0, %v940_v62  ;;  %v972_v62 = vld [vmem:[%s3574_s24 + $0x1a00] sm:$0xff] }
 0x32d   : > { %2957 = vst [vmem:[%s3587_s17 + $0x1808] sm:$0xff] %v1933_v5  ;;  %v1965_v5 = vadd.f32 1.0, %v941_v0  ;;  %v973_v0 = vld [vmem:[%s3574_s24 + $0x1a08] sm:$0xff] }
 0x32e   : > { %2958 = vst [vmem:[%s3587_s17 + $0x1810] sm:$0xff] %v1934_v7  ;;  %v1966_v7 = vadd.f32 1.0, %v942_v2  ;;  %v974_v2 = vld [vmem:[%s3574_s24 + $0x1a10] sm:$0xff] }
 0x32f   : > { %2959 = vst [vmem:[%s3587_s17 + $0x1818] sm:$0xff] %v1935_v9  ;;  %v1967_v9 = vadd.f32 1.0, %v943_v4  ;;  %v975_v4 = vld [vmem:[%s3574_s24 + $0x1a18] sm:$0xff] }
 0x330   : > { %2960 = vst [vmem:[%s3587_s17 + $0x1820] sm:$0xff] %v1936_v11  ;;  %v1968_v11 = vadd.f32 1.0, %v944_v6  ;;  %v976_v6 = vld [vmem:[%s3574_s24 + $0x1a20] sm:$0xff] }
 0x331   : > { %2961 = vst [vmem:[%s3587_s17 + $0x1828] sm:$0xff] %v1937_v13  ;;  %v1969_v13 = vadd.f32 1.0, %v945_v8  ;;  %v977_v8 = vld [vmem:[%s3574_s24 + $0x1a28] sm:$0xff] }
 0x332   : > { %2962 = vst [vmem:[%s3587_s17 + $0x1830] sm:$0xff] %v1938_v15  ;;  %v1970_v15 = vadd.f32 1.0, %v946_v10  ;;  %v978_v10 = vld [vmem:[%s3574_s24 + $0x1a30] sm:$0xff] }
 0x333   : > { %2963 = vst [vmem:[%s3587_s17 + $0x1838] sm:$0xff] %v1939_v17  ;;  %v1971_v17 = vadd.f32 1.0, %v947_v12  ;;  %v979_v12 = vld [vmem:[%s3574_s24 + $0x1a38] sm:$0xff] }
 0x334   : > { %2964 = vst [vmem:[%s3587_s17 + $0x1840] sm:$0xff] %v1940_v19  ;;  %v1972_v19 = vadd.f32 1.0, %v948_v14  ;;  %v980_v14 = vld [vmem:[%s3574_s24 + $0x1a40] sm:$0xff] }
 0x335   : > { %2965 = vst [vmem:[%s3587_s17 + $0x1848] sm:$0xff] %v1941_v21  ;;  %v1973_v21 = vadd.f32 1.0, %v949_v16  ;;  %v981_v16 = vld [vmem:[%s3574_s24 + $0x1a48] sm:$0xff] }
 0x336   : > { %2966 = vst [vmem:[%s3587_s17 + $0x1850] sm:$0xff] %v1942_v23  ;;  %v1974_v23 = vadd.f32 1.0, %v950_v18  ;;  %v982_v18 = vld [vmem:[%s3574_s24 + $0x1a50] sm:$0xff] }
 0x337   : > { %2967 = vst [vmem:[%s3587_s17 + $0x1858] sm:$0xff] %v1943_v25  ;;  %v1975_v25 = vadd.f32 1.0, %v951_v20  ;;  %v983_v20 = vld [vmem:[%s3574_s24 + $0x1a58] sm:$0xff] }
 0x338   : > { %2968 = vst [vmem:[%s3587_s17 + $0x1860] sm:$0xff] %v1944_v27  ;;  %v1976_v27 = vadd.f32 1.0, %v952_v22  ;;  %v984_v22 = vld [vmem:[%s3574_s24 + $0x1a60] sm:$0xff] }
 0x339   : > { %2969 = vst [vmem:[%s3587_s17 + $0x1868] sm:$0xff] %v1945_v29  ;;  %v1977_v29 = vadd.f32 1.0, %v953_v24  ;;  %v985_v24 = vld [vmem:[%s3574_s24 + $0x1a68] sm:$0xff] }
 0x33a   : > { %2970 = vst [vmem:[%s3587_s17 + $0x1870] sm:$0xff] %v1946_v31  ;;  %v1978_v31 = vadd.f32 1.0, %v954_v26  ;;  %v986_v26 = vld [vmem:[%s3574_s24 + $0x1a70] sm:$0xff] }
 0x33b   : > { %2971 = vst [vmem:[%s3587_s17 + $0x1878] sm:$0xff] %v1947_v33  ;;  %v1979_v33 = vadd.f32 1.0, %v955_v28  ;;  %v987_v28 = vld [vmem:[%s3574_s24 + $0x1a78] sm:$0xff] }
 0x33c   : > { %2972 = vst [vmem:[%s3587_s17 + $0x1880] sm:$0xff] %v1948_v35  ;;  %v1980_v35 = vadd.f32 1.0, %v956_v30  ;;  %v988_v30 = vld [vmem:[%s3574_s24 + $0x1a80] sm:$0xff] }
 0x33d   : > { %2973 = vst [vmem:[%s3587_s17 + $0x1888] sm:$0xff] %v1949_v37  ;;  %v1981_v37 = vadd.f32 1.0, %v957_v32  ;;  %v989_v32 = vld [vmem:[%s3574_s24 + $0x1a88] sm:$0xff] }
 0x33e   : > { %2974 = vst [vmem:[%s3587_s17 + $0x1890] sm:$0xff] %v1950_v39  ;;  %v1982_v39 = vadd.f32 1.0, %v958_v34  ;;  %v990_v34 = vld [vmem:[%s3574_s24 + $0x1a90] sm:$0xff] }
 0x33f   : > { %2975 = vst [vmem:[%s3587_s17 + $0x1898] sm:$0xff] %v1951_v41  ;;  %v1983_v41 = vadd.f32 1.0, %v959_v36  ;;  %v991_v36 = vld [vmem:[%s3574_s24 + $0x1a98] sm:$0xff] }
 0x340   : > { %2976 = vst [vmem:[%s3587_s17 + $0x18a0] sm:$0xff] %v1952_v43  ;;  %v1984_v43 = vadd.f32 1.0, %v960_v38  ;;  %v992_v38 = vld [vmem:[%s3574_s24 + $0x1aa0] sm:$0xff] }
 0x341   : > { %2977 = vst [vmem:[%s3587_s17 + $0x18a8] sm:$0xff] %v1953_v45  ;;  %v1985_v45 = vadd.f32 1.0, %v961_v40  ;;  %v993_v40 = vld [vmem:[%s3574_s24 + $0x1aa8] sm:$0xff] }
 0x342   : > { %2978 = vst [vmem:[%s3587_s17 + $0x18b0] sm:$0xff] %v1954_v47  ;;  %v1986_v47 = vadd.f32 1.0, %v962_v42  ;;  %v994_v42 = vld [vmem:[%s3574_s24 + $0x1ab0] sm:$0xff] }
 0x343   : > { %2979 = vst [vmem:[%s3587_s17 + $0x18b8] sm:$0xff] %v1955_v49  ;;  %v1987_v49 = vadd.f32 1.0, %v963_v44  ;;  %v995_v44 = vld [vmem:[%s3574_s24 + $0x1ab8] sm:$0xff] }
 0x344   : > { %2980 = vst [vmem:[%s3587_s17 + $0x18c0] sm:$0xff] %v1956_v51  ;;  %v1988_v51 = vadd.f32 1.0, %v964_v46  ;;  %v996_v46 = vld [vmem:[%s3574_s24 + $0x1ac0] sm:$0xff] }
 0x345   : > { %2981 = vst [vmem:[%s3587_s17 + $0x18c8] sm:$0xff] %v1957_v53  ;;  %v1989_v53 = vadd.f32 1.0, %v965_v48  ;;  %v997_v48 = vld [vmem:[%s3574_s24 + $0x1ac8] sm:$0xff] }
 0x346   : > { %2982 = vst [vmem:[%s3587_s17 + $0x18d0] sm:$0xff] %v1958_v55  ;;  %v1990_v55 = vadd.f32 1.0, %v966_v50  ;;  %v998_v50 = vld [vmem:[%s3574_s24 + $0x1ad0] sm:$0xff] }
 0x347   : > { %2983 = vst [vmem:[%s3587_s17 + $0x18d8] sm:$0xff] %v1959_v57  ;;  %v1991_v57 = vadd.f32 1.0, %v967_v52  ;;  %v999_v52 = vld [vmem:[%s3574_s24 + $0x1ad8] sm:$0xff] }
 0x348   : > { %2984 = vst [vmem:[%s3587_s17 + $0x18e0] sm:$0xff] %v1960_v59  ;;  %v1992_v59 = vadd.f32 1.0, %v968_v54  ;;  %v1000_v54 = vld [vmem:[%s3574_s24 + $0x1ae0] sm:$0xff] }
 0x349   : > { %2985 = vst [vmem:[%s3587_s17 + $0x18e8] sm:$0xff] %v1961_v61  ;;  %v1993_v61 = vadd.f32 1.0, %v969_v56  ;;  %v1001_v56 = vld [vmem:[%s3574_s24 + $0x1ae8] sm:$0xff] }
 0x34a   : > { %2986 = vst [vmem:[%s3587_s17 + $0x18f0] sm:$0xff] %v1962_v63  ;;  %v1994_v63 = vadd.f32 1.0, %v970_v58  ;;  %v1002_v58 = vld [vmem:[%s3574_s24 + $0x1af0] sm:$0xff] }
 0x34b   : > { %2987 = vst [vmem:[%s3587_s17 + $0x18f8] sm:$0xff] %v1963_v1  ;;  %v1995_v1 = vadd.f32 1.0, %v971_v60  ;;  %v1003_v60 = vld [vmem:[%s3574_s24 + $0x1af8] sm:$0xff] }
 0x34c   : > { %2988 = vst [vmem:[%s3587_s17 + $0x1900] sm:$0xff] %v1964_v3  ;;  %v1996_v3 = vadd.f32 1.0, %v972_v62  ;;  %v1004_v62 = vld [vmem:[%s3574_s24 + $0x1b00] sm:$0xff] }
 0x34d   : > { %2989 = vst [vmem:[%s3587_s17 + $0x1908] sm:$0xff] %v1965_v5  ;;  %v1997_v5 = vadd.f32 1.0, %v973_v0  ;;  %v1005_v0 = vld [vmem:[%s3574_s24 + $0x1b08] sm:$0xff] }
 0x34e   : > { %2990 = vst [vmem:[%s3587_s17 + $0x1910] sm:$0xff] %v1966_v7  ;;  %v1998_v7 = vadd.f32 1.0, %v974_v2  ;;  %v1006_v2 = vld [vmem:[%s3574_s24 + $0x1b10] sm:$0xff] }
 0x34f   : > { %2991 = vst [vmem:[%s3587_s17 + $0x1918] sm:$0xff] %v1967_v9  ;;  %v1999_v9 = vadd.f32 1.0, %v975_v4  ;;  %v1007_v4 = vld [vmem:[%s3574_s24 + $0x1b18] sm:$0xff] }
 0x350   : > { %2992 = vst [vmem:[%s3587_s17 + $0x1920] sm:$0xff] %v1968_v11  ;;  %v2000_v11 = vadd.f32 1.0, %v976_v6  ;;  %v1008_v6 = vld [vmem:[%s3574_s24 + $0x1b20] sm:$0xff] }
 0x351   : > { %2993 = vst [vmem:[%s3587_s17 + $0x1928] sm:$0xff] %v1969_v13  ;;  %v2001_v13 = vadd.f32 1.0, %v977_v8  ;;  %v1009_v8 = vld [vmem:[%s3574_s24 + $0x1b28] sm:$0xff] }
 0x352   : > { %2994 = vst [vmem:[%s3587_s17 + $0x1930] sm:$0xff] %v1970_v15  ;;  %v2002_v15 = vadd.f32 1.0, %v978_v10  ;;  %v1010_v10 = vld [vmem:[%s3574_s24 + $0x1b30] sm:$0xff] }
 0x353   : > { %2995 = vst [vmem:[%s3587_s17 + $0x1938] sm:$0xff] %v1971_v17  ;;  %v2003_v17 = vadd.f32 1.0, %v979_v12  ;;  %v1011_v12 = vld [vmem:[%s3574_s24 + $0x1b38] sm:$0xff] }
 0x354   : > { %2996 = vst [vmem:[%s3587_s17 + $0x1940] sm:$0xff] %v1972_v19  ;;  %v2004_v19 = vadd.f32 1.0, %v980_v14  ;;  %v1012_v14 = vld [vmem:[%s3574_s24 + $0x1b40] sm:$0xff] }
 0x355   : > { %2997 = vst [vmem:[%s3587_s17 + $0x1948] sm:$0xff] %v1973_v21  ;;  %v2005_v21 = vadd.f32 1.0, %v981_v16  ;;  %v1013_v16 = vld [vmem:[%s3574_s24 + $0x1b48] sm:$0xff] }
 0x356   : > { %2998 = vst [vmem:[%s3587_s17 + $0x1950] sm:$0xff] %v1974_v23  ;;  %v2006_v23 = vadd.f32 1.0, %v982_v18  ;;  %v1014_v18 = vld [vmem:[%s3574_s24 + $0x1b50] sm:$0xff] }
 0x357   : > { %2999 = vst [vmem:[%s3587_s17 + $0x1958] sm:$0xff] %v1975_v25  ;;  %v2007_v25 = vadd.f32 1.0, %v983_v20  ;;  %v1015_v20 = vld [vmem:[%s3574_s24 + $0x1b58] sm:$0xff] }
 0x358   : > { %3000 = vst [vmem:[%s3587_s17 + $0x1960] sm:$0xff] %v1976_v27  ;;  %v2008_v27 = vadd.f32 1.0, %v984_v22  ;;  %v1016_v22 = vld [vmem:[%s3574_s24 + $0x1b60] sm:$0xff] }
 0x359   : > { %3001 = vst [vmem:[%s3587_s17 + $0x1968] sm:$0xff] %v1977_v29  ;;  %v2009_v29 = vadd.f32 1.0, %v985_v24  ;;  %v1017_v24 = vld [vmem:[%s3574_s24 + $0x1b68] sm:$0xff] }
 0x35a   : > { %3002 = vst [vmem:[%s3587_s17 + $0x1970] sm:$0xff] %v1978_v31  ;;  %v2010_v31 = vadd.f32 1.0, %v986_v26  ;;  %v1018_v26 = vld [vmem:[%s3574_s24 + $0x1b70] sm:$0xff] }
 0x35b   : > { %3003 = vst [vmem:[%s3587_s17 + $0x1978] sm:$0xff] %v1979_v33  ;;  %v2011_v33 = vadd.f32 1.0, %v987_v28  ;;  %v1019_v28 = vld [vmem:[%s3574_s24 + $0x1b78] sm:$0xff] }
 0x35c   : > { %3004 = vst [vmem:[%s3587_s17 + $0x1980] sm:$0xff] %v1980_v35  ;;  %v2012_v35 = vadd.f32 1.0, %v988_v30  ;;  %v1020_v30 = vld [vmem:[%s3574_s24 + $0x1b80] sm:$0xff] }
 0x35d   : > { %3005 = vst [vmem:[%s3587_s17 + $0x1988] sm:$0xff] %v1981_v37  ;;  %v2013_v37 = vadd.f32 1.0, %v989_v32  ;;  %v1021_v32 = vld [vmem:[%s3574_s24 + $0x1b88] sm:$0xff] }
 0x35e   : > { %3006 = vst [vmem:[%s3587_s17 + $0x1990] sm:$0xff] %v1982_v39  ;;  %v2014_v39 = vadd.f32 1.0, %v990_v34  ;;  %v1022_v34 = vld [vmem:[%s3574_s24 + $0x1b90] sm:$0xff] }
 0x35f   : > { %3007 = vst [vmem:[%s3587_s17 + $0x1998] sm:$0xff] %v1983_v41  ;;  %v2015_v41 = vadd.f32 1.0, %v991_v36  ;;  %v1023_v36 = vld [vmem:[%s3574_s24 + $0x1b98] sm:$0xff] }
 0x360   : > { %3008 = vst [vmem:[%s3587_s17 + $0x19a0] sm:$0xff] %v1984_v43  ;;  %v2016_v43 = vadd.f32 1.0, %v992_v38  ;;  %v1024_v38 = vld [vmem:[%s3574_s24 + $0x1ba0] sm:$0xff] }
 0x361   : > { %3009 = vst [vmem:[%s3587_s17 + $0x19a8] sm:$0xff] %v1985_v45  ;;  %v2017_v45 = vadd.f32 1.0, %v993_v40  ;;  %v1025_v40 = vld [vmem:[%s3574_s24 + $0x1ba8] sm:$0xff] }
 0x362   : > { %3010 = vst [vmem:[%s3587_s17 + $0x19b0] sm:$0xff] %v1986_v47  ;;  %v2018_v47 = vadd.f32 1.0, %v994_v42  ;;  %v1026_v42 = vld [vmem:[%s3574_s24 + $0x1bb0] sm:$0xff] }
 0x363   : > { %3011 = vst [vmem:[%s3587_s17 + $0x19b8] sm:$0xff] %v1987_v49  ;;  %v2019_v49 = vadd.f32 1.0, %v995_v44  ;;  %v1027_v44 = vld [vmem:[%s3574_s24 + $0x1bb8] sm:$0xff] }
 0x364   : > { %3012 = vst [vmem:[%s3587_s17 + $0x19c0] sm:$0xff] %v1988_v51  ;;  %v2020_v51 = vadd.f32 1.0, %v996_v46  ;;  %v1028_v46 = vld [vmem:[%s3574_s24 + $0x1bc0] sm:$0xff] }
 0x365   : > { %3013 = vst [vmem:[%s3587_s17 + $0x19c8] sm:$0xff] %v1989_v53  ;;  %v2021_v53 = vadd.f32 1.0, %v997_v48  ;;  %v1029_v48 = vld [vmem:[%s3574_s24 + $0x1bc8] sm:$0xff] }
 0x366   : > { %3014 = vst [vmem:[%s3587_s17 + $0x19d0] sm:$0xff] %v1990_v55  ;;  %v2022_v55 = vadd.f32 1.0, %v998_v50  ;;  %v1030_v50 = vld [vmem:[%s3574_s24 + $0x1bd0] sm:$0xff] }
 0x367   : > { %3015 = vst [vmem:[%s3587_s17 + $0x19d8] sm:$0xff] %v1991_v57  ;;  %v2023_v57 = vadd.f32 1.0, %v999_v52  ;;  %v1031_v52 = vld [vmem:[%s3574_s24 + $0x1bd8] sm:$0xff] }
 0x368   : > { %3016 = vst [vmem:[%s3587_s17 + $0x19e0] sm:$0xff] %v1992_v59  ;;  %v2024_v59 = vadd.f32 1.0, %v1000_v54  ;;  %v1032_v54 = vld [vmem:[%s3574_s24 + $0x1be0] sm:$0xff] }
 0x369   : > { %3017 = vst [vmem:[%s3587_s17 + $0x19e8] sm:$0xff] %v1993_v61  ;;  %v2025_v61 = vadd.f32 1.0, %v1001_v56  ;;  %v1033_v56 = vld [vmem:[%s3574_s24 + $0x1be8] sm:$0xff] }
 0x36a   : > { %3018 = vst [vmem:[%s3587_s17 + $0x19f0] sm:$0xff] %v1994_v63  ;;  %v2026_v63 = vadd.f32 1.0, %v1002_v58  ;;  %v1034_v58 = vld [vmem:[%s3574_s24 + $0x1bf0] sm:$0xff] }
 0x36b   : > { %3019 = vst [vmem:[%s3587_s17 + $0x19f8] sm:$0xff] %v1995_v1  ;;  %v2027_v1 = vadd.f32 1.0, %v1003_v60  ;;  %v1035_v60 = vld [vmem:[%s3574_s24 + $0x1bf8] sm:$0xff] }
 0x36c   : > { %3020 = vst [vmem:[%s3587_s17 + $0x1a00] sm:$0xff] %v1996_v3  ;;  %v2028_v3 = vadd.f32 1.0, %v1004_v62  ;;  %v1036_v62 = vld [vmem:[%s3574_s24 + $0x1c00] sm:$0xff] }
 0x36d   : > { %3021 = vst [vmem:[%s3587_s17 + $0x1a08] sm:$0xff] %v1997_v5  ;;  %v2029_v5 = vadd.f32 1.0, %v1005_v0  ;;  %v1037_v0 = vld [vmem:[%s3574_s24 + $0x1c08] sm:$0xff] }
 0x36e   : > { %3022 = vst [vmem:[%s3587_s17 + $0x1a10] sm:$0xff] %v1998_v7  ;;  %v2030_v7 = vadd.f32 1.0, %v1006_v2  ;;  %v1038_v2 = vld [vmem:[%s3574_s24 + $0x1c10] sm:$0xff] }
 0x36f   : > { %3023 = vst [vmem:[%s3587_s17 + $0x1a18] sm:$0xff] %v1999_v9  ;;  %v2031_v9 = vadd.f32 1.0, %v1007_v4  ;;  %v1039_v4 = vld [vmem:[%s3574_s24 + $0x1c18] sm:$0xff] }
 0x370   : > { %3024 = vst [vmem:[%s3587_s17 + $0x1a20] sm:$0xff] %v2000_v11  ;;  %v2032_v11 = vadd.f32 1.0, %v1008_v6  ;;  %v1040_v6 = vld [vmem:[%s3574_s24 + $0x1c20] sm:$0xff] }
 0x371   : > { %3025 = vst [vmem:[%s3587_s17 + $0x1a28] sm:$0xff] %v2001_v13  ;;  %v2033_v13 = vadd.f32 1.0, %v1009_v8  ;;  %v1041_v8 = vld [vmem:[%s3574_s24 + $0x1c28] sm:$0xff] }
 0x372   : > { %3026 = vst [vmem:[%s3587_s17 + $0x1a30] sm:$0xff] %v2002_v15  ;;  %v2034_v15 = vadd.f32 1.0, %v1010_v10  ;;  %v1042_v10 = vld [vmem:[%s3574_s24 + $0x1c30] sm:$0xff] }
 0x373   : > { %3027 = vst [vmem:[%s3587_s17 + $0x1a38] sm:$0xff] %v2003_v17  ;;  %v2035_v17 = vadd.f32 1.0, %v1011_v12  ;;  %v1043_v12 = vld [vmem:[%s3574_s24 + $0x1c38] sm:$0xff] }
 0x374   : > { %3028 = vst [vmem:[%s3587_s17 + $0x1a40] sm:$0xff] %v2004_v19  ;;  %v2036_v19 = vadd.f32 1.0, %v1012_v14  ;;  %v1044_v14 = vld [vmem:[%s3574_s24 + $0x1c40] sm:$0xff] }
 0x375   : > { %3029 = vst [vmem:[%s3587_s17 + $0x1a48] sm:$0xff] %v2005_v21  ;;  %v2037_v21 = vadd.f32 1.0, %v1013_v16  ;;  %v1045_v16 = vld [vmem:[%s3574_s24 + $0x1c48] sm:$0xff] }
 0x376   : > { %3030 = vst [vmem:[%s3587_s17 + $0x1a50] sm:$0xff] %v2006_v23  ;;  %v2038_v23 = vadd.f32 1.0, %v1014_v18  ;;  %v1046_v18 = vld [vmem:[%s3574_s24 + $0x1c50] sm:$0xff] }
 0x377   : > { %3031 = vst [vmem:[%s3587_s17 + $0x1a58] sm:$0xff] %v2007_v25  ;;  %v2039_v25 = vadd.f32 1.0, %v1015_v20  ;;  %v1047_v20 = vld [vmem:[%s3574_s24 + $0x1c58] sm:$0xff] }
 0x378   : > { %3032 = vst [vmem:[%s3587_s17 + $0x1a60] sm:$0xff] %v2008_v27  ;;  %v2040_v27 = vadd.f32 1.0, %v1016_v22  ;;  %v1048_v22 = vld [vmem:[%s3574_s24 + $0x1c60] sm:$0xff] }
 0x379   : > { %3033 = vst [vmem:[%s3587_s17 + $0x1a68] sm:$0xff] %v2009_v29  ;;  %v2041_v29 = vadd.f32 1.0, %v1017_v24  ;;  %v1049_v24 = vld [vmem:[%s3574_s24 + $0x1c68] sm:$0xff] }
 0x37a   : > { %3034 = vst [vmem:[%s3587_s17 + $0x1a70] sm:$0xff] %v2010_v31  ;;  %v2042_v31 = vadd.f32 1.0, %v1018_v26  ;;  %v1050_v26 = vld [vmem:[%s3574_s24 + $0x1c70] sm:$0xff] }
 0x37b   : > { %3035 = vst [vmem:[%s3587_s17 + $0x1a78] sm:$0xff] %v2011_v33  ;;  %v2043_v33 = vadd.f32 1.0, %v1019_v28  ;;  %v1051_v28 = vld [vmem:[%s3574_s24 + $0x1c78] sm:$0xff] }
 0x37c   : > { %3036 = vst [vmem:[%s3587_s17 + $0x1a80] sm:$0xff] %v2012_v35  ;;  %v2044_v35 = vadd.f32 1.0, %v1020_v30  ;;  %v1052_v30 = vld [vmem:[%s3574_s24 + $0x1c80] sm:$0xff] }
 0x37d   : > { %3037 = vst [vmem:[%s3587_s17 + $0x1a88] sm:$0xff] %v2013_v37  ;;  %v2045_v37 = vadd.f32 1.0, %v1021_v32  ;;  %v1053_v32 = vld [vmem:[%s3574_s24 + $0x1c88] sm:$0xff] }
 0x37e   : > { %3038 = vst [vmem:[%s3587_s17 + $0x1a90] sm:$0xff] %v2014_v39  ;;  %v2046_v39 = vadd.f32 1.0, %v1022_v34  ;;  %v1054_v34 = vld [vmem:[%s3574_s24 + $0x1c90] sm:$0xff] }
 0x37f   : > { %3039 = vst [vmem:[%s3587_s17 + $0x1a98] sm:$0xff] %v2015_v41  ;;  %v2047_v41 = vadd.f32 1.0, %v1023_v36  ;;  %v1055_v36 = vld [vmem:[%s3574_s24 + $0x1c98] sm:$0xff] }
 0x380   : > { %3040 = vst [vmem:[%s3587_s17 + $0x1aa0] sm:$0xff] %v2016_v43  ;;  %v2048_v43 = vadd.f32 1.0, %v1024_v38  ;;  %v1056_v38 = vld [vmem:[%s3574_s24 + $0x1ca0] sm:$0xff] }
 0x381   : > { %3041 = vst [vmem:[%s3587_s17 + $0x1aa8] sm:$0xff] %v2017_v45  ;;  %v2049_v45 = vadd.f32 1.0, %v1025_v40  ;;  %v1057_v40 = vld [vmem:[%s3574_s24 + $0x1ca8] sm:$0xff] }
 0x382   : > { %3042 = vst [vmem:[%s3587_s17 + $0x1ab0] sm:$0xff] %v2018_v47  ;;  %v2050_v47 = vadd.f32 1.0, %v1026_v42  ;;  %v1058_v42 = vld [vmem:[%s3574_s24 + $0x1cb0] sm:$0xff] }
 0x383   : > { %3043 = vst [vmem:[%s3587_s17 + $0x1ab8] sm:$0xff] %v2019_v49  ;;  %v2051_v49 = vadd.f32 1.0, %v1027_v44  ;;  %v1059_v44 = vld [vmem:[%s3574_s24 + $0x1cb8] sm:$0xff] }
 0x384   : > { %3044 = vst [vmem:[%s3587_s17 + $0x1ac0] sm:$0xff] %v2020_v51  ;;  %v2052_v51 = vadd.f32 1.0, %v1028_v46  ;;  %v1060_v46 = vld [vmem:[%s3574_s24 + $0x1cc0] sm:$0xff] }
 0x385   : > { %3045 = vst [vmem:[%s3587_s17 + $0x1ac8] sm:$0xff] %v2021_v53  ;;  %v2053_v53 = vadd.f32 1.0, %v1029_v48  ;;  %v1061_v48 = vld [vmem:[%s3574_s24 + $0x1cc8] sm:$0xff] }
 0x386   : > { %3046 = vst [vmem:[%s3587_s17 + $0x1ad0] sm:$0xff] %v2022_v55  ;;  %v2054_v55 = vadd.f32 1.0, %v1030_v50  ;;  %v1062_v50 = vld [vmem:[%s3574_s24 + $0x1cd0] sm:$0xff] }
 0x387   : > { %3047 = vst [vmem:[%s3587_s17 + $0x1ad8] sm:$0xff] %v2023_v57  ;;  %v2055_v57 = vadd.f32 1.0, %v1031_v52  ;;  %v1063_v52 = vld [vmem:[%s3574_s24 + $0x1cd8] sm:$0xff] }
 0x388   : > { %3048 = vst [vmem:[%s3587_s17 + $0x1ae0] sm:$0xff] %v2024_v59  ;;  %v2056_v59 = vadd.f32 1.0, %v1032_v54  ;;  %v1064_v54 = vld [vmem:[%s3574_s24 + $0x1ce0] sm:$0xff] }
 0x389   : > { %3049 = vst [vmem:[%s3587_s17 + $0x1ae8] sm:$0xff] %v2025_v61  ;;  %v2057_v61 = vadd.f32 1.0, %v1033_v56  ;;  %v1065_v56 = vld [vmem:[%s3574_s24 + $0x1ce8] sm:$0xff] }
 0x38a   : > { %3050 = vst [vmem:[%s3587_s17 + $0x1af0] sm:$0xff] %v2026_v63  ;;  %v2058_v63 = vadd.f32 1.0, %v1034_v58  ;;  %v1066_v58 = vld [vmem:[%s3574_s24 + $0x1cf0] sm:$0xff] }
 0x38b   : > { %3051 = vst [vmem:[%s3587_s17 + $0x1af8] sm:$0xff] %v2027_v1  ;;  %v2059_v1 = vadd.f32 1.0, %v1035_v60  ;;  %v1067_v60 = vld [vmem:[%s3574_s24 + $0x1cf8] sm:$0xff] }
 0x38c   : > { %3052 = vst [vmem:[%s3587_s17 + $0x1b00] sm:$0xff] %v2028_v3  ;;  %v2060_v3 = vadd.f32 1.0, %v1036_v62  ;;  %v1068_v62 = vld [vmem:[%s3574_s24 + $0x1d00] sm:$0xff] }
 0x38d   : > { %3053 = vst [vmem:[%s3587_s17 + $0x1b08] sm:$0xff] %v2029_v5  ;;  %v2061_v5 = vadd.f32 1.0, %v1037_v0  ;;  %v1069_v0 = vld [vmem:[%s3574_s24 + $0x1d08] sm:$0xff] }
 0x38e   : > { %3054 = vst [vmem:[%s3587_s17 + $0x1b10] sm:$0xff] %v2030_v7  ;;  %v2062_v7 = vadd.f32 1.0, %v1038_v2  ;;  %v1070_v2 = vld [vmem:[%s3574_s24 + $0x1d10] sm:$0xff] }
 0x38f   : > { %3055 = vst [vmem:[%s3587_s17 + $0x1b18] sm:$0xff] %v2031_v9  ;;  %v2063_v9 = vadd.f32 1.0, %v1039_v4  ;;  %v1071_v4 = vld [vmem:[%s3574_s24 + $0x1d18] sm:$0xff] }
 0x390   : > { %3056 = vst [vmem:[%s3587_s17 + $0x1b20] sm:$0xff] %v2032_v11  ;;  %v2064_v11 = vadd.f32 1.0, %v1040_v6  ;;  %v1072_v6 = vld [vmem:[%s3574_s24 + $0x1d20] sm:$0xff] }
 0x391   : > { %3057 = vst [vmem:[%s3587_s17 + $0x1b28] sm:$0xff] %v2033_v13  ;;  %v2065_v13 = vadd.f32 1.0, %v1041_v8  ;;  %v1073_v8 = vld [vmem:[%s3574_s24 + $0x1d28] sm:$0xff] }
 0x392   : > { %3058 = vst [vmem:[%s3587_s17 + $0x1b30] sm:$0xff] %v2034_v15  ;;  %v2066_v15 = vadd.f32 1.0, %v1042_v10  ;;  %v1074_v10 = vld [vmem:[%s3574_s24 + $0x1d30] sm:$0xff] }
 0x393   : > { %3059 = vst [vmem:[%s3587_s17 + $0x1b38] sm:$0xff] %v2035_v17  ;;  %v2067_v17 = vadd.f32 1.0, %v1043_v12  ;;  %v1075_v12 = vld [vmem:[%s3574_s24 + $0x1d38] sm:$0xff] }
 0x394   : > { %3060 = vst [vmem:[%s3587_s17 + $0x1b40] sm:$0xff] %v2036_v19  ;;  %v2068_v19 = vadd.f32 1.0, %v1044_v14  ;;  %v1076_v14 = vld [vmem:[%s3574_s24 + $0x1d40] sm:$0xff] }
 0x395   : > { %3061 = vst [vmem:[%s3587_s17 + $0x1b48] sm:$0xff] %v2037_v21  ;;  %v2069_v21 = vadd.f32 1.0, %v1045_v16  ;;  %v1077_v16 = vld [vmem:[%s3574_s24 + $0x1d48] sm:$0xff] }
 0x396   : > { %3062 = vst [vmem:[%s3587_s17 + $0x1b50] sm:$0xff] %v2038_v23  ;;  %v2070_v23 = vadd.f32 1.0, %v1046_v18  ;;  %v1078_v18 = vld [vmem:[%s3574_s24 + $0x1d50] sm:$0xff] }
 0x397   : > { %3063 = vst [vmem:[%s3587_s17 + $0x1b58] sm:$0xff] %v2039_v25  ;;  %v2071_v25 = vadd.f32 1.0, %v1047_v20  ;;  %v1079_v20 = vld [vmem:[%s3574_s24 + $0x1d58] sm:$0xff] }
 0x398   : > { %3064 = vst [vmem:[%s3587_s17 + $0x1b60] sm:$0xff] %v2040_v27  ;;  %v2072_v27 = vadd.f32 1.0, %v1048_v22  ;;  %v1080_v22 = vld [vmem:[%s3574_s24 + $0x1d60] sm:$0xff] }
 0x399   : > { %3065 = vst [vmem:[%s3587_s17 + $0x1b68] sm:$0xff] %v2041_v29  ;;  %v2073_v29 = vadd.f32 1.0, %v1049_v24  ;;  %v1081_v24 = vld [vmem:[%s3574_s24 + $0x1d68] sm:$0xff] }
 0x39a   : > { %3066 = vst [vmem:[%s3587_s17 + $0x1b70] sm:$0xff] %v2042_v31  ;;  %v2074_v31 = vadd.f32 1.0, %v1050_v26  ;;  %v1082_v26 = vld [vmem:[%s3574_s24 + $0x1d70] sm:$0xff] }
 0x39b   : > { %3067 = vst [vmem:[%s3587_s17 + $0x1b78] sm:$0xff] %v2043_v33  ;;  %v2075_v33 = vadd.f32 1.0, %v1051_v28  ;;  %v1083_v28 = vld [vmem:[%s3574_s24 + $0x1d78] sm:$0xff] }
 0x39c   : > { %3068 = vst [vmem:[%s3587_s17 + $0x1b80] sm:$0xff] %v2044_v35  ;;  %v2076_v35 = vadd.f32 1.0, %v1052_v30  ;;  %v1084_v30 = vld [vmem:[%s3574_s24 + $0x1d80] sm:$0xff] }
 0x39d   : > { %3069 = vst [vmem:[%s3587_s17 + $0x1b88] sm:$0xff] %v2045_v37  ;;  %v2077_v37 = vadd.f32 1.0, %v1053_v32  ;;  %v1085_v32 = vld [vmem:[%s3574_s24 + $0x1d88] sm:$0xff] }
 0x39e   : > { %3070 = vst [vmem:[%s3587_s17 + $0x1b90] sm:$0xff] %v2046_v39  ;;  %v2078_v39 = vadd.f32 1.0, %v1054_v34  ;;  %v1086_v34 = vld [vmem:[%s3574_s24 + $0x1d90] sm:$0xff] }
 0x39f   : > { %3071 = vst [vmem:[%s3587_s17 + $0x1b98] sm:$0xff] %v2047_v41  ;;  %v2079_v41 = vadd.f32 1.0, %v1055_v36  ;;  %v1087_v36 = vld [vmem:[%s3574_s24 + $0x1d98] sm:$0xff] }
 0x3a0   : > { %3072 = vst [vmem:[%s3587_s17 + $0x1ba0] sm:$0xff] %v2048_v43  ;;  %v2080_v43 = vadd.f32 1.0, %v1056_v38  ;;  %v1088_v38 = vld [vmem:[%s3574_s24 + $0x1da0] sm:$0xff] }
 0x3a1   : > { %3073 = vst [vmem:[%s3587_s17 + $0x1ba8] sm:$0xff] %v2049_v45  ;;  %v2081_v45 = vadd.f32 1.0, %v1057_v40  ;;  %v1089_v40 = vld [vmem:[%s3574_s24 + $0x1da8] sm:$0xff] }
 0x3a2   : > { %3074 = vst [vmem:[%s3587_s17 + $0x1bb0] sm:$0xff] %v2050_v47  ;;  %v2082_v47 = vadd.f32 1.0, %v1058_v42  ;;  %v1090_v42 = vld [vmem:[%s3574_s24 + $0x1db0] sm:$0xff] }
 0x3a3   : > { %3075 = vst [vmem:[%s3587_s17 + $0x1bb8] sm:$0xff] %v2051_v49  ;;  %v2083_v49 = vadd.f32 1.0, %v1059_v44  ;;  %v1091_v44 = vld [vmem:[%s3574_s24 + $0x1db8] sm:$0xff] }
 0x3a4   : > { %3076 = vst [vmem:[%s3587_s17 + $0x1bc0] sm:$0xff] %v2052_v51  ;;  %v2084_v51 = vadd.f32 1.0, %v1060_v46  ;;  %v1092_v46 = vld [vmem:[%s3574_s24 + $0x1dc0] sm:$0xff] }
 0x3a5   : > { %3077 = vst [vmem:[%s3587_s17 + $0x1bc8] sm:$0xff] %v2053_v53  ;;  %v2085_v53 = vadd.f32 1.0, %v1061_v48  ;;  %v1093_v48 = vld [vmem:[%s3574_s24 + $0x1dc8] sm:$0xff] }
 0x3a6   : > { %3078 = vst [vmem:[%s3587_s17 + $0x1bd0] sm:$0xff] %v2054_v55  ;;  %v2086_v55 = vadd.f32 1.0, %v1062_v50  ;;  %v1094_v50 = vld [vmem:[%s3574_s24 + $0x1dd0] sm:$0xff] }
 0x3a7   : > { %3079 = vst [vmem:[%s3587_s17 + $0x1bd8] sm:$0xff] %v2055_v57  ;;  %v2087_v57 = vadd.f32 1.0, %v1063_v52  ;;  %v1095_v52 = vld [vmem:[%s3574_s24 + $0x1dd8] sm:$0xff] }
 0x3a8   : > { %3080 = vst [vmem:[%s3587_s17 + $0x1be0] sm:$0xff] %v2056_v59  ;;  %v2088_v59 = vadd.f32 1.0, %v1064_v54  ;;  %v1096_v54 = vld [vmem:[%s3574_s24 + $0x1de0] sm:$0xff] }
 0x3a9   : > { %3081 = vst [vmem:[%s3587_s17 + $0x1be8] sm:$0xff] %v2057_v61  ;;  %v2089_v61 = vadd.f32 1.0, %v1065_v56  ;;  %v1097_v56 = vld [vmem:[%s3574_s24 + $0x1de8] sm:$0xff] }
 0x3aa   : > { %3082 = vst [vmem:[%s3587_s17 + $0x1bf0] sm:$0xff] %v2058_v63  ;;  %v2090_v63 = vadd.f32 1.0, %v1066_v58  ;;  %v1098_v58 = vld [vmem:[%s3574_s24 + $0x1df0] sm:$0xff] }
 0x3ab   : > { %3083 = vst [vmem:[%s3587_s17 + $0x1bf8] sm:$0xff] %v2059_v1  ;;  %v2091_v1 = vadd.f32 1.0, %v1067_v60  ;;  %v1099_v60 = vld [vmem:[%s3574_s24 + $0x1df8] sm:$0xff] }
 0x3ac   : > { %3084 = vst [vmem:[%s3587_s17 + $0x1c00] sm:$0xff] %v2060_v3  ;;  %v2092_v3 = vadd.f32 1.0, %v1068_v62  ;;  %v1100_v62 = vld [vmem:[%s3574_s24 + $0x1e00] sm:$0xff] }
 0x3ad   : > { %3085 = vst [vmem:[%s3587_s17 + $0x1c08] sm:$0xff] %v2061_v5  ;;  %v2093_v5 = vadd.f32 1.0, %v1069_v0  ;;  %v1101_v0 = vld [vmem:[%s3574_s24 + $0x1e08] sm:$0xff] }
 0x3ae   : > { %3086 = vst [vmem:[%s3587_s17 + $0x1c10] sm:$0xff] %v2062_v7  ;;  %v2094_v7 = vadd.f32 1.0, %v1070_v2  ;;  %v1102_v2 = vld [vmem:[%s3574_s24 + $0x1e10] sm:$0xff] }
 0x3af   : > { %3087 = vst [vmem:[%s3587_s17 + $0x1c18] sm:$0xff] %v2063_v9  ;;  %v2095_v9 = vadd.f32 1.0, %v1071_v4  ;;  %v1103_v4 = vld [vmem:[%s3574_s24 + $0x1e18] sm:$0xff] }
 0x3b0   : > { %3088 = vst [vmem:[%s3587_s17 + $0x1c20] sm:$0xff] %v2064_v11  ;;  %v2096_v11 = vadd.f32 1.0, %v1072_v6  ;;  %v1104_v6 = vld [vmem:[%s3574_s24 + $0x1e20] sm:$0xff] }
 0x3b1   : > { %3089 = vst [vmem:[%s3587_s17 + $0x1c28] sm:$0xff] %v2065_v13  ;;  %v2097_v13 = vadd.f32 1.0, %v1073_v8  ;;  %v1105_v8 = vld [vmem:[%s3574_s24 + $0x1e28] sm:$0xff] }
 0x3b2   : > { %3090 = vst [vmem:[%s3587_s17 + $0x1c30] sm:$0xff] %v2066_v15  ;;  %v2098_v15 = vadd.f32 1.0, %v1074_v10  ;;  %v1106_v10 = vld [vmem:[%s3574_s24 + $0x1e30] sm:$0xff] }
 0x3b3   : > { %3091 = vst [vmem:[%s3587_s17 + $0x1c38] sm:$0xff] %v2067_v17  ;;  %v2099_v17 = vadd.f32 1.0, %v1075_v12  ;;  %v1107_v12 = vld [vmem:[%s3574_s24 + $0x1e38] sm:$0xff] }
 0x3b4   : > { %3092 = vst [vmem:[%s3587_s17 + $0x1c40] sm:$0xff] %v2068_v19  ;;  %v2100_v19 = vadd.f32 1.0, %v1076_v14  ;;  %v1108_v14 = vld [vmem:[%s3574_s24 + $0x1e40] sm:$0xff] }
 0x3b5   : > { %3093 = vst [vmem:[%s3587_s17 + $0x1c48] sm:$0xff] %v2069_v21  ;;  %v2101_v21 = vadd.f32 1.0, %v1077_v16  ;;  %v1109_v16 = vld [vmem:[%s3574_s24 + $0x1e48] sm:$0xff] }
 0x3b6   : > { %3094 = vst [vmem:[%s3587_s17 + $0x1c50] sm:$0xff] %v2070_v23  ;;  %v2102_v23 = vadd.f32 1.0, %v1078_v18  ;;  %v1110_v18 = vld [vmem:[%s3574_s24 + $0x1e50] sm:$0xff] }
 0x3b7   : > { %3095 = vst [vmem:[%s3587_s17 + $0x1c58] sm:$0xff] %v2071_v25  ;;  %v2103_v25 = vadd.f32 1.0, %v1079_v20  ;;  %v1111_v20 = vld [vmem:[%s3574_s24 + $0x1e58] sm:$0xff] }
 0x3b8   : > { %3096 = vst [vmem:[%s3587_s17 + $0x1c60] sm:$0xff] %v2072_v27  ;;  %v2104_v27 = vadd.f32 1.0, %v1080_v22  ;;  %v1112_v22 = vld [vmem:[%s3574_s24 + $0x1e60] sm:$0xff] }
 0x3b9   : > { %3097 = vst [vmem:[%s3587_s17 + $0x1c68] sm:$0xff] %v2073_v29  ;;  %v2105_v29 = vadd.f32 1.0, %v1081_v24  ;;  %v1113_v24 = vld [vmem:[%s3574_s24 + $0x1e68] sm:$0xff] }
 0x3ba   : > { %3098 = vst [vmem:[%s3587_s17 + $0x1c70] sm:$0xff] %v2074_v31  ;;  %v2106_v31 = vadd.f32 1.0, %v1082_v26  ;;  %v1114_v26 = vld [vmem:[%s3574_s24 + $0x1e70] sm:$0xff] }
 0x3bb   : > { %3099 = vst [vmem:[%s3587_s17 + $0x1c78] sm:$0xff] %v2075_v33  ;;  %v2107_v33 = vadd.f32 1.0, %v1083_v28  ;;  %v1115_v28 = vld [vmem:[%s3574_s24 + $0x1e78] sm:$0xff] }
 0x3bc   : > { %3100 = vst [vmem:[%s3587_s17 + $0x1c80] sm:$0xff] %v2076_v35  ;;  %v2108_v35 = vadd.f32 1.0, %v1084_v30  ;;  %v1116_v30 = vld [vmem:[%s3574_s24 + $0x1e80] sm:$0xff] }
 0x3bd   : > { %3101 = vst [vmem:[%s3587_s17 + $0x1c88] sm:$0xff] %v2077_v37  ;;  %v2109_v37 = vadd.f32 1.0, %v1085_v32  ;;  %v1117_v32 = vld [vmem:[%s3574_s24 + $0x1e88] sm:$0xff] }
 0x3be   : > { %3102 = vst [vmem:[%s3587_s17 + $0x1c90] sm:$0xff] %v2078_v39  ;;  %v2110_v39 = vadd.f32 1.0, %v1086_v34  ;;  %v1118_v34 = vld [vmem:[%s3574_s24 + $0x1e90] sm:$0xff] }
 0x3bf   : > { %3103 = vst [vmem:[%s3587_s17 + $0x1c98] sm:$0xff] %v2079_v41  ;;  %v2111_v41 = vadd.f32 1.0, %v1087_v36  ;;  %v1119_v36 = vld [vmem:[%s3574_s24 + $0x1e98] sm:$0xff] }
 0x3c0   : > { %3104 = vst [vmem:[%s3587_s17 + $0x1ca0] sm:$0xff] %v2080_v43  ;;  %v2112_v43 = vadd.f32 1.0, %v1088_v38  ;;  %v1120_v38 = vld [vmem:[%s3574_s24 + $0x1ea0] sm:$0xff] }
 0x3c1   : > { %3105 = vst [vmem:[%s3587_s17 + $0x1ca8] sm:$0xff] %v2081_v45  ;;  %v2113_v45 = vadd.f32 1.0, %v1089_v40  ;;  %v1121_v40 = vld [vmem:[%s3574_s24 + $0x1ea8] sm:$0xff] }
 0x3c2   : > { %3106 = vst [vmem:[%s3587_s17 + $0x1cb0] sm:$0xff] %v2082_v47  ;;  %v2114_v47 = vadd.f32 1.0, %v1090_v42  ;;  %v1122_v42 = vld [vmem:[%s3574_s24 + $0x1eb0] sm:$0xff] }
 0x3c3   : > { %3107 = vst [vmem:[%s3587_s17 + $0x1cb8] sm:$0xff] %v2083_v49  ;;  %v2115_v49 = vadd.f32 1.0, %v1091_v44  ;;  %v1123_v44 = vld [vmem:[%s3574_s24 + $0x1eb8] sm:$0xff] }
 0x3c4   : > { %3108 = vst [vmem:[%s3587_s17 + $0x1cc0] sm:$0xff] %v2084_v51  ;;  %v2116_v51 = vadd.f32 1.0, %v1092_v46  ;;  %v1124_v46 = vld [vmem:[%s3574_s24 + $0x1ec0] sm:$0xff] }
 0x3c5   : > { %3109 = vst [vmem:[%s3587_s17 + $0x1cc8] sm:$0xff] %v2085_v53  ;;  %v2117_v53 = vadd.f32 1.0, %v1093_v48  ;;  %v1125_v48 = vld [vmem:[%s3574_s24 + $0x1ec8] sm:$0xff] }
 0x3c6   : > { %3110 = vst [vmem:[%s3587_s17 + $0x1cd0] sm:$0xff] %v2086_v55  ;;  %v2118_v55 = vadd.f32 1.0, %v1094_v50  ;;  %v1126_v50 = vld [vmem:[%s3574_s24 + $0x1ed0] sm:$0xff] }
 0x3c7   : > { %3111 = vst [vmem:[%s3587_s17 + $0x1cd8] sm:$0xff] %v2087_v57  ;;  %v2119_v57 = vadd.f32 1.0, %v1095_v52  ;;  %v1127_v52 = vld [vmem:[%s3574_s24 + $0x1ed8] sm:$0xff] }
 0x3c8   : > { %3112 = vst [vmem:[%s3587_s17 + $0x1ce0] sm:$0xff] %v2088_v59  ;;  %v2120_v59 = vadd.f32 1.0, %v1096_v54  ;;  %v1128_v54 = vld [vmem:[%s3574_s24 + $0x1ee0] sm:$0xff] }
 0x3c9   : > { %3113 = vst [vmem:[%s3587_s17 + $0x1ce8] sm:$0xff] %v2089_v61  ;;  %v2121_v61 = vadd.f32 1.0, %v1097_v56  ;;  %v1129_v56 = vld [vmem:[%s3574_s24 + $0x1ee8] sm:$0xff] }
 0x3ca   : > { %3114 = vst [vmem:[%s3587_s17 + $0x1cf0] sm:$0xff] %v2090_v63  ;;  %v2122_v63 = vadd.f32 1.0, %v1098_v58  ;;  %v1130_v58 = vld [vmem:[%s3574_s24 + $0x1ef0] sm:$0xff] }
 0x3cb   : > { %3115 = vst [vmem:[%s3587_s17 + $0x1cf8] sm:$0xff] %v2091_v1  ;;  %v2123_v1 = vadd.f32 1.0, %v1099_v60  ;;  %v1131_v60 = vld [vmem:[%s3574_s24 + $0x1ef8] sm:$0xff] }
 0x3cc   : > { %3116 = vst [vmem:[%s3587_s17 + $0x1d00] sm:$0xff] %v2092_v3  ;;  %v2124_v3 = vadd.f32 1.0, %v1100_v62  ;;  %v1132_v62 = vld [vmem:[%s3574_s24 + $0x1f00] sm:$0xff] }
 0x3cd   : > { %3117 = vst [vmem:[%s3587_s17 + $0x1d08] sm:$0xff] %v2093_v5  ;;  %v2125_v5 = vadd.f32 1.0, %v1101_v0  ;;  %v1133_v0 = vld [vmem:[%s3574_s24 + $0x1f08] sm:$0xff] }
 0x3ce   : > { %3118 = vst [vmem:[%s3587_s17 + $0x1d10] sm:$0xff] %v2094_v7  ;;  %v2126_v7 = vadd.f32 1.0, %v1102_v2  ;;  %v1134_v2 = vld [vmem:[%s3574_s24 + $0x1f10] sm:$0xff] }
 0x3cf   : > { %3119 = vst [vmem:[%s3587_s17 + $0x1d18] sm:$0xff] %v2095_v9  ;;  %v2127_v9 = vadd.f32 1.0, %v1103_v4  ;;  %v1135_v4 = vld [vmem:[%s3574_s24 + $0x1f18] sm:$0xff] }
 0x3d0   : > { %3120 = vst [vmem:[%s3587_s17 + $0x1d20] sm:$0xff] %v2096_v11  ;;  %v2128_v11 = vadd.f32 1.0, %v1104_v6  ;;  %v1136_v6 = vld [vmem:[%s3574_s24 + $0x1f20] sm:$0xff] }
 0x3d1   : > { %3121 = vst [vmem:[%s3587_s17 + $0x1d28] sm:$0xff] %v2097_v13  ;;  %v2129_v13 = vadd.f32 1.0, %v1105_v8  ;;  %v1137_v8 = vld [vmem:[%s3574_s24 + $0x1f28] sm:$0xff] }
 0x3d2   : > { %3122 = vst [vmem:[%s3587_s17 + $0x1d30] sm:$0xff] %v2098_v15  ;;  %v2130_v15 = vadd.f32 1.0, %v1106_v10  ;;  %v1138_v10 = vld [vmem:[%s3574_s24 + $0x1f30] sm:$0xff] }
 0x3d3   : > { %3123 = vst [vmem:[%s3587_s17 + $0x1d38] sm:$0xff] %v2099_v17  ;;  %v2131_v17 = vadd.f32 1.0, %v1107_v12  ;;  %v1139_v12 = vld [vmem:[%s3574_s24 + $0x1f38] sm:$0xff] }
 0x3d4   : > { %3124 = vst [vmem:[%s3587_s17 + $0x1d40] sm:$0xff] %v2100_v19  ;;  %v2132_v19 = vadd.f32 1.0, %v1108_v14  ;;  %v1140_v14 = vld [vmem:[%s3574_s24 + $0x1f40] sm:$0xff] }
 0x3d5   : > { %3125 = vst [vmem:[%s3587_s17 + $0x1d48] sm:$0xff] %v2101_v21  ;;  %v2133_v21 = vadd.f32 1.0, %v1109_v16  ;;  %v1141_v16 = vld [vmem:[%s3574_s24 + $0x1f48] sm:$0xff] }
 0x3d6   : > { %3126 = vst [vmem:[%s3587_s17 + $0x1d50] sm:$0xff] %v2102_v23  ;;  %v2134_v23 = vadd.f32 1.0, %v1110_v18  ;;  %v1142_v18 = vld [vmem:[%s3574_s24 + $0x1f50] sm:$0xff] }
 0x3d7   : > { %3127 = vst [vmem:[%s3587_s17 + $0x1d58] sm:$0xff] %v2103_v25  ;;  %v2135_v25 = vadd.f32 1.0, %v1111_v20  ;;  %v1143_v20 = vld [vmem:[%s3574_s24 + $0x1f58] sm:$0xff] }
 0x3d8   : > { %3128 = vst [vmem:[%s3587_s17 + $0x1d60] sm:$0xff] %v2104_v27  ;;  %v2136_v27 = vadd.f32 1.0, %v1112_v22  ;;  %v1144_v22 = vld [vmem:[%s3574_s24 + $0x1f60] sm:$0xff] }
 0x3d9   : > { %3129 = vst [vmem:[%s3587_s17 + $0x1d68] sm:$0xff] %v2105_v29  ;;  %v2137_v29 = vadd.f32 1.0, %v1113_v24  ;;  %v1145_v24 = vld [vmem:[%s3574_s24 + $0x1f68] sm:$0xff] }
 0x3da   : > { %3130 = vst [vmem:[%s3587_s17 + $0x1d70] sm:$0xff] %v2106_v31  ;;  %v2138_v31 = vadd.f32 1.0, %v1114_v26  ;;  %v1146_v26 = vld [vmem:[%s3574_s24 + $0x1f70] sm:$0xff] }
 0x3db   : > { %3131 = vst [vmem:[%s3587_s17 + $0x1d78] sm:$0xff] %v2107_v33  ;;  %v2139_v33 = vadd.f32 1.0, %v1115_v28  ;;  %v1147_v28 = vld [vmem:[%s3574_s24 + $0x1f78] sm:$0xff] }
 0x3dc   : > { %3132 = vst [vmem:[%s3587_s17 + $0x1d80] sm:$0xff] %v2108_v35  ;;  %v2140_v35 = vadd.f32 1.0, %v1116_v30  ;;  %v1148_v30 = vld [vmem:[%s3574_s24 + $0x1f80] sm:$0xff] }
 0x3dd   : > { %3133 = vst [vmem:[%s3587_s17 + $0x1d88] sm:$0xff] %v2109_v37  ;;  %v2141_v37 = vadd.f32 1.0, %v1117_v32  ;;  %v1149_v32 = vld [vmem:[%s3574_s24 + $0x1f88] sm:$0xff] }
 0x3de   : > { %3134 = vst [vmem:[%s3587_s17 + $0x1d90] sm:$0xff] %v2110_v39  ;;  %v2142_v39 = vadd.f32 1.0, %v1118_v34  ;;  %v1150_v34 = vld [vmem:[%s3574_s24 + $0x1f90] sm:$0xff] }
 0x3df   : > { %3135 = vst [vmem:[%s3587_s17 + $0x1d98] sm:$0xff] %v2111_v41  ;;  %v2143_v41 = vadd.f32 1.0, %v1119_v36  ;;  %v1151_v36 = vld [vmem:[%s3574_s24 + $0x1f98] sm:$0xff] }
 0x3e0   : > { %3136 = vst [vmem:[%s3587_s17 + $0x1da0] sm:$0xff] %v2112_v43  ;;  %v2144_v43 = vadd.f32 1.0, %v1120_v38  ;;  %v1152_v38 = vld [vmem:[%s3574_s24 + $0x1fa0] sm:$0xff] }
 0x3e1   : > { %3137 = vst [vmem:[%s3587_s17 + $0x1da8] sm:$0xff] %v2113_v45  ;;  %v2145_v45 = vadd.f32 1.0, %v1121_v40  ;;  %v1153_v40 = vld [vmem:[%s3574_s24 + $0x1fa8] sm:$0xff] }
 0x3e2   : > { %3138 = vst [vmem:[%s3587_s17 + $0x1db0] sm:$0xff] %v2114_v47  ;;  %v2146_v47 = vadd.f32 1.0, %v1122_v42  ;;  %v1154_v42 = vld [vmem:[%s3574_s24 + $0x1fb0] sm:$0xff] }
 0x3e3   : > { %3139 = vst [vmem:[%s3587_s17 + $0x1db8] sm:$0xff] %v2115_v49  ;;  %v2147_v49 = vadd.f32 1.0, %v1123_v44  ;;  %v1155_v44 = vld [vmem:[%s3574_s24 + $0x1fb8] sm:$0xff] }
 0x3e4   : > { %3140 = vst [vmem:[%s3587_s17 + $0x1dc0] sm:$0xff] %v2116_v51  ;;  %v2148_v51 = vadd.f32 1.0, %v1124_v46  ;;  %v1156_v46 = vld [vmem:[%s3574_s24 + $0x1fc0] sm:$0xff] }
 0x3e5   : > { %3141 = vst [vmem:[%s3587_s17 + $0x1dc8] sm:$0xff] %v2117_v53  ;;  %v2149_v53 = vadd.f32 1.0, %v1125_v48  ;;  %v1157_v48 = vld [vmem:[%s3574_s24 + $0x1fc8] sm:$0xff] }
 0x3e6   : > { %3142 = vst [vmem:[%s3587_s17 + $0x1dd0] sm:$0xff] %v2118_v55  ;;  %v2150_v55 = vadd.f32 1.0, %v1126_v50  ;;  %v1158_v50 = vld [vmem:[%s3574_s24 + $0x1fd0] sm:$0xff] }
 0x3e7   : > { %3143 = vst [vmem:[%s3587_s17 + $0x1dd8] sm:$0xff] %v2119_v57  ;;  %v2151_v57 = vadd.f32 1.0, %v1127_v52  ;;  %v1159_v52 = vld [vmem:[%s3574_s24 + $0x1fd8] sm:$0xff] }
 0x3e8   : > { %3144 = vst [vmem:[%s3587_s17 + $0x1de0] sm:$0xff] %v2120_v59  ;;  %v2152_v59 = vadd.f32 1.0, %v1128_v54  ;;  %v1160_v54 = vld [vmem:[%s3574_s24 + $0x1fe0] sm:$0xff] }
 0x3e9   : > { %3145 = vst [vmem:[%s3587_s17 + $0x1de8] sm:$0xff] %v2121_v61  ;;  %v2153_v61 = vadd.f32 1.0, %v1129_v56  ;;  %v1161_v56 = vld [vmem:[%s3574_s24 + $0x1fe8] sm:$0xff] }
 0x3ea   : > { %3146 = vst [vmem:[%s3587_s17 + $0x1df0] sm:$0xff] %v2122_v63  ;;  %v2154_v63 = vadd.f32 1.0, %v1130_v58  ;;  %v1162_v58 = vld [vmem:[%s3574_s24 + $0x1ff0] sm:$0xff] }
 0x3eb   : > { %3147 = vst [vmem:[%s3587_s17 + $0x1df8] sm:$0xff] %v2123_v1  ;;  %v2155_v1 = vadd.f32 1.0, %v1131_v60  ;;  %v1163_v60 = vld [vmem:[%s3574_s24 + $0x1ff8] sm:$0xff] }
 0x3ec   : > { %3148 = vst [vmem:[%s3587_s17 + $0x1e00] sm:$0xff] %v2124_v3  ;;  %v2156_v3 = vadd.f32 1.0, %v1132_v62  ;;  %v2186_v62 = vadd.f32 1.0, %v1162_v58 }
 0x3ed   : > { %3149 = vst [vmem:[%s3587_s17 + $0x1e08] sm:$0xff] %v2125_v5  ;;  %v2157_v5 = vadd.f32 1.0, %v1133_v0 }
 0x3ee   : > { %3150 = vst [vmem:[%s3587_s17 + $0x1e10] sm:$0xff] %v2126_v7  ;;  %v2158_v7 = vadd.f32 1.0, %v1134_v2 }
 0x3ef   : > { %3151 = vst [vmem:[%s3587_s17 + $0x1e18] sm:$0xff] %v2127_v9  ;;  %v2159_v9 = vadd.f32 1.0, %v1135_v4 }
 0x3f0   : > { %3152 = vst [vmem:[%s3587_s17 + $0x1e20] sm:$0xff] %v2128_v11  ;;  %v2160_v11 = vadd.f32 1.0, %v1136_v6 }
 0x3f1   : > { %3153 = vst [vmem:[%s3587_s17 + $0x1e28] sm:$0xff] %v2129_v13  ;;  %v2161_v13 = vadd.f32 1.0, %v1137_v8 }
 0x3f2   : > { %3154 = vst [vmem:[%s3587_s17 + $0x1e30] sm:$0xff] %v2130_v15  ;;  %v2162_v15 = vadd.f32 1.0, %v1138_v10 }
 0x3f3   : > { %3155 = vst [vmem:[%s3587_s17 + $0x1e38] sm:$0xff] %v2131_v17  ;;  %v2163_v17 = vadd.f32 1.0, %v1139_v12 }
 0x3f4   : > { %3156 = vst [vmem:[%s3587_s17 + $0x1e40] sm:$0xff] %v2132_v19  ;;  %v2164_v19 = vadd.f32 1.0, %v1140_v14 }
 0x3f5   : > { %3157 = vst [vmem:[%s3587_s17 + $0x1e48] sm:$0xff] %v2133_v21  ;;  %v2165_v21 = vadd.f32 1.0, %v1141_v16 }
 0x3f6   : > { %3158 = vst [vmem:[%s3587_s17 + $0x1e50] sm:$0xff] %v2134_v23  ;;  %v2166_v23 = vadd.f32 1.0, %v1142_v18 }
 0x3f7   : > { %3159 = vst [vmem:[%s3587_s17 + $0x1e58] sm:$0xff] %v2135_v25  ;;  %v2167_v25 = vadd.f32 1.0, %v1143_v20 }
 0x3f8   : > { %3160 = vst [vmem:[%s3587_s17 + $0x1e60] sm:$0xff] %v2136_v27  ;;  %v2168_v27 = vadd.f32 1.0, %v1144_v22 }
 0x3f9   : > { %3161 = vst [vmem:[%s3587_s17 + $0x1e68] sm:$0xff] %v2137_v29  ;;  %v2169_v29 = vadd.f32 1.0, %v1145_v24 }
 0x3fa   : > { %3162 = vst [vmem:[%s3587_s17 + $0x1e70] sm:$0xff] %v2138_v31  ;;  %v2170_v31 = vadd.f32 1.0, %v1146_v26 }
 0x3fb   : > { %3163 = vst [vmem:[%s3587_s17 + $0x1e78] sm:$0xff] %v2139_v33  ;;  %v2171_v33 = vadd.f32 1.0, %v1147_v28 }
 0x3fc   : > { %3164 = vst [vmem:[%s3587_s17 + $0x1e80] sm:$0xff] %v2140_v35  ;;  %v2172_v35 = vadd.f32 1.0, %v1148_v30 }
 0x3fd   : > { %3165 = vst [vmem:[%s3587_s17 + $0x1e88] sm:$0xff] %v2141_v37  ;;  %v2173_v37 = vadd.f32 1.0, %v1149_v32 }
 0x3fe   : > { %3166 = vst [vmem:[%s3587_s17 + $0x1e90] sm:$0xff] %v2142_v39  ;;  %v2174_v39 = vadd.f32 1.0, %v1150_v34 }
 0x3ff   : > { %3167 = vst [vmem:[%s3587_s17 + $0x1e98] sm:$0xff] %v2143_v41  ;;  %v2175_v41 = vadd.f32 1.0, %v1151_v36 }
 0x400   : > { %3168 = vst [vmem:[%s3587_s17 + $0x1ea0] sm:$0xff] %v2144_v43  ;;  %v2176_v43 = vadd.f32 1.0, %v1152_v38 }
 0x401   : > { %3169 = vst [vmem:[%s3587_s17 + $0x1ea8] sm:$0xff] %v2145_v45  ;;  %v2177_v45 = vadd.f32 1.0, %v1153_v40 }
 0x402   : > { %3170 = vst [vmem:[%s3587_s17 + $0x1eb0] sm:$0xff] %v2146_v47  ;;  %v2178_v47 = vadd.f32 1.0, %v1154_v42 }
 0x403   : > { %3171 = vst [vmem:[%s3587_s17 + $0x1eb8] sm:$0xff] %v2147_v49  ;;  %v2179_v49 = vadd.f32 1.0, %v1155_v44 }
 0x404   : > { %3172 = vst [vmem:[%s3587_s17 + $0x1ec0] sm:$0xff] %v2148_v51  ;;  %v2180_v51 = vadd.f32 1.0, %v1156_v46 }
 0x405   : > { %3173 = vst [vmem:[%s3587_s17 + $0x1ec8] sm:$0xff] %v2149_v53  ;;  %v2181_v53 = vadd.f32 1.0, %v1157_v48 }
 0x406   : > { %3174 = vst [vmem:[%s3587_s17 + $0x1ed0] sm:$0xff] %v2150_v55  ;;  %v2182_v55 = vadd.f32 1.0, %v1158_v50 }
 0x407   : > { %3175 = vst [vmem:[%s3587_s17 + $0x1ed8] sm:$0xff] %v2151_v57  ;;  %v2183_v57 = vadd.f32 1.0, %v1159_v52 }
 0x408   : > { %3176 = vst [vmem:[%s3587_s17 + $0x1ee0] sm:$0xff] %v2152_v59  ;;  %v2184_v59 = vadd.f32 1.0, %v1160_v54 }
 0x409   : > { %3177 = vst [vmem:[%s3587_s17 + $0x1ee8] sm:$0xff] %v2153_v61  ;;  %v2185_v61 = vadd.f32 1.0, %v1161_v56 }
 0x40a   : > { %3178 = vst [vmem:[%s3587_s17 + $0x1ef0] sm:$0xff] %v2154_v63  ;;  %v2187_v63 = vadd.f32 1.0, %v1163_v60 }
 0x40b   : > { %3179 = vst [vmem:[%s3587_s17 + $0x1ef8] sm:$0xff] %v2155_v1 }
 0x40c   : > { %3180 = vst [vmem:[%s3587_s17 + $0x1f00] sm:$0xff] %v2156_v3 }
 0x40d   : > { %3181 = vst [vmem:[%s3587_s17 + $0x1f08] sm:$0xff] %v2157_v5 }
 0x40e   : > { %3182 = vst [vmem:[%s3587_s17 + $0x1f10] sm:$0xff] %v2158_v7 }
 0x40f   : > { %3183 = vst [vmem:[%s3587_s17 + $0x1f18] sm:$0xff] %v2159_v9 }
 0x410   : > { %3184 = vst [vmem:[%s3587_s17 + $0x1f20] sm:$0xff] %v2160_v11 }
 0x411   : > { %3185 = vst [vmem:[%s3587_s17 + $0x1f28] sm:$0xff] %v2161_v13 }
 0x412   : > { %3186 = vst [vmem:[%s3587_s17 + $0x1f30] sm:$0xff] %v2162_v15 }
 0x413   : > { %3187 = vst [vmem:[%s3587_s17 + $0x1f38] sm:$0xff] %v2163_v17 }
 0x414   : > { %3188 = vst [vmem:[%s3587_s17 + $0x1f40] sm:$0xff] %v2164_v19 }
 0x415   : > { %3189 = vst [vmem:[%s3587_s17 + $0x1f48] sm:$0xff] %v2165_v21 }
 0x416   : > { %3190 = vst [vmem:[%s3587_s17 + $0x1f50] sm:$0xff] %v2166_v23 }
 0x417   : > { %3191 = vst [vmem:[%s3587_s17 + $0x1f58] sm:$0xff] %v2167_v25 }
 0x418   : > { %3192 = vst [vmem:[%s3587_s17 + $0x1f60] sm:$0xff] %v2168_v27 }
 0x419   : > { %3193 = vst [vmem:[%s3587_s17 + $0x1f68] sm:$0xff] %v2169_v29 }
 0x41a   : > { %3194 = vst [vmem:[%s3587_s17 + $0x1f70] sm:$0xff] %v2170_v31 }
 0x41b   : > { %3195 = vst [vmem:[%s3587_s17 + $0x1f78] sm:$0xff] %v2171_v33 }
 0x41c   : > { %3196 = vst [vmem:[%s3587_s17 + $0x1f80] sm:$0xff] %v2172_v35 }
 0x41d   : > { %3197 = vst [vmem:[%s3587_s17 + $0x1f88] sm:$0xff] %v2173_v37 }
 0x41e   : > { %3198 = vst [vmem:[%s3587_s17 + $0x1f90] sm:$0xff] %v2174_v39 }
 0x41f   : > { %3199 = vst [vmem:[%s3587_s17 + $0x1f98] sm:$0xff] %v2175_v41 }
 0x420   : > { %3200 = vst [vmem:[%s3587_s17 + $0x1fa0] sm:$0xff] %v2176_v43 }
 0x421   : > { %3201 = vst [vmem:[%s3587_s17 + $0x1fa8] sm:$0xff] %v2177_v45 }
 0x422   : > { %3202 = vst [vmem:[%s3587_s17 + $0x1fb0] sm:$0xff] %v2178_v47 }
 0x423   : > { %3203 = vst [vmem:[%s3587_s17 + $0x1fb8] sm:$0xff] %v2179_v49 }
 0x424   : > { %3204 = vst [vmem:[%s3587_s17 + $0x1fc0] sm:$0xff] %v2180_v51 }
 0x425   : > { %3205 = vst [vmem:[%s3587_s17 + $0x1fc8] sm:$0xff] %v2181_v53 }
 0x426   : > { %3206 = vst [vmem:[%s3587_s17 + $0x1fd0] sm:$0xff] %v2182_v55 }
 0x427   : > { %3207 = vst [vmem:[%s3587_s17 + $0x1fd8] sm:$0xff] %v2183_v57 }
 0x428   : > { %3208 = vst [vmem:[%s3587_s17 + $0x1fe0] sm:$0xff] %v2184_v59 }
 0x429   : > { %3209 = vst [vmem:[%s3587_s17 + $0x1fe8] sm:$0xff] %v2185_v61 }
 0x42a   : > { %3210 = vst [vmem:[%s3587_s17 + $0x1ff0] sm:$0xff] %v2186_v62 }
 0x42b   : > { %3211 = vst [vmem:[%s3587_s17 + $0x1ff8] sm:$0xff] %v2187_v63 }
 0x42c   : > { %3429 = shalt.err (!%p3426_p4)
}
 0x42d   : > { %s3472_s16 = smov 1024   ;;  %s3473_s20 = smov 64  }
 0x42e   : > { %3324 = dma.vmem_to_hbm [thread:$0]  (%p3534_p11), %s3227_s10, 131072, %s3229_s29, %s3213_s30, %s3472_s16, %s3472_s16, %s3473_s20  }
 0x42f PF: > { %s3243_s21 = sand.u32 1, %s3456_s6   ;;  %p5671_p7 = scmp.ge.s32.totalorder %s3468_s9, 2 }
 0x430   : > { %s3244_s22 = scalar_lea.sflag [#allocation4], %s3243_s21 }
 0x431   : > { %p3331_p5 = pnand %p5671_p7, %p3538_p12 }
 0x433   : > { %p3332_p8 = pneg %p3331_p5 }
 0x435   : > { %3451 = dma.done.wait (%p3332_p8), %s3244_s22, 131072  }
 0x436   : > { %3453 = vsyncadd (%p3332_p8), %s3244_s22, 4294836224  ;;  %p14_p10 = scmp.ge.s32.totalorder %s3509_s12, 4   ;;  %s5672_s6 = smov %s3460_s7 }
 0x437   : > { %s5673_s7 = smov %s3464_s8  ;;  %s5674_s8 = smov %s3521_s15 }
 0x438   : > { %s5675_s9 = smov %s3509_s12  ;;  %16 = sbr.rel (!%p14_p10) target bundleno = 5 (0x5), region = 69 }
 0x43d   :  { %3250 = vsyncpa [#allocation3], 1 }
 0x43e   :  { %3252 = vsyncpa [#allocation3 + $0x1], 1 }
 0x43f   :  { %3253 = vsyncpa [#allocation4], 1 }
 0x440   :  { %3255 = vsyncpa [#allocation4 + $0x1], 1 }

</bundles_post_ra>
